<compile_context>
chip_gen: v6e
topology: v6e:2x2x1
jax: 0.10.0
libtpu: 0.0.40
codegen_flags: <defaults>
</compile_context>

<pallas_src>
import functools

import jax
import jax.numpy as jnp
from jax import lax
from jax.experimental import pallas as pl
from jax.experimental.pallas import tpu as pltpu

K = 5            # conv kernel size (both conv layers)
CONV_CH = 128    # conv output channels (both conv layers)
HIDDEN = 512     # FC hidden width (per head)


def _round_up(n, m):
    return ((n + m - 1) // m) * m


def _batch_tile(b):
    """Largest convenient batch tile (whole batch for small B)."""
    if b <= 32:
        return b
    for t in (32, 16, 8):
        if b % t == 0:
            return t
    return b


# ---------------------------------------------------------------------------
# Fused kernel: conv1 -> ReLU -> conv2 -> ReLU -> flatten -> dueling heads.
# Activations are channel-last so channels / hidden units sit on the lane axis.
# ---------------------------------------------------------------------------
def _fused_kernel(l2, cols_ref, w1_ref, b1_ref, w2_ref, b2_ref,
                  wh1_ref, bh1_ref, wh2_ref, bh2_ref, o_ref):
    bt = o_ref.shape[0]                  # batch tile
    l1p = cols_ref.shape[0] // bt        # conv1 output length, padded to mult of 8
    ch = w1_ref.shape[1]                 # 128 conv channels
    mxu_dtype = w1_ref.dtype             # bf16 operands, f32 accumulation

    # ---- conv1: one (bt*l1p, C*K) @ (C*K, 128) MXU matmul -------------------
    c1 = cols_ref[...].astype(mxu_dtype)
    h1 = jnp.dot(c1, w1_ref[...], preferred_element_type=jnp.float32)
    h1 = jnp.maximum(h1 + b1_ref[...], 0.0)            # (bt*l1p, 128), f32
    h1 = h1.reshape(bt, l1p, ch)                        # tile-aligned unfold

    # ---- conv2: im2col of the K taps via 128-lane-aligned concat, one matmul
    c2 = jnp.concatenate([h1[:, k:k + l2, :] for k in range(K)], axis=-1)
    c2 = c2.reshape(bt * l2, K * ch).astype(mxu_dtype)  # (bt*l2, K*128)
    h2 = jnp.dot(c2, w2_ref[...], preferred_element_type=jnp.float32)
    h2 = jnp.maximum(h2 + b2_ref[...], 0.0)             # (bt*l2, 128), f32
    h2 = h2.reshape(bt, l2, ch)

    # ---- flatten channel-last (FC weight rows were permuted to match) -------
    feat = jnp.concatenate([h2[:, l, :] for l in range(l2)], axis=-1)  # (bt, l2*128)

    # ---- fused dueling heads: two matmuls instead of four -------------------
    hh = jnp.dot(feat.astype(mxu_dtype), wh1_ref[...],
                 preferred_element_type=jnp.float32)
    hh = jnp.maximum(hh + bh1_ref[...], 0.0)            # (bt, 2*HIDDEN)
    o2 = jnp.dot(hh.astype(mxu_dtype), wh2_ref[...],
                 preferred_element_type=jnp.float32) + bh2_ref[...]    # (bt, 1+A)

    val = o2[:, 0:1]
    adv = o2[:, 1:]
    o_ref[...] = val + (adv - jnp.mean(adv, axis=1, keepdims=True))


# ---------------------------------------------------------------------------
# Wrapper: tiny XLA im2col of the raw input + one fused pallas_call.
# ---------------------------------------------------------------------------
@jax.jit
def dqn_conv1d_forward(x, kp):
    B, C, L = x.shape
    L1 = L - K + 1
    L2 = L1 - K + 1
    L1P = _round_up(L1, 8)               # keep in-kernel batch folds tile aligned
    A = kp["wh2"].shape[1] - 1
    KC = K * C
    bt = _batch_tile(B)
    nb = B // bt

    # conv1 im2col: (B, C, L) -> (B*L1P, K*C), columns ordered (k, c).
    xt = jnp.transpose(x, (0, 2, 1))                                  # (B, L, C)
    cols = jnp.concatenate([xt[:, k:k + L1, :] for k in range(K)], axis=-1)
    cols = jnp.pad(cols, ((0, 0), (0, L1P - L1), (0, 0)))             # (B, L1P, K*C)
    cols = cols.reshape(B * L1P, KC)

    return pl.pallas_call(
        functools.partial(_fused_kernel, L2),
        grid=(nb,),
        in_specs=[
            pl.BlockSpec((bt * L1P, KC), lambda b: (b, 0)),
            pl.BlockSpec((KC, CONV_CH), lambda b: (0, 0)),
            pl.BlockSpec((1, CONV_CH), lambda b: (0, 0)),
            pl.BlockSpec((K * CONV_CH, CONV_CH), lambda b: (0, 0)),
            pl.BlockSpec((1, CONV_CH), lambda b: (0, 0)),
            pl.BlockSpec((CONV_CH * L2, 2 * HIDDEN), lambda b: (0, 0)),
            pl.BlockSpec((1, 2 * HIDDEN), lambda b: (0, 0)),
            pl.BlockSpec((2 * HIDDEN, 1 + A), lambda b: (0, 0)),
            pl.BlockSpec((1, 1 + A), lambda b: (0, 0)),
        ],
        out_specs=pl.BlockSpec((bt, A), lambda b: (b, 0)),
        out_shape=jax.ShapeDtypeStruct((B, A), jnp.float32),
        compiler_params=pltpu.CompilerParams(dimension_semantics=("parallel",)),
    )(cols, kp["w1f"], kp["b1"], kp["w2f"], kp["b2"],
      kp["wh1"], kp["bh1"], kp["wh2"], kp["bh2"])


# ---------------------------------------------------------------------------
# Parameter init (torch layouts / torch-style init) + one-time kernel repack.
# ---------------------------------------------------------------------------
def init_params(key, in_channels, length, action_space):
    L1 = length - K + 1
    L2 = L1 - K + 1
    out_size = CONV_CH * L2

    def uni(k, shape, fan_in):
        bound = 1.0 / jnp.sqrt(float(fan_in))
        return jax.random.uniform(k, shape, jnp.float32, -bound, bound)

    ks = jax.random.split(key, 12)
    return {
        "w1": uni(ks[0], (CONV_CH, in_channels, K), in_channels * K),
        "b1": uni(ks[1], (CONV_CH,), in_channels * K),
        "w2": uni(ks[2], (CONV_CH, CONV_CH, K), CONV_CH * K),
        "b2": uni(ks[3], (CONV_CH,), CONV_CH * K),
        # FC weights stored pre-transposed: (in_features, out_features)
        "wv1_t": uni(ks[4], (out_size, HIDDEN), out_size),
        "bv1": uni(ks[5], (HIDDEN,), out_size),
        "wv2_t": uni(ks[6], (HIDDEN, 1), HIDDEN),
        "bv2": uni(ks[7], (1,), HIDDEN),
        "wa1_t": uni(ks[8], (out_size, HIDDEN), out_size),
        "ba1": uni(ks[9], (HIDDEN,), out_size),
        "wa2_t": uni(ks[10], (HIDDEN, action_space), HIDDEN),
        "ba2": uni(ks[11], (action_space,), HIDDEN),
    }


def prepare_params(p, l2, mxu_dtype=jnp.bfloat16):
    """One-time (free) repack of torch-layout params into kernel layouts."""
    ch = p["w1"].shape[0]
    hidden = p["wv1_t"].shape[1]
    a = p["wa2_t"].shape[1]

    # Conv weights flattened so the contraction index is (k, c).
    w1f = jnp.transpose(p["w1"], (2, 1, 0)).reshape(-1, ch)       # (K*C_in, 128)
    w2f = jnp.transpose(p["w2"], (2, 1, 0)).reshape(-1, ch)       # (K*128, 128)

    # torch flatten index is c*L2 + l; kernel's channel-last flatten is l*CH + c
    # -> permute FC weight rows accordingly (free, done once).
    def permute_rows(w):
        return (w.reshape(ch, l2, w.shape[1])
                 .transpose(1, 0, 2)
                 .reshape(ch * l2, w.shape[1]))

    wh1 = jnp.concatenate([permute_rows(p["wv1_t"]), permute_rows(p["wa1_t"])],
                          axis=1)                                 # (out, 2*HIDDEN)
    bh1 = jnp.concatenate([p["bv1"], p["ba1"]])[None, :]

    # Block-diagonal layer 2: column 0 = value head, columns 1.. = advantage.
    wh2 = jnp.zeros((2 * hidden, 1 + a), jnp.float32)
    wh2 = wh2.at[:hidden, 0:1].set(p["wv2_t"]).at[hidden:, 1:].set(p["wa2_t"])
    bh2 = jnp.concatenate([p["bv2"], p["ba2"]])[None, :]

    f32 = jnp.float32
    return {
        "w1f": w1f.astype(mxu_dtype), "b1": p["b1"][None, :].astype(f32),
        "w2f": w2f.astype(mxu_dtype), "b2": p["b2"][None, :].astype(f32),
        "wh1": wh1.astype(mxu_dtype), "bh1": bh1.astype(f32),
        "wh2": wh2.astype(mxu_dtype), "bh2": bh2.astype(f32),
    }


def reference_forward(x, params):
    """Pure-JAX f32 reference matching the PyTorch module."""
    dn = ("NCH", "OIH", "NCH")
    h = lax.conv_general_dilated(x, params["w1"], (1,), "VALID",
                                 dimension_numbers=dn)
    h = jnp.maximum(h + params["b1"][None, :, None], 0.0)
    h = lax.conv_general_dilated(h, params["w2"], (1,), "VALID",
                                 dimension_numbers=dn)
    h = jnp.maximum(h + params["b2"][None, :, None], 0.0)
    feat = h.reshape(x.shape[0], -1)
    v = jnp.maximum(feat @ params["wv1_t"] + params["bv1"], 0.0) @ params["wv2_t"] + params["bv2"]
    a = jnp.maximum(feat @ params["wa1_t"] + params["ba1"], 0.0) @ params["wa2_t"] + params["ba2"]
    return v + (a - a.mean(axis=1, keepdims=True))


if __name__ == "__main__":
    B, C, L, A = 2, 4, 16, 4          # input_shape=(4, 16), action_space=4
    L2 = L - 2 * (K - 1)

    key = jax.random.PRNGKey(0)
    k_x, k_p = jax.random.split(key)
    x = jax.random.normal(k_x, (B, C, L), jnp.float32)
    params = init_params(k_p, C, L, A)
    kparams = prepare_params(params, L2)

    out = jax.block_until_ready(dqn_conv1d_forward(x, kparams))
    ref = jax.block_until_ready(reference_forward(x, params))

    assert out.shape == (B, A), out.shape
    # bf16 MXU operands with f32 accumulation vs. a pure-f32 reference.
    assert jnp.allclose(out, ref, rtol=2e-2, atol=2e-2), (out, ref)

    print("KERNEL_OK")
</pallas_src>

<mosaic_0001>
module attributes {stable_mosaic.version = 11 : i64} {
  func.func @_fused_kernel(%arg0: i32, %arg1: memref<32x20xf32, #tpu.memory_space<vmem>>, %arg2: memref<20x128xbf16, #tpu.memory_space<vmem>>, %arg3: memref<1x128xf32, #tpu.memory_space<vmem>>, %arg4: memref<640x128xbf16, #tpu.memory_space<vmem>>, %arg5: memref<1x128xf32, #tpu.memory_space<vmem>>, %arg6: memref<1024x1024xbf16, #tpu.memory_space<vmem>>, %arg7: memref<1x1024xf32, #tpu.memory_space<vmem>>, %arg8: memref<1024x5xbf16, #tpu.memory_space<vmem>>, %arg9: memref<1x5xf32, #tpu.memory_space<vmem>>, %arg10: memref<2x4xf32, #tpu.memory_space<vmem>>) attributes {dimension_semantics = [#tpu.dimension_semantics<parallel>], iteration_bounds = array<i64: 1>, scalar_prefetch = 0 : i64, scratch_operands = 0 : i64, tpu.core_type = #tpu.core_type<tc>, window_params = [{transform_indices = @transform_0, window_bounds = array<i64: 32, 20>}, {pipeline_mode = #tpu.pipeline_mode<synchronous>, transform_indices = @transform_1, window_bounds = array<i64: 20, 128>}, {pipeline_mode = #tpu.pipeline_mode<synchronous>, transform_indices = @transform_2, window_bounds = array<i64: 1, 128>}, {pipeline_mode = #tpu.pipeline_mode<synchronous>, transform_indices = @transform_3, window_bounds = array<i64: 640, 128>}, {pipeline_mode = #tpu.pipeline_mode<synchronous>, transform_indices = @transform_4, window_bounds = array<i64: 1, 128>}, {pipeline_mode = #tpu.pipeline_mode<synchronous>, transform_indices = @transform_5, window_bounds = array<i64: 1024, 1024>}, {pipeline_mode = #tpu.pipeline_mode<synchronous>, transform_indices = @transform_6, window_bounds = array<i64: 1, 1024>}, {pipeline_mode = #tpu.pipeline_mode<synchronous>, transform_indices = @transform_7, window_bounds = array<i64: 1024, 5>}, {pipeline_mode = #tpu.pipeline_mode<synchronous>, transform_indices = @transform_8, window_bounds = array<i64: 1, 5>}, {transform_indices = @transform_9, window_bounds = array<i64: 2, 4>}]} {
    %c0 = arith.constant 0 : index
    %c0_0 = arith.constant 0 : index
    %0 = vector.load %arg1[%c0, %c0_0] : memref<32x20xf32, #tpu.memory_space<vmem>>, vector<32x20xf32>
    %1 = arith.truncf %0 : vector<32x20xf32> to vector<32x20xbf16>
    %c0_1 = arith.constant 0 : index
    %c0_2 = arith.constant 0 : index
    %2 = vector.load %arg2[%c0_1, %c0_2] : memref<20x128xbf16, #tpu.memory_space<vmem>>, vector<20x128xbf16>
    %cst = arith.constant dense<0.000000e+00> : vector<32x128xf32>
    %3 = tpu.matmul %1, %2, %cst {dimension_numbers = #tpu.dot_dimension_numbers<[1], [0], [0], [1], [0, 0, 1, 1], [], []>} : vector<32x20xbf16>, vector<20x128xbf16>, vector<32x128xf32> -> vector<32x128xf32>
    %c0_3 = arith.constant 0 : index
    %c0_4 = arith.constant 0 : index
    %4 = vector.load %arg3[%c0_3, %c0_4] : memref<1x128xf32, #tpu.memory_space<vmem>>, vector<1x128xf32>
    %5 = vector.broadcast %4 : vector<1x128xf32> to vector<32x128xf32>
    %6 = arith.addf %3, %5 : vector<32x128xf32>
    %cst_5 = arith.constant 0.000000e+00 : f32
    %7 = vector.broadcast %cst_5 : f32 to vector<32x128xf32>
    %8 = arith.maximumf %6, %7 : vector<32x128xf32>
    %9 = vector.shape_cast %8 : vector<32x128xf32> to vector<2x16x128xf32>
    %10 = vector.extract_strided_slice %9 {offsets = [0, 0, 0], sizes = [2, 8, 128], strides = [1, 1, 1]} : vector<2x16x128xf32> to vector<2x8x128xf32>
    %11 = vector.extract_strided_slice %9 {offsets = [0, 1, 0], sizes = [2, 8, 128], strides = [1, 1, 1]} : vector<2x16x128xf32> to vector<2x8x128xf32>
    %12 = vector.extract_strided_slice %9 {offsets = [0, 2, 0], sizes = [2, 8, 128], strides = [1, 1, 1]} : vector<2x16x128xf32> to vector<2x8x128xf32>
    %13 = vector.extract_strided_slice %9 {offsets = [0, 3, 0], sizes = [2, 8, 128], strides = [1, 1, 1]} : vector<2x16x128xf32> to vector<2x8x128xf32>
    %14 = vector.extract_strided_slice %9 {offsets = [0, 4, 0], sizes = [2, 8, 128], strides = [1, 1, 1]} : vector<2x16x128xf32> to vector<2x8x128xf32>
    %15 = tpu.concatenate %10, %11, %12, %13, %14 in 2 : vector<2x8x128xf32>, vector<2x8x128xf32>, vector<2x8x128xf32>, vector<2x8x128xf32>, vector<2x8x128xf32> -> vector<2x8x640xf32>
    %16 = vector.shape_cast %15 : vector<2x8x640xf32> to vector<16x640xf32>
    %17 = arith.truncf %16 : vector<16x640xf32> to vector<16x640xbf16>
    %c0_6 = arith.constant 0 : index
    %c0_7 = arith.constant 0 : index
    %18 = vector.load %arg4[%c0_6, %c0_7] : memref<640x128xbf16, #tpu.memory_space<vmem>>, vector<640x128xbf16>
    %cst_8 = arith.constant dense<0.000000e+00> : vector<16x128xf32>
    %19 = tpu.matmul %17, %18, %cst_8 {dimension_numbers = #tpu.dot_dimension_numbers<[1], [0], [0], [1], [0, 0, 1, 1], [], []>} : vector<16x640xbf16>, vector<640x128xbf16>, vector<16x128xf32> -> vector<16x128xf32>
    %c0_9 = arith.constant 0 : index
    %c0_10 = arith.constant 0 : index
    %20 = vector.load %arg5[%c0_9, %c0_10] : memref<1x128xf32, #tpu.memory_space<vmem>>, vector<1x128xf32>
    %21 = vector.broadcast %20 : vector<1x128xf32> to vector<16x128xf32>
    %22 = arith.addf %19, %21 : vector<16x128xf32>
    %cst_11 = arith.constant 0.000000e+00 : f32
    %23 = vector.broadcast %cst_11 : f32 to vector<16x128xf32>
    %24 = arith.maximumf %22, %23 : vector<16x128xf32>
    %25 = vector.shape_cast %24 : vector<16x128xf32> to vector<2x8x128xf32>
    %26 = vector.extract_strided_slice %25 {offsets = [0, 0, 0], sizes = [2, 1, 128], strides = [1, 1, 1]} : vector<2x8x128xf32> to vector<2x1x128xf32>
    %27 = vector.shape_cast %26 : vector<2x1x128xf32> to vector<2x128xf32>
    %28 = vector.extract_strided_slice %25 {offsets = [0, 1, 0], sizes = [2, 1, 128], strides = [1, 1, 1]} : vector<2x8x128xf32> to vector<2x1x128xf32>
    %29 = vector.shape_cast %28 : vector<2x1x128xf32> to vector<2x128xf32>
    %30 = vector.extract_strided_slice %25 {offsets = [0, 2, 0], sizes = [2, 1, 128], strides = [1, 1, 1]} : vector<2x8x128xf32> to vector<2x1x128xf32>
    %31 = vector.shape_cast %30 : vector<2x1x128xf32> to vector<2x128xf32>
    %32 = vector.extract_strided_slice %25 {offsets = [0, 3, 0], sizes = [2, 1, 128], strides = [1, 1, 1]} : vector<2x8x128xf32> to vector<2x1x128xf32>
    %33 = vector.shape_cast %32 : vector<2x1x128xf32> to vector<2x128xf32>
    %34 = vector.extract_strided_slice %25 {offsets = [0, 4, 0], sizes = [2, 1, 128], strides = [1, 1, 1]} : vector<2x8x128xf32> to vector<2x1x128xf32>
    %35 = vector.shape_cast %34 : vector<2x1x128xf32> to vector<2x128xf32>
    %36 = vector.extract_strided_slice %25 {offsets = [0, 5, 0], sizes = [2, 1, 128], strides = [1, 1, 1]} : vector<2x8x128xf32> to vector<2x1x128xf32>
    %37 = vector.shape_cast %36 : vector<2x1x128xf32> to vector<2x128xf32>
    %38 = vector.extract_strided_slice %25 {offsets = [0, 6, 0], sizes = [2, 1, 128], strides = [1, 1, 1]} : vector<2x8x128xf32> to vector<2x1x128xf32>
    %39 = vector.shape_cast %38 : vector<2x1x128xf32> to vector<2x128xf32>
    %40 = vector.extract_strided_slice %25 {offsets = [0, 7, 0], sizes = [2, 1, 128], strides = [1, 1, 1]} : vector<2x8x128xf32> to vector<2x1x128xf32>
    %41 = vector.shape_cast %40 : vector<2x1x128xf32> to vector<2x128xf32>
    %42 = tpu.concatenate %27, %29, %31, %33, %35, %37, %39, %41 in 1 : vector<2x128xf32>, vector<2x128xf32>, vector<2x128xf32>, vector<2x128xf32>, vector<2x128xf32>, vector<2x128xf32>, vector<2x128xf32>, vector<2x128xf32> -> vector<2x1024xf32>
    %43 = arith.truncf %42 : vector<2x1024xf32> to vector<2x1024xbf16>
    %c0_12 = arith.constant 0 : index
    %c0_13 = arith.constant 0 : index
    %44 = vector.load %arg6[%c0_12, %c0_13] : memref<1024x1024xbf16, #tpu.memory_space<vmem>>, vector<1024x1024xbf16>
    %cst_14 = arith.constant dense<0.000000e+00> : vector<2x1024xf32>
    %45 = tpu.matmul %43, %44, %cst_14 {dimension_numbers = #tpu.dot_dimension_numbers<[1], [0], [0], [1], [0, 0, 1, 1], [], []>} : vector<2x1024xbf16>, vector<1024x1024xbf16>, vector<2x1024xf32> -> vector<2x1024xf32>
    %c0_15 = arith.constant 0 : index
    %c0_16 = arith.constant 0 : index
    %46 = vector.load %arg7[%c0_15, %c0_16] : memref<1x1024xf32, #tpu.memory_space<vmem>>, vector<1x1024xf32>
    %47 = vector.broadcast %46 : vector<1x1024xf32> to vector<2x1024xf32>
    %48 = arith.addf %45, %47 : vector<2x1024xf32>
    %cst_17 = arith.constant 0.000000e+00 : f32
    %49 = vector.broadcast %cst_17 : f32 to vector<2x1024xf32>
    %50 = arith.maximumf %48, %49 : vector<2x1024xf32>
    %51 = arith.truncf %50 : vector<2x1024xf32> to vector<2x1024xbf16>
    %c0_18 = arith.constant 0 : index
    %c0_19 = arith.constant 0 : index
    %52 = vector.load %arg8[%c0_18, %c0_19] : memref<1024x5xbf16, #tpu.memory_space<vmem>>, vector<1024x5xbf16>
    %cst_20 = arith.constant dense<0.000000e+00> : vector<2x5xf32>
    %53 = tpu.matmul %51, %52, %cst_20 {dimension_numbers = #tpu.dot_dimension_numbers<[1], [0], [0], [1], [0, 0, 1, 1], [], []>} : vector<2x1024xbf16>, vector<1024x5xbf16>, vector<2x5xf32> -> vector<2x5xf32>
    %c0_21 = arith.constant 0 : index
    %c0_22 = arith.constant 0 : index
    %54 = vector.load %arg9[%c0_21, %c0_22] : memref<1x5xf32, #tpu.memory_space<vmem>>, vector<1x5xf32>
    %55 = vector.broadcast %54 : vector<1x5xf32> to vector<2x5xf32>
    %56 = arith.addf %53, %55 : vector<2x5xf32>
    %57 = vector.extract_strided_slice %56 {offsets = [0, 0], sizes = [2, 1], strides = [1, 1]} : vector<2x5xf32> to vector<2x1xf32>
    %58 = vector.extract_strided_slice %56 {offsets = [0, 1], sizes = [2, 4], strides = [1, 1]} : vector<2x5xf32> to vector<2x4xf32>
    %cst_23 = arith.constant dense<0.000000e+00> : vector<2xf32>
    %59 = vector.multi_reduction <add>, %58, %cst_23 [1] : vector<2x4xf32> to vector<2xf32>
    %60 = vector.shape_cast %59 : vector<2xf32> to vector<2x1xf32>
    %cst_24 = arith.constant 4.000000e+00 : f32
    %61 = vector.broadcast %cst_24 : f32 to vector<2x1xf32>
    %62 = arith.divf %60, %61 : vector<2x1xf32>
    %63 = vector.broadcast %62 : vector<2x1xf32> to vector<2x4xf32>
    %64 = arith.subf %58, %63 : vector<2x4xf32>
    %65 = vector.broadcast %57 : vector<2x1xf32> to vector<2x4xf32>
    %66 = arith.addf %65, %64 : vector<2x4xf32>
    %c0_25 = arith.constant 0 : index
    %c0_26 = arith.constant 0 : index
    %67 = vector.load %arg10[%c0_25, %c0_26] : memref<2x4xf32, #tpu.memory_space<vmem>>, vector<2x4xf32>
    tpu.vector_store %arg10[%c0_25, %c0_26], %66 {strides = array<i32>} : memref<2x4xf32, #tpu.memory_space<vmem>>, vector<2x4xf32>,
    return
  }
  func.func @transform_0(%arg0: i32) -> (i32, i32) {
    %c0_i32 = arith.constant 0 : i32
    %c0_i32_0 = arith.constant 0 : i32
    return %arg0, %c0_i32 : i32, i32
  }
  func.func @transform_1(%arg0: i32) -> (i32, i32) {
    %c0_i32 = arith.constant 0 : i32
    %c0_i32_0 = arith.constant 0 : i32
    %c0_i32_1 = arith.constant 0 : i32
    return %c0_i32, %c0_i32_0 : i32, i32
  }
  func.func @transform_2(%arg0: i32) -> (i32, i32) {
    %c0_i32 = arith.constant 0 : i32
    %c0_i32_0 = arith.constant 0 : i32
    %c0_i32_1 = arith.constant 0 : i32
    return %c0_i32, %c0_i32_0 : i32, i32
  }
  func.func @transform_3(%arg0: i32) -> (i32, i32) {
    %c0_i32 = arith.constant 0 : i32
    %c0_i32_0 = arith.constant 0 : i32
    %c0_i32_1 = arith.constant 0 : i32
    return %c0_i32, %c0_i32_0 : i32, i32
  }
  func.func @transform_4(%arg0: i32) -> (i32, i32) {
    %c0_i32 = arith.constant 0 : i32
    %c0_i32_0 = arith.constant 0 : i32
    %c0_i32_1 = arith.constant 0 : i32
    return %c0_i32, %c0_i32_0 : i32, i32
  }
  func.func @transform_5(%arg0: i32) -> (i32, i32) {
    %c0_i32 = arith.constant 0 : i32
    %c0_i32_0 = arith.constant 0 : i32
    %c0_i32_1 = arith.constant 0 : i32
    return %c0_i32, %c0_i32_0 : i32, i32
  }
  func.func @transform_6(%arg0: i32) -> (i32, i32) {
    %c0_i32 = arith.constant 0 : i32
    %c0_i32_0 = arith.constant 0 : i32
    %c0_i32_1 = arith.constant 0 : i32
    return %c0_i32, %c0_i32_0 : i32, i32
  }
  func.func @transform_7(%arg0: i32) -> (i32, i32) {
    %c0_i32 = arith.constant 0 : i32
    %c0_i32_0 = arith.constant 0 : i32
    %c0_i32_1 = arith.constant 0 : i32
    return %c0_i32, %c0_i32_0 : i32, i32
  }
  func.func @transform_8(%arg0: i32) -> (i32, i32) {
    %c0_i32 = arith.constant 0 : i32
    %c0_i32_0 = arith.constant 0 : i32
    %c0_i32_1 = arith.constant 0 : i32
    return %c0_i32, %c0_i32_0 : i32, i32
  }
  func.func @transform_9(%arg0: i32) -> (i32, i32) {
    %c0_i32 = arith.constant 0 : i32
    %c0_i32_0 = arith.constant 0 : i32
    return %arg0, %c0_i32 : i32, i32
  }
}

</mosaic_0001>

<bundles_post_ra>
// kernel: dqn_conv1d_forward.1
= control target key start
LH: loop header
LB: loop body
LE: loop exit
PB: predicated region body
PF: predicated region fallthrough
CT: control target
= control target key end

     0   :  { %14 = vsyncpa [#allocation3], 0  ;;  %s6822_s0 = inlined_call_operand.vmem [shape: f32[32,20], index: 0, kind: input, shape index: {}]   ;;  %s6823_s1 = inlined_call_operand.hbm [shape: bf16[20,128], index: 1, kind: input, shape index: {}]   ;;  %s6824_s2 = inlined_call_operand.hbm [shape: f32[1,128], index: 2, kind: input, shape index: {}]   ;;  %s6825_s3 = inlined_call_operand.hbm [shape: bf16[640,128], index: 3, kind: input, shape index: {}]   ;;  %s6826_s4 = inlined_call_operand.hbm [shape: f32[1,128], index: 4, kind: input, shape index: {}]   ;;  %s6827_s5 = inlined_call_operand.hbm [shape: bf16[1024,1024], index: 5, kind: input, shape index: {}]   ;;  %s6828_s6 = inlined_call_operand.hbm [shape: f32[1,1024], index: 6, kind: input, shape index: {}]   ;;  %s6829_s7 = inlined_call_operand.vmem [shape: bf16[1024,5], index: 7, kind: input, shape index: {}]   ;;  %s6830_s8 = inlined_call_operand.hbm [shape: f32[1,5], index: 8, kind: input, shape index: {}]   ;;  %s6831_s9 = inlined_call_operand.hbm [shape: f32[2,4], index: 9, kind: output, shape index: {}]  }
   0x1   :  { %15 = vsyncpa [#allocation6], 0 }
   0x2   :  { %16 = vsyncpa [#allocation9], 0 }
   0x3   :  { %17 = vsyncpa [#allocation12], 0 }
   0x4   :  { %18 = vsyncpa [#allocation4], 0  ;;  %s6344_s30 = smov [#allocation5]   ;;  %s6345_s11 = smov [#allocation8]  }
   0x5   :  { %s39_s10 = sshll.u32 %s6344_s30, 4  ;;  %s61_s12 = sshll.u32 %s6345_s11, 4  ;;  %s40_s10 = int_to_ptr.vmem [resolvable:$true] %s39_s10  ;;  %s62_s12 = int_to_ptr.vmem [resolvable:$true] %s61_s12 }
   0x6   :  { %s6182_s13 = scalar_lea.vmem %s40_s10, 16  ;;  %s6186_s14 = scalar_lea.vmem %s40_s10, 32 }
   0x7   :  { %p6183_p0 = scmp.ne.s32.totalorder %s40_s10, %s6182_s13  ;;  %p6187_p1 = scmp.lt.s32.totalorder %s40_s10, %s40_s10 }
   0x8   :  { %p6188_p2 = scmp.lt.s32.totalorder %s6186_s14, %s6182_s13 }
   0xa   :  { %p6189_p3 = por %p6188_p2, %p6187_p1 }
   0xc   :  { %p6190_p4 = pnand %p6189_p3, %p6183_p0 }
   0xe   :  { %6193 = shalt.err (!%p6190_p4)
}
   0xf   :  { %42 = dma.hbm_to_vmem [thread:$0]  %s6824_s2, 16, %s40_s10, [#allocation6]  }
  0x10   :  { %s6202_s17 = scalar_lea.vmem %s62_s12, 16  ;;  %s6206_s18 = scalar_lea.vmem %s62_s12, 32 }
  0x11   :  { %p6203_p5 = scmp.ne.s32.totalorder %s62_s12, %s6202_s17  ;;  %p6207_p6 = scmp.lt.s32.totalorder %s62_s12, %s62_s12 }
  0x12   :  { %p6208_p7 = scmp.lt.s32.totalorder %s6206_s18, %s6202_s17 }
  0x14   :  { %p6209_p8 = por %p6208_p7, %p6207_p6 }
  0x16   :  { %p6210_p9 = pnand %p6209_p8, %p6203_p5 }
  0x18   :  { %6213 = shalt.err (!%p6210_p9)
}
  0x19   :  { %64 = dma.hbm_to_vmem [thread:$0]  %s6826_s4, 16, %s62_s12, [#allocation9]  }
  0x1a   :  { %s6346_s21 = smov [#allocation11]   ;;  %s6347_s23 = smov [#allocation2]  }
  0x1b   :  { %s83_s22 = sshll.u32 %s6346_s21, 4  ;;  %s26_s24 = sshll.u32 %s6347_s23, 4  ;;  %s84_s22 = int_to_ptr.vmem [resolvable:$true] %s83_s22  ;;  %s27_s24 = int_to_ptr.vmem [resolvable:$true] %s26_s24 }
  0x1c   :  { %s6222_s25 = scalar_lea.vmem %s84_s22, 128  ;;  %p6227_p11 = scmp.lt.s32.totalorder %s84_s22, %s84_s22 }
  0x1d   :  { %p6223_p10 = scmp.ne.s32.totalorder %s84_s22, %s6222_s25  ;;  %p6228_p12 = scmp.lt.s32.totalorder %s6222_s25, %s6222_s25 }
  0x1f   :  { %p6229_p13 = por %p6228_p12, %p6227_p11 }
  0x21   :  { %p6230_p0 = pnand %p6229_p13, %p6223_p10 }
  0x23   :  { %6233 = shalt.err (!%p6230_p0)
}
  0x24   :  { %86 = dma.hbm_to_vmem [thread:$0]  %s6828_s6, 128, %s84_s22, [#allocation12]  }
  0x25   :  { %s6242_s27 = scalar_lea.vmem %s27_s24, 192  ;;  %p6247_p2 = scmp.lt.s32.totalorder %s27_s24, %s27_s24 }
  0x26   :  { %p6243_p1 = scmp.ne.s32.totalorder %s27_s24, %s6242_s27  ;;  %p6248_p3 = scmp.lt.s32.totalorder %s6242_s27, %s6242_s27 }
  0x28   :  { %p6249_p4 = por %p6248_p3, %p6247_p2 }
  0x2a   :  { %p6250_p5 = pnand %p6249_p4, %p6243_p1 }
  0x2c   :  { %6253 = shalt.err (!%p6250_p5)
}
  0x2d   :  { %s6348_s4 = smov 64   ;;  %s6349_s28 = smov 4  }
  0x2e   :  { %32 = dma.hbm_to_vmem [thread:$0]  %s6823_s1, 192, %s27_s24, [#allocation3], %s6348_s4, %s6348_s4, %s6349_s28  }
  0x2f   :  { %s6350_s10 = smov [#allocation7]   ;;  %s6351_s12 = smov [#allocation10]  }
  0x30   :  { %s48_s11 = sshll.u32 %s6350_s10, 4  ;;  %s70_s13 = sshll.u32 %s6351_s12, 4  ;;  %s49_s11 = int_to_ptr.vmem [resolvable:$true] %s48_s11  ;;  %s71_s13 = int_to_ptr.vmem [resolvable:$true] %s70_s13 }
  0x31   :  { %s6262_s6 = scalar_lea.vmem %s49_s11, 5120  ;;  %p6267_p7 = scmp.lt.s32.totalorder %s49_s11, %s49_s11 }
  0x32   :  { %p6263_p6 = scmp.ne.s32.totalorder %s49_s11, %s6262_s6  ;;  %p6268_p8 = scmp.lt.s32.totalorder %s6262_s6, %s6262_s6 }
  0x34   :  { %p6269_p9 = por %p6268_p8, %p6267_p7 }
  0x36   :  { %p6270_p10 = pnand %p6269_p9, %p6263_p6 }
  0x38   :  { %6273 = shalt.err (!%p6270_p10)
}
  0x39   :  { %54 = dma.hbm_to_vmem [thread:$0]  %s6825_s3, 5120, %s49_s11, [#allocation6], %s6348_s4, %s6348_s4, %s6349_s28  }
  0x3a   :  { %s6282_s16 = scalar_lea.vmem %s71_s13, 65536  ;;  %p6287_p12 = scmp.lt.s32.totalorder %s71_s13, %s71_s13 }
  0x3b   :  { %p6283_p11 = scmp.ne.s32.totalorder %s71_s13, %s6282_s16  ;;  %p6288_p13 = scmp.lt.s32.totalorder %s6282_s16, %s6282_s16 }
  0x3d   :  { %p6289_p0 = por %p6288_p13, %p6287_p12 }
  0x3f   :  { %p6290_p1 = pnand %p6289_p0, %p6283_p11 }
  0x41   :  { %6293 = shalt.err (!%p6290_p1)
}
  0x42   :  { %s6352_s1 = smov 512   ;;  %s6353_s17 = smov 32  }
  0x43   :  { %76 = dma.hbm_to_vmem [thread:$0]  %s6827_s5, 65536, %s71_s13, [#allocation9], %s6352_s1, %s6352_s1, %s6353_s17  }
  0x44   :  { %s6354_s20 = smov [#allocation13]  }
  0x45   :  { %s95_s21 = sshll.u32 %s6354_s20, 4  ;;  %s96_s21 = int_to_ptr.vmem [resolvable:$true] %s95_s21 }
  0x46   :  { %s6302_s22 = scalar_lea.vmem %s96_s21, 16  ;;  %s6306_s23 = scalar_lea.vmem %s96_s21, 32 }
  0x47   :  { %p6303_p2 = scmp.ne.s32.totalorder %s96_s21, %s6302_s22  ;;  %p6307_p3 = scmp.lt.s32.totalorder %s96_s21, %s96_s21 }
  0x48   :  { %p6308_p4 = scmp.lt.s32.totalorder %s6306_s23, %s6302_s22 }
  0x4a   :  { %p6309_p5 = por %p6308_p4, %p6307_p3 }
  0x4c   :  { %p6310_p6 = pnand %p6309_p5, %p6303_p2 }
  0x4e   :  { %6313 = shalt.err (!%p6310_p6)
}
  0x4f   :  { %98 = dma.hbm_to_vmem [thread:$0]  %s6830_s8, 16, %s96_s21, [#allocation12]  }
  0x50   :  { %6334 = dma.done.wait [#allocation3], 192  }
  0x51   :  { %6335 = vsyncadd [#allocation3], 4294967104 }
  0x52   :  { %6336 = dma.done.wait [#allocation6], 5136  }
  0x53   :  { %6337 = vsyncadd [#allocation6], 4294962160 }
  0x54   :  { %6338 = dma.done.wait [#allocation9], 65552  }
  0x55   :  { %6339 = vsyncadd [#allocation9], 4294901744 }
  0x56   :  { %6340 = dma.done.wait [#allocation12], 144  }
  0x57   :  { %6341 = vsyncadd [#allocation12], 4294967152  ;;  %vm153_vm0 = vcmask 1041408   ;;  %v6067_v0 = vld [vmem:[#allocation2 + $0x8] ss:$0 sps:$4 sm:$0x33]  }
  0x58   :  { %v6068_v1 = vld [vmem:[#allocation2] sm:$0xff]   ;;  %6048 = vmatprep.subr.msk.bf16.mxu0 %vm153_vm0, %v6067_v0  ;;  %v155_v3 = vsel %vm153_vm0, %v6067_v0, 0  ;;  %v122_v4 = vld [vmem:[%s6822_s0 + $0x8] sm:$0xff]  ;;  %vm146_vm1 = vcmask 162816   ;;  %v123_v5 = vld [vmem:[%s6822_s0 + $0x10] sm:$0xff]  ;;  %v6355_v41 = vmov 0.0  }
  0x59   :  { %v121_v2 = vld [vmem:[%s6822_s0] sm:$0xff]  ;;  %v124_v6 = vld [vmem:[%s6822_s0 + $0x18] sm:$0xff]  ;;  %6021 = vmatpush3.bf16.msra.mxu0 %v155_v3  ;;  %v6081_v21 = vld [vmem:[#allocation7 + $0x60] sm:$0xff]   ;;  %vm214_vm2 = vcmask 1046528   ;;  %vm232_vm3 = vcmask 1044480   ;;  %vm223_vm4 = vcmask 1045504  }
  0x5a   :  { %v125_v7 = vpack.c.bf16 %v122_v4, %v121_v2  ;;  %v6069_v8 = vld [vmem:[#allocation7 + $0x78] sm:$0xff]   ;;  %6022 = vmatprep.subr.bf16.mxu0 %v6068_v1  ;;  %v126_v11 = vpack.c.bf16 %v124_v6, %v123_v5  ;;  %v6073_v13 = vld [vmem:[#allocation7 + $0x70] sm:$0xff]   ;;  %v6077_v17 = vld [vmem:[#allocation7 + $0x68] sm:$0xff]   ;;  %vm6356_vm5 = vmmov 0   ;;  %vm241_vm6 = vcmask 1043456   ;;  %s6359_s17 = smov [#allocation14]  }
  0x5b   :  { %v6070_v9 = vld [vmem:[#allocation7 + $0x38] sm:$0xff]   ;;  %5879 = vmatprep.subr.bf16.mxu1 %v6069_v8  ;;  %v6074_v14 = vld [vmem:[#allocation7 + $0x30] sm:$0xff]   ;;  %v6078_v18 = vld [vmem:[#allocation7 + $0x28] sm:$0xff]   ;;  %vm710_vm7 = vcmask 1041409   ;;  %vm5217_vm8 = vcmask 25600   ;;  %s5240_s18 = sshll.u32 %s6359_s17, 4  ;;  %s5241_s18 = int_to_ptr.vmem [resolvable:$true] %s5240_s18 }
  0x5c   :  { %6024 = vmatprep.mubr.msk.bf16.mxu0 %vm146_vm1, %v125_v7  ;;  %v6071_v10 = vld [vmem:[#allocation7 + $0xf8] sm:$0xff]   ;;  %5880 = vmatpush3.bf16.msra.mxu1 %v6070_v9  ;;  %v6075_v15 = vld [vmem:[#allocation7 + $0xf0] sm:$0xff]   ;;  %v6079_v19 = vld [vmem:[#allocation7 + $0xe8] sm:$0xff]   ;;  %s6314_s19 = scalar_lea.vmem %s5241_s18, 32  ;;  %p6319_p8 = scmp.lt.s32.totalorder %s5241_s18, %s5241_s18 }
  0x5d   :  { %v6072_v12 = vld [vmem:[#allocation7 + $0xb8] sm:$0xff]   ;;  %6023 = vmatpush3.bf16.msra.mxu0 %v6068_v1  ;;  %5881 = vmatprep.subr.bf16.mxu1 %v6073_v13  ;;  %v6076_v16 = vld [vmem:[#allocation7 + $0xb0] sm:$0xff]   ;;  %v6080_v20 = vld [vmem:[#allocation7 + $0xa8] sm:$0xff]   ;;  %p6315_p7 = scmp.ne.s32.totalorder %s5241_s18, %s6314_s19  ;;  %p6320_p9 = scmp.lt.s32.totalorder %s6314_s19, %s6314_s19 }
  0x5e   :  { %5901 = vmatprep.subr.bf16.mxu0 %v6071_v10  ;;  %v6082_v22 = vld [vmem:[#allocation7 + $0x20] sm:$0xff]   ;;  %v6085_v25 = vld [vmem:[#allocation7 + $0x58] sm:$0xff]   ;;  %v6089_v29 = vld [vmem:[#allocation7 + $0x50] sm:$0xff]  }
  0x5f   :  { %v6083_v23 = vld [vmem:[#allocation7 + $0xe0] sm:$0xff]   ;;  %v6086_v26 = vld [vmem:[#allocation7 + $0x18] sm:$0xff]   ;;  %v6090_v30 = vld [vmem:[#allocation7 + $0x10] sm:$0xff]   ;;  %p6321_p10 = por %p6320_p9, %p6319_p8 }
  0x60   :  { %6025 = vmatmul.mubr.msk.bf16.vlgmr.msra.gmra.mxu0 %vm146_vm1, %v126_v11  ;;  %5882 = vmatpush3.bf16.msra.mxu1 %v6074_v14  ;;  %v6084_v24 = vld [vmem:[#allocation7 + $0xa0] sm:$0xff]   ;;  %v6087_v27 = vld [vmem:[#allocation7 + $0xd8] sm:$0xff]   ;;  %v6091_v31 = vld [vmem:[#allocation7 + $0xd0] sm:$0xff]  }
  0x61   :  { %5902 = vmatpush3.bf16.msra.mxu0 %v6072_v12  ;;  %5883 = vmatprep.subr.bf16.mxu1 %v6077_v17  ;;  %v6088_v28 = vld [vmem:[#allocation7 + $0x98] sm:$0xff]   ;;  %v6092_v32 = vld [vmem:[#allocation7 + $0x90] sm:$0xff]   ;;  %v6093_v33 = vld [vmem:[#allocation7 + $0x48] sm:$0xff]   ;;  %p6322_p11 = pnand %p6321_p10, %p6315_p7 }
  0x62   :  { %5903 = vmatprep.subr.bf16.mxu0 %v6075_v15  ;;  %v6094_v34 = vld [vmem:[#allocation7 + $0x8] sm:$0xff]   ;;  %v6097_v37 = vld [vmem:[#allocation7 + $0x40] sm:$0xff]   ;;  %v5252_v46 = vld [vmem:[#allocation5] ss:$0 sm:$0xff] }
  0x63   :  { %v6095_v35 = vld [vmem:[#allocation7 + $0xc8] sm:$0xff]   ;;  %v6098_v38 = vld [vmem:[#allocation7] sm:$0xff]  }
  0x64   :  { %5884 = vmatpush3.bf16.msra.mxu1 %v6078_v18  ;;  %v6096_v36 = vld [vmem:[#allocation7 + $0x88] sm:$0xff]   ;;  %v6099_v39 = vld [vmem:[#allocation7 + $0xc0] sm:$0xff]   ;;  %v6101_v18 = vld [vmem:[#allocation7 + $0x138] sm:$0xff]  }
  0x65   :  { %5904 = vmatpush3.bf16.msra.mxu0 %v6076_v16  ;;  %5885 = vmatprep.subr.bf16.mxu1 %v6081_v21  ;;  %v6100_v40 = vld [vmem:[#allocation7 + $0x80] sm:$0xff]  }
  0x66   :  { %5905 = vmatprep.subr.bf16.mxu0 %v6079_v19  ;;  %v804_v42 = vld [vmem:[#allocation10 + $0x1c0] sm:$0xff] }
  0x67   :  { %v808_v43 = vld [vmem:[#allocation10 + $0x1e0] sm:$0xff] }
  0x68   :  { %5886 = vmatpush3.bf16.msra.mxu1 %v6082_v22  ;;  %v5354_v44 = vcombine.low %v804_v42, %v808_v43  ;;  %v5355_v45 = vcombine.high %v804_v42, %v808_v43  ;;  %v796_v13 = vld [vmem:[#allocation10 + $0x180] sm:$0xff] }
  0x69   :  { %5906 = vmatpush3.bf16.msra.mxu0 %v6080_v20  ;;  %5887 = vmatprep.subr.bf16.mxu1 %v6085_v25  ;;  %v800_v14 = vld [vmem:[#allocation10 + $0x1a0] sm:$0xff] }
  0x6a   :  { %5907 = vmatprep.subr.bf16.mxu0 %v6083_v23  ;;  %v5347_v20 = vcombine.high %v796_v13, %v800_v14  ;;  %v788_v21 = vld [vmem:[#allocation10 + $0x140] sm:$0xff]  ;;  %v6102_v23 = vld [vmem:[#allocation7 + $0x130] sm:$0xff]  }
  0x6b   :  { %v792_v22 = vld [vmem:[#allocation10 + $0x160] sm:$0xff] }
  0x6c   :  { %5888 = vmatpush3.bf16.msra.mxu1 %v6086_v26  ;;  %v5339_v25 = vcombine.high %v788_v21, %v792_v22  ;;  %v780_v26 = vld [vmem:[#allocation10 + $0x100] sm:$0xff] }
  0x6d   :  { %5908 = vmatpush3.bf16.msra.mxu0 %v6084_v24  ;;  %5889 = vmatprep.subr.bf16.mxu1 %v6089_v29  ;;  %v5346_v24 = vcombine.low %v796_v13, %v800_v14  ;;  %v5338_v29 = vcombine.low %v788_v21, %v792_v22  ;;  %v932_v42 = vld [vmem:[#allocation10 + $0x5c0] sm:$0xff] }
  0x6e   :  { %5909 = vmatprep.subr.bf16.mxu0 %v6087_v27  ;;  %v784_v27 = vld [vmem:[#allocation10 + $0x120] sm:$0xff] }
  0x6f   :  { %v936_v43 = vld [vmem:[#allocation10 + $0x5e0] sm:$0xff] }
  0x70   :  { %5890 = vmatpush3.bf16.msra.mxu1 %v6090_v30  ;;  %v5331_v30 = vcombine.high %v780_v26, %v784_v27  ;;  %v760_v13 = vld [vmem:[#allocation10 + $0x60] sm:$0xff] }
  0x71   :  { %5910 = vmatpush3.bf16.msra.mxu0 %v6088_v28  ;;  %5891 = vmatprep.subr.bf16.mxu1 %v6093_v33  ;;  %v6103_v28 = vld [vmem:[#allocation7 + $0x128] sm:$0xff]   ;;  %v6104_v33 = vld [vmem:[#allocation7 + $0x120] sm:$0xff]  }
  0x72   :  { %5911 = vmatprep.subr.bf16.mxu0 %v6091_v31  ;;  %v772_v31 = vld [vmem:[#allocation10 + $0xc0] sm:$0xff] }
  0x73   :  { %v752_v21 = vld [vmem:[#allocation10 + $0x20] sm:$0xff] }
  0x74   :  { %5892 = vmatpush3.bf16.msra.mxu1 %v6094_v34  ;;  %v5330_v34 = vcombine.low %v780_v26, %v784_v27 }
  0x75   :  { %5912 = vmatpush3.bf16.msra.mxu0 %v6092_v32  ;;  %5893 = vmatprep.subr.bf16.mxu1 %v6097_v37  ;;  %v776_v32 = vld [vmem:[#allocation10 + $0xe0] sm:$0xff] }
  0x76   :  { %5913 = vmatprep.subr.bf16.mxu0 %v6095_v35  ;;  %v5323_v35 = vcombine.high %v772_v31, %v776_v32  ;;  %v5322_v37 = vcombine.low %v772_v31, %v776_v32 }
  0x78   :  { %5894 = vmatpush3.bf16.msra.mxu1 %v6098_v38  ;;  %v6106_v38 = vld [vmem:[#allocation7 + $0x110] sm:$0xff]  }
  0x79   :  { %5914 = vmatpush3.bf16.msra.mxu0 %v6096_v36  ;;  %6028 = vmatprep.subr.bf16.mxu1 %v6355_v41  ;;  %v6105_v36 = vld [vmem:[#allocation7 + $0x118] sm:$0xff]  }
  0x7a   :  { %5915 = vmatprep.subr.bf16.mxu0 %v6099_v39  ;;  %v6107_v39 = vld [vmem:[#allocation7 + $0x108] sm:$0xff]  }
  0x7d   :  { %5916 = vmatpush3.bf16.msra.mxu0 %v6100_v40 }
  0x7e   :  { %3862 = vmatprep.subr.bf16.mxu0 %v5355_v45  ;;  %v6108_v45 = vld [vmem:[#allocation7 + $0x100] sm:$0xff]  }
 0x120   :  { %v6026_v47 = vpop.f32.mrf.mxu0 }
 0x121   :  { %v200_v48 = vadd.f32 %v6026_v47, %v5252_v46  ;;  %v5483_v47 = vcombine.high %v932_v42, %v936_v43 }
 0x122   :  { %v191_v49 = vpop.f32.mrf.mxu0 }
 0x123   :  { %v192_v50 = vadd.f32 %v5252_v46, %v191_v49  ;;  %v6446_v51 = vmax.f32 %v200_v48, 0.0 }
 0x124   :  { %v6027_v52 = vpop.f32.mrf.mxu0 }
 0x125   :  { %v203_v53 = vadd.f32 %v6027_v52, %v5252_v46  ;;  %v6448_v54 = vmax.f32 %v192_v50, 0.0  ;;  %v218_v58 = vrot.slane %v6446_v51, 1  ;;  %v236_v62 = vrot.slane %v6446_v51, 3  ;;  %v924_v50 = vld [vmem:[#allocation10 + $0x580] sm:$0xff] }
 0x126   :  { %v194_v55 = vpop.f32.mrf.mxu0  ;;  %v227_v2 = vrot.slane %v6446_v51, 2  ;;  %v245_v49 = vrot.slane %v6446_v51, 4  ;;  %v928_v52 = vld [vmem:[#allocation10 + $0x5a0] sm:$0xff] }
 0x127   :  { %v6450_v56 = vmax.f32 %v203_v53, 0.0  ;;  %v195_v57 = vadd.f32 %v5252_v46, %v194_v55  ;;  %v215_v63 = vrot.slane %v6448_v54, 1  ;;  %v233_v1 = vrot.slane %v6448_v54, 3 }
 0x128   :  { %v224_v6 = vrot.slane %v6448_v54, 2  ;;  %v250_v19 = vpack.c.bf16 %v6446_v51, %v6448_v54  ;;  %v242_v46 = vrot.slane %v6448_v54, 4  ;;  %v5482_v55 = vcombine.low %v932_v42, %v936_v43  ;;  %v852_v43 = vld [vmem:[#allocation10 + $0x340] sm:$0xff] }
 0x129   :  { %v228_v59 = vrot.slane %v6450_v56, 2  ;;  %v237_v60 = vrot.slane %v6450_v56, 3  ;;  %v6455_v61 = vmax.f32 %v195_v57, 0.0  ;;  %v219_v0 = vrot.slane %v6450_v56, 1 }
 0x12a   :  { %v5474_v54 = vcombine.low %v924_v50, %v928_v52 }
 0x12b   :  { %v225_v3 = vrot.slane %v6455_v61, 2  ;;  %v234_v4 = vrot.slane %v6455_v61, 3  ;;  %v216_v5 = vrot.slane %v6455_v61, 1  ;;  %v220_v7 = vsel %vm214_vm2, %v218_v58, %v219_v0  ;;  %v904_v0 = vld [vmem:[#allocation10 + $0x4e0] sm:$0xff] }
 0x12c   :  { %v238_v8 = vsel %vm232_vm3, %v236_v62, %v237_v60  ;;  %v229_v12 = vsel %vm223_vm4, %v227_v2, %v228_v59  ;;  %v243_v40 = vrot.slane %v6455_v61, 4  ;;  %v5475_v58 = vcombine.high %v924_v50, %v928_v52  ;;  %v920_v59 = vld [vmem:[#allocation10 + $0x560] sm:$0xff] }
 0x12d   :  { %v217_v9 = vsel %vm214_vm2, %v215_v63, %v216_v5  ;;  %v235_v10 = vsel %vm232_vm3, %v233_v1, %v234_v4  ;;  %v226_v11 = vsel %vm223_vm4, %v224_v6, %v225_v3  ;;  %v908_v60 = vld [vmem:[#allocation10 + $0x500] sm:$0xff] }
 0x12e   :  { %v251_v15 = vpack.c.bf16 %v220_v7, %v217_v9  ;;  %v253_v16 = vpack.c.bf16 %v238_v8, %v235_v10  ;;  %v252_v17 = vpack.c.bf16 %v229_v12, %v226_v11  ;;  %v244_v48 = vsel %vm241_vm6, %v242_v46, %v243_v40  ;;  %v912_v61 = vld [vmem:[#allocation10 + $0x520] sm:$0xff] }
 0x12f   :  { %v5459_v51 = vcombine.high %v908_v60, %v912_v61  ;;  %v900_v63 = vld [vmem:[#allocation10 + $0x4c0] sm:$0xff]  ;;  %v5458_v1 = vcombine.low %v908_v60, %v912_v61 }
 0x130   :  { %614 = vmatprep.mubr.bf16.mxu1 %v251_v15  ;;  %655 = vmatprep.mubr.bf16.mxu0 %v253_v16  ;;  %v5451_v2 = vcombine.high %v900_v63, %v904_v0  ;;  %v5450_v3 = vcombine.low %v900_v63, %v904_v0  ;;  %v764_v4 = vld [vmem:[#allocation10 + $0x80] sm:$0xff] }
 0x131   :  { %615 = vmatmul.mubr.bf16.vlgmr.msra.gmra.mxu1 %v250_v19  ;;  %656 = vmatmul.mubr.bf16.vlgmr.msra.gmra.mxu0 %v252_v17  ;;  %v768_v5 = vld [vmem:[#allocation10 + $0xa0] sm:$0xff] }
 0x132   :  { %6029 = vmatpush3.bf16.msra.mxu1 %v6101_v18  ;;  %6044 = vmatprep.mubr.msk.bf16.mxu1 %vm6356_vm5, %v6355_v41  ;;  %v5315_v6 = vcombine.high %v764_v4, %v768_v5  ;;  %v892_v7 = vld [vmem:[#allocation10 + $0x480] sm:$0xff]  ;;  %v5314_v9 = vcombine.low %v764_v4, %v768_v5 }
 0x133   :  { %6030 = vmatprep.subr.bf16.mxu1 %v6355_v41  ;;  %3863 = vmatpush1.bf16.msra.mxu0 %v5354_v44  ;;  %v246_v44 = vrot.slane %v6450_v56, 4  ;;  %v916_v56 = vld [vmem:[#allocation10 + $0x540] sm:$0xff] }
 0x134   :  { %3864 = vmatprep.subr.bf16.mxu0 %v5347_v20  ;;  %v5466_v62 = vcombine.low %v916_v56, %v920_v59  ;;  %v896_v8 = vld [vmem:[#allocation10 + $0x4a0] sm:$0xff] }
 0x135   :  { %v247_v53 = vsel %vm241_vm6, %v245_v49, %v246_v44  ;;  %v5442_v10 = vcombine.low %v892_v7, %v896_v8  ;;  %v5443_v11 = vcombine.high %v892_v7, %v896_v8  ;;  %v756_v12 = vld [vmem:[#allocation10 + $0x40] sm:$0xff] }
 0x136   :  { %6031 = vmatpush3.bf16.msra.mxu1 %v6102_v23  ;;  %v254_v57 = vpack.c.bf16 %v247_v53, %v244_v48  ;;  %v5307_v14 = vcombine.high %v756_v12, %v760_v13  ;;  %v884_v15 = vld [vmem:[#allocation10 + $0x440] sm:$0xff]  ;;  %v5306_v17 = vcombine.low %v756_v12, %v760_v13 }
 0x137   :  { %6032 = vmatprep.subr.bf16.mxu1 %v6355_v41  ;;  %3865 = vmatpush1.bf16.msra.mxu0 %v5346_v24  ;;  %v888_v16 = vld [vmem:[#allocation10 + $0x460] sm:$0xff] }
 0x138   :  { %3866 = vmatprep.subr.bf16.mxu0 %v5339_v25  ;;  %v5435_v18 = vcombine.high %v884_v15, %v888_v16  ;;  %v5434_v19 = vcombine.low %v884_v15, %v888_v16  ;;  %v748_v20 = vld [vmem:[#allocation10] sm:$0xff] }
 0x139   :  { %v5299_v22 = vcombine.high %v748_v20, %v752_v21  ;;  %v876_v23 = vld [vmem:[#allocation10 + $0x400] sm:$0xff]  ;;  %v5298_v25 = vcombine.low %v748_v20, %v752_v21 }
 0x13a   :  { %6033 = vmatpush3.bf16.msra.mxu1 %v6103_v28  ;;  %v880_v24 = vld [vmem:[#allocation10 + $0x420] sm:$0xff] }
 0x13b   :  { %6034 = vmatprep.subr.bf16.mxu1 %v6355_v41  ;;  %3867 = vmatpush1.bf16.msra.mxu0 %v5338_v29  ;;  %v5427_v26 = vcombine.high %v876_v23, %v880_v24  ;;  %v5426_v27 = vcombine.low %v876_v23, %v880_v24  ;;  %v868_v28 = vld [vmem:[#allocation10 + $0x3c0] sm:$0xff] }
 0x13c   :  { %3868 = vmatprep.subr.bf16.mxu0 %v5331_v30  ;;  %v872_v29 = vld [vmem:[#allocation10 + $0x3e0] sm:$0xff] }
 0x13d   :  { %v996_v30 = vld [vmem:[#allocation10 + $0x7c0] sm:$0xff]  ;;  %v5418_v31 = vcombine.low %v868_v28, %v872_v29  ;;  %v5419_v32 = vcombine.high %v868_v28, %v872_v29 }
 0x13e   :  { %6035 = vmatpush3.bf16.msra.mxu1 %v6104_v33  ;;  %v1000_v33 = vld [vmem:[#allocation10 + $0x7e0] sm:$0xff] }
 0x13f   :  { %6036 = vmatprep.subr.bf16.mxu1 %v6355_v41  ;;  %3869 = vmatpush1.bf16.msra.mxu0 %v5330_v34  ;;  %v860_v34 = vld [vmem:[#allocation10 + $0x380] sm:$0xff] }
 0x140   :  { %3870 = vmatprep.subr.bf16.mxu0 %v5323_v35  ;;  %v864_v35 = vld [vmem:[#allocation10 + $0x3a0] sm:$0xff] }
 0x141   :  { %v992_v40 = vld [vmem:[#allocation10 + $0x7a0] sm:$0xff] }
 0x142   :  { %6037 = vmatpush3.bf16.msra.mxu1 %v6105_v36  ;;  %v5546_v36 = vcombine.low %v996_v30, %v1000_v33  ;;  %v856_v44 = vld [vmem:[#allocation10 + $0x360] sm:$0xff] }
 0x143   :  { %6038 = vmatprep.subr.bf16.mxu1 %v6355_v41  ;;  %3871 = vmatpush1.bf16.msra.mxu0 %v5322_v37  ;;  %v5547_v37 = vcombine.high %v996_v30, %v1000_v33  ;;  %v984_v46 = vld [vmem:[#allocation10 + $0x760] sm:$0xff]  ;;  %v5403_v49 = vcombine.high %v852_v43, %v856_v44 }
 0x144   :  { %3872 = vmatprep.subr.bf16.mxu0 %v5315_v6  ;;  %v844_v52 = vld [vmem:[#allocation10 + $0x300] sm:$0xff] }
 0x145   :  { %v848_v53 = vld [vmem:[#allocation10 + $0x320] sm:$0xff] }
 0x146   :  { %6039 = vmatpush3.bf16.msra.mxu1 %v6106_v38  ;;  %v5411_v38 = vcombine.high %v860_v34, %v864_v35  ;;  %v840_v60 = vld [vmem:[#allocation10 + $0x2e0] sm:$0xff] }
 0x147   :  { %6040 = vmatprep.subr.bf16.mxu1 %v6355_v41  ;;  %3873 = vmatpush1.bf16.msra.mxu0 %v5314_v9  ;;  %v964_v61 = vld [vmem:[#allocation10 + $0x6c0] sm:$0xff] }
 0x148   :  { %3874 = vmatprep.subr.bf16.mxu0 %v5307_v14  ;;  %v828_v4 = vld [vmem:[#allocation10 + $0x280] sm:$0xff] }
 0x149   :  { %v832_v5 = vld [vmem:[#allocation10 + $0x2a0] sm:$0xff] }
 0x14a   :  { %6041 = vmatpush3.bf16.msra.mxu1 %v6107_v39  ;;  %v988_v39 = vld [vmem:[#allocation10 + $0x780] sm:$0xff]  ;;  %v5379_v6 = vcombine.high %v828_v4, %v832_v5  ;;  %v5378_v9 = vcombine.low %v828_v4, %v832_v5 }
 0x14b   :  { %6042 = vmatprep.subr.bf16.mxu1 %v6355_v41  ;;  %v5467_v41 = vcombine.high %v916_v56, %v920_v59  ;;  %3875 = vmatpush1.bf16.msra.mxu0 %v5306_v17  ;;  %v5539_v42 = vcombine.high %v988_v39, %v992_v40  ;;  %v5538_v48 = vcombine.low %v988_v39, %v992_v40  ;;  %v956_v7 = vld [vmem:[#allocation10 + $0x680] sm:$0xff] }
 0x14c   :  { %3876 = vmatprep.subr.bf16.mxu0 %v5299_v22  ;;  %v5395_v59 = vcombine.high %v844_v52, %v848_v53  ;;  %v960_v8 = vld [vmem:[#allocation10 + $0x6a0] sm:$0xff] }
 0x14d   :  { %v820_v12 = vld [vmem:[#allocation10 + $0x240] sm:$0xff] }
 0x14e   :  { %6043 = vmatpush3.bf16.msra.mxu1 %v6108_v45  ;;  %v980_v45 = vld [vmem:[#allocation10 + $0x740] sm:$0xff] }
 0x14f   :  { %3903 = vmatprep.subr.bf16.mxu1 %v5483_v47  ;;  %3877 = vmatpush1.bf16.msra.mxu0 %v5298_v25  ;;  %v5410_v47 = vcombine.low %v860_v34, %v864_v35  ;;  %v5531_v50 = vcombine.high %v980_v45, %v984_v46  ;;  %v5530_v56 = vcombine.low %v980_v45, %v984_v46  ;;  %v824_v13 = vld [vmem:[#allocation10 + $0x260] sm:$0xff] }
 0x150   :  { %3878 = vmatprep.subr.bf16.mxu0 %v5419_v32  ;;  %v5371_v14 = vcombine.high %v820_v12, %v824_v13  ;;  %v948_v15 = vld [vmem:[#allocation10 + $0x640] sm:$0xff]  ;;  %v5370_v17 = vcombine.low %v820_v12, %v824_v13 }
 0x151   :  { %6045 = vmatmul.mubr.bf16.vlgmr.msra.gmra.mxu1 %v254_v57  ;;  %v976_v57 = vld [vmem:[#allocation10 + $0x720] sm:$0xff] }
 0x152   :  { %3904 = vmatpush1.bf16.msra.mxu1 %v5482_v55  ;;  %v972_v55 = vld [vmem:[#allocation10 + $0x700] sm:$0xff] }
 0x153   :  { %3905 = vmatprep.subr.bf16.mxu1 %v5475_v58  ;;  %3879 = vmatpush2.bf16.msra.mxu0 %v5418_v31  ;;  %v5402_v58 = vcombine.low %v852_v43, %v856_v44  ;;  %v5522_v63 = vcombine.low %v972_v55, %v976_v57  ;;  %v952_v16 = vld [vmem:[#allocation10 + $0x660] sm:$0xff]  ;;  %v5257_v43 = vld [vmem:[#allocation8] ss:$0 sm:$0xff] }
 0x154   :  { %3880 = vmatprep.subr.bf16.mxu0 %v5411_v38  ;;  %v812_v20 = vld [vmem:[#allocation10 + $0x200] sm:$0xff] }
 0x155   :  { %v816_v21 = vld [vmem:[#allocation10 + $0x220] sm:$0xff] }
 0x156   :  { %3906 = vmatpush1.bf16.msra.mxu1 %v5474_v54  ;;  %v5523_v54 = vcombine.high %v972_v55, %v976_v57  ;;  %v5362_v22 = vcombine.low %v812_v20, %v816_v21  ;;  %v5363_v23 = vcombine.high %v812_v20, %v816_v21  ;;  %v940_v24 = vld [vmem:[#allocation10 + $0x600] sm:$0xff] }
 0x157   :  { %3907 = vmatprep.subr.bf16.mxu1 %v5467_v41  ;;  %3881 = vmatpush2.bf16.msra.mxu0 %v5410_v47  ;;  %v836_v41 = vld [vmem:[#allocation10 + $0x2c0] sm:$0xff] }
 0x158   :  { %3882 = vmatprep.subr.bf16.mxu0 %v5403_v49  ;;  %v5387_v0 = vcombine.high %v836_v41, %v840_v60  ;;  %v944_v25 = vld [vmem:[#allocation10 + $0x620] sm:$0xff] }
 0x159   :  { %v6486_v28 = vld [vmem:[#allocation10 + $0x9c0] sm:$0xff] }
 0x15a   :  { %3908 = vmatpush1.bf16.msra.mxu1 %v5466_v62  ;;  %v968_v62 = vld [vmem:[#allocation10 + $0x6e0] sm:$0xff] }
 0x15b   :  { %3909 = vmatprep.subr.bf16.mxu1 %v5459_v51  ;;  %3883 = vmatpush2.bf16.msra.mxu0 %v5402_v58  ;;  %v5394_v51 = vcombine.low %v844_v52, %v848_v53  ;;  %v6488_v29 = vld [vmem:[#allocation10 + $0x9e0] sm:$0xff] }
 0x15c   :  { %3884 = vmatprep.subr.bf16.mxu0 %v5395_v59  ;;  %v5611_v30 = vcombine.high %v6486_v28, %v6488_v29  ;;  %v5610_v31 = vcombine.low %v6486_v28, %v6488_v29  ;;  %v6494_v32 = vld [vmem:[#allocation10 + $0xdc0] sm:$0xff] }
 0x15d   :  { %v6496_v33 = vld [vmem:[#allocation10 + $0xde0] sm:$0xff] }
 0x15e   :  { %3910 = vmatpush1.bf16.msra.mxu1 %v5458_v1  ;;  %v5515_v1 = vcombine.high %v964_v61, %v968_v62  ;;  %v5739_v34 = vcombine.high %v6494_v32, %v6496_v33  ;;  %v5738_v35 = vcombine.low %v6494_v32, %v6496_v33  ;;  %v1040_v28 = vld [vmem:[#allocation10 + $0x920] sm:$0xff] }
 0x15f   :  { %3911 = vmatprep.subr.bf16.mxu1 %v5451_v2  ;;  %3885 = vmatpush2.bf16.msra.mxu0 %v5394_v51  ;;  %v5386_v2 = vcombine.low %v836_v41, %v840_v60  ;;  %v1056_v41 = vld [vmem:[#allocation10 + $0x9a0] sm:$0xff] }
 0x160   :  { %3886 = vmatprep.subr.bf16.mxu0 %v5387_v0  ;;  %v1164_v29 = vld [vmem:[#allocation10 + $0xd00] sm:$0xff] }
 0x161   :  { %v1028_v33 = vld [vmem:[#allocation10 + $0x8c0] sm:$0xff] }
 0x162   :  { %3912 = vmatpush1.bf16.msra.mxu1 %v5450_v3  ;;  %v5514_v3 = vcombine.low %v964_v61, %v968_v62 }
 0x163   :  { %3913 = vmatprep.subr.bf16.mxu1 %v5443_v11  ;;  %3887 = vmatpush2.bf16.msra.mxu0 %v5386_v2  ;;  %v5506_v11 = vcombine.low %v956_v7, %v960_v8 }
 0x164   :  { %3888 = vmatprep.subr.bf16.mxu0 %v5379_v6 }
 0x166   :  { %3914 = vmatpush1.bf16.msra.mxu1 %v5442_v10  ;;  %v5507_v10 = vcombine.high %v956_v7, %v960_v8 }
 0x167   :  { %3915 = vmatprep.subr.bf16.mxu1 %v5435_v18  ;;  %3889 = vmatpush2.bf16.msra.mxu0 %v5378_v9  ;;  %v5499_v18 = vcombine.high %v948_v15, %v952_v16 }
 0x168   :  { %3890 = vmatprep.subr.bf16.mxu0 %v5371_v14 }
 0x16a   :  { %3916 = vmatpush1.bf16.msra.mxu1 %v5434_v19  ;;  %v5498_v19 = vcombine.low %v948_v15, %v952_v16 }
 0x16b   :  { %3917 = vmatprep.subr.bf16.mxu1 %v5427_v26  ;;  %3891 = vmatpush2.bf16.msra.mxu0 %v5370_v17  ;;  %v5490_v26 = vcombine.low %v940_v24, %v944_v25 }
 0x16c   :  { %3892 = vmatprep.subr.bf16.mxu0 %v5363_v23 }
 0x16e   :  { %3918 = vmatpush1.bf16.msra.mxu1 %v5426_v27  ;;  %v5491_v27 = vcombine.high %v940_v24, %v944_v25 }
 0x16f   :  { %3919 = vmatprep.subr.bf16.mxu1 %v5547_v37  ;;  %3893 = vmatpush2.bf16.msra.mxu0 %v5362_v22 }
 0x170   :  { %3944 = vmatprep.subr.bf16.mxu0 %v5611_v30  ;;  %v1048_v30 = vld [vmem:[#allocation10 + $0x960] sm:$0xff] }
 0x172   :  { %3920 = vmatpush2.bf16.msra.mxu1 %v5546_v36 }
 0x173   :  { %3921 = vmatprep.subr.bf16.mxu1 %v5539_v42 }
 0x176   :  { %3922 = vmatpush2.bf16.msra.mxu1 %v5538_v48 }
 0x177   :  { %3923 = vmatprep.subr.bf16.mxu1 %v5531_v50 }
 0x17a   :  { %3924 = vmatpush2.bf16.msra.mxu1 %v5530_v56 }
 0x17b   :  { %3925 = vmatprep.subr.bf16.mxu1 %v5523_v54  ;;  %v1052_v54 = vld [vmem:[#allocation10 + $0x980] sm:$0xff] }
 0x17c   :  { %v5603_v51 = vcombine.high %v1052_v54, %v1056_v41 }
 0x17e   :  { %3926 = vmatpush2.bf16.msra.mxu1 %v5522_v63 }
 0x17f   :  { %3927 = vmatprep.subr.bf16.mxu1 %v5515_v1 }
 0x182   :  { %3928 = vmatpush2.bf16.msra.mxu1 %v5514_v3 }
 0x183   :  { %3929 = vmatprep.subr.bf16.mxu1 %v5507_v10 }
 0x186   :  { %3930 = vmatpush2.bf16.msra.mxu1 %v5506_v11 }
 0x187   :  { %3931 = vmatprep.subr.bf16.mxu1 %v5499_v18  ;;  %v1180_v18 = vld [vmem:[#allocation10 + $0xd80] sm:$0xff] }
 0x18a   :  { %3932 = vmatpush2.bf16.msra.mxu1 %v5498_v19  ;;  %v1184_v19 = vld [vmem:[#allocation10 + $0xda0] sm:$0xff] }
 0x18b   :  { %3933 = vmatprep.subr.bf16.mxu1 %v5491_v27  ;;  %v1044_v27 = vld [vmem:[#allocation10 + $0x940] sm:$0xff] }
 0x18e   :  { %3934 = vmatpush2.bf16.msra.mxu1 %v5490_v26 }
 0x18f   :  { %3985 = vmatprep.subr.bf16.mxu1 %v5739_v34 }
 0x1f1   :  { %v5895_v36 = vpop.f32.mrf.mxu1  ;;  %v5917_v38 = vpop.f32.mrf.mxu0 }
 0x1f3   :  { %v5896_v37 = vpop.f32.mrf.mxu1  ;;  %v5918_v40 = vpop.f32.mrf.mxu0 }
 0x1f4   :  { %v5897_v42 = vadd.f32 %v5896_v37, %v5895_v36  ;;  %v5919_v48 = vadd.f32 %v5918_v40, %v5917_v38  ;;  %v5731_v37 = vcombine.high %v1180_v18, %v1184_v19  ;;  %v1172_v38 = vld [vmem:[#allocation10 + $0xd40] sm:$0xff] }
 0x1f5   :  { %v5898_v39 = vpop.f32.mrf.mxu1  ;;  %v5920_v45 = vpop.f32.mrf.mxu0 }
 0x1f6   :  { %v617_v46 = vadd.f32 %v5897_v42, %v5257_v43  ;;  %v5602_v42 = vcombine.low %v1052_v54, %v1056_v41  ;;  %v1148_v54 = vld [vmem:[#allocation10 + $0xc80] sm:$0xff] }
 0x1f7   :  { %v5899_v44 = vpop.f32.mrf.mxu1  ;;  %v5921_v49 = vpop.f32.mrf.mxu0  ;;  %v1152_v41 = vld [vmem:[#allocation10 + $0xca0] sm:$0xff] }
 0x1f8   :  { %v5900_v47 = vadd.f32 %v5899_v44, %v5898_v39  ;;  %v658_v52 = vadd.f32 %v5919_v48, %v617_v46  ;;  %v5922_v55 = vadd.f32 %v5921_v49, %v5920_v45  ;;  %v1176_v39 = vld [vmem:[#allocation10 + $0xd60] sm:$0xff]  ;;  %v5595_v44 = vcombine.high %v1044_v27, %v1048_v30 }
 0x1f9   :  { %v5723_v45 = vcombine.high %v1172_v38, %v1176_v39  ;;  %v1036_v46 = vld [vmem:[#allocation10 + $0x900] sm:$0xff]  ;;  %v5722_v48 = vcombine.low %v1172_v38, %v1176_v39 }
 0x1fa   :  { %v620_v50 = vadd.f32 %v5900_v47, %v5257_v43  ;;  %v5730_v43 = vcombine.low %v1180_v18, %v1184_v19  ;;  %v5594_v47 = vcombine.low %v1044_v27, %v1048_v30  ;;  %v5587_v49 = vcombine.high %v1036_v46, %v1040_v28  ;;  %v1252_v18 = vld [vmem:[#allocation10 + $0xfc0] sm:$0xff] }
 0x1fb   :  { %v1256_v19 = vld [vmem:[#allocation10 + $0xfe0] sm:$0xff] }
 0x1fc   :  { %v661_v59 = vadd.f32 %v5922_v55, %v620_v50  ;;  %v1156_v50 = vld [vmem:[#allocation10 + $0xcc0] sm:$0xff]  ;;  %v5803_v27 = vcombine.high %v1252_v18, %v1256_v19 }
 0x1fd   :  { %v1116_v30 = vld [vmem:[#allocation10 + $0xb80] sm:$0xff] }
 0x1fe   :  { %v1244_v38 = vld [vmem:[#allocation10 + $0xf80] sm:$0xff] }
 0x1ff   :  { %v1248_v39 = vld [vmem:[#allocation10 + $0xfa0] sm:$0xff] }
 0x211   :  { %v698_v53 = vpop.f32.mrf.mxu1 }
 0x212   :  { %v699_v57 = vadd.f32 %v698_v53, %v658_v52  ;;  %v1160_v52 = vld [vmem:[#allocation10 + $0xce0] sm:$0xff]  ;;  %v5586_v53 = vcombine.low %v1036_v46, %v1040_v28 }
 0x213   :  { %v6046_v58 = vpop.f32.mrf.mxu1  ;;  %v1108_v46 = vld [vmem:[#allocation10 + $0xb40] sm:$0xff] }
 0x214   :  { %v705_v56 = vmax.f32 %v699_v57, 0.0  ;;  %v5707_v58 = vcombine.high %v1156_v50, %v1160_v52  ;;  %v1112_v28 = vld [vmem:[#allocation10 + $0xb60] sm:$0xff] }
 0x215   :  { %v701_v60 = vpop.f32.mrf.mxu1 }
 0x216   :  { %v702_v61 = vadd.f32 %v701_v60, %v661_v59  ;;  %v713_v0 = vrot.slane %v705_v56, 1  ;;  %v720_v1 = vrot.slane %v705_v56, 3  ;;  %v716_v2 = vrot.slane %v705_v56, 2  ;;  %v1024_v59 = vld [vmem:[#allocation10 + $0x8a0] sm:$0xff] }
 0x217   :  { %v6047_v62 = vpop.f32.mrf.mxu1  ;;  %v728_v3 = vrot.slane %v705_v56, 5  ;;  %v736_v4 = vrot.slane %v705_v56, 7  ;;  %v724_v5 = vrot.slane %v705_v56, 4  ;;  %v732_v6 = vrot.slane %v705_v56, 6 }
 0x218   :  { %v706_v63 = vmax.f32 %v702_v61, 0.0  ;;  %v5706_v61 = vcombine.low %v1156_v50, %v1160_v52  ;;  %v1228_v50 = vld [vmem:[#allocation10 + $0xf00] sm:$0xff] }
 0x219   :  { %v1232_v52 = vld [vmem:[#allocation10 + $0xf20] sm:$0xff] }
 0x21a   :  { %v714_v7 = vsel %vm710_vm7, %v706_v63, %v713_v0  ;;  %v709_v8 = vrot.slane %v706_v63, 7  ;;  %v721_v9 = vrot.slane %v706_v63, 2  ;;  %v717_v10 = vrot.slane %v706_v63, 1  ;;  %v1016_v0 = vld [vmem:[#allocation10 + $0x860] sm:$0xff] }
 0x21b   :  { %v6503_v11 = vpack.c.bf16 %v714_v7, %v714_v7  ;;  %v729_v12 = vrot.slane %v706_v63, 4  ;;  %v737_v13 = vrot.slane %v706_v63, 6  ;;  %v725_v14 = vrot.slane %v706_v63, 3  ;;  %v1004_v7 = vld [vmem:[#allocation10 + $0x800] sm:$0xff] }
 0x21c   :  { %v711_v15 = vsel %vm710_vm7, %v709_v8, %v705_v56  ;;  %v722_v16 = vsel %vm710_vm7, %v721_v9, %v720_v1  ;;  %v718_v17 = vsel %vm710_vm7, %v717_v10, %v716_v2  ;;  %v733_v20 = vrot.slane %v706_v63, 5  ;;  %v1020_v56 = vld [vmem:[#allocation10 + $0x880] sm:$0xff] }
 0x21d   :  { %3894 = vmatprep.mubr.bf16.mxu0 %v6503_v11  ;;  %v6509_v21 = vpack.c.bf16 %v711_v15, %v711_v15  ;;  %v6511_v22 = vpack.c.bf16 %v722_v16, %v722_v16  ;;  %v6513_v23 = vpack.c.bf16 %v718_v17, %v718_v17  ;;  %v730_v24 = vsel %vm710_vm7, %v729_v12, %v728_v3  ;;  %v1012_v63 = vld [vmem:[#allocation10 + $0x840] sm:$0xff] }
 0x21e   :  { %v6516_v25 = vpack.c.bf16 %v730_v24, %v730_v24  ;;  %v738_v26 = vsel %vm710_vm7, %v737_v13, %v736_v4  ;;  %v6520_v34 = vsel %vm710_vm7, %v725_v14, %v724_v5  ;;  %v6523_v36 = vsel %vm710_vm7, %v733_v20, %v732_v6  ;;  %v1140_v1 = vld [vmem:[#allocation10 + $0xc40] sm:$0xff] }
 0x21f   :  { %3895 = vmatmul.mubr.bf16.vlgmr.msra.gmra.mxu0 %v6509_v21  ;;  %3935 = vmatprep.mubr.bf16.mxu1 %v6511_v22  ;;  %v6531_v40 = vpack.c.bf16 %v738_v26, %v738_v26  ;;  %v5571_v62 = vcombine.high %v1020_v56, %v1024_v59  ;;  %v1144_v2 = vld [vmem:[#allocation10 + $0xc60] sm:$0xff]  ;;  %v5570_v3 = vcombine.low %v1020_v56, %v1024_v59 }
 0x220   :  { %3945 = vmatpush1.bf16.msra.mxu0 %v5610_v31  ;;  %3936 = vmatmul.mubr.bf16.vlgmr.msra.gmra.mxu1 %v6513_v23  ;;  %v1168_v31 = vld [vmem:[#allocation10 + $0xd20] sm:$0xff]  ;;  %v5698_v4 = vcombine.low %v1148_v54, %v1152_v41  ;;  %v5563_v5 = vcombine.high %v1012_v63, %v1016_v0  ;;  %v5691_v6 = vcombine.high %v1140_v1, %v1144_v2 }
 0x221   :  { %3976 = vmatprep.mubr.bf16.mxu0 %v6516_v25  ;;  %3986 = vmatpush1.bf16.msra.mxu1 %v5738_v35  ;;  %v5715_v32 = vcombine.high %v1164_v29, %v1168_v31  ;;  %v1032_v35 = vld [vmem:[#allocation10 + $0x8e0] sm:$0xff]  ;;  %v5714_v55 = vcombine.low %v1164_v29, %v1168_v31  ;;  %v5562_v12 = vcombine.low %v1012_v63, %v1016_v0 }
 0x222   :  { %4017 = vmatprep.mubr.bf16.mxu1 %v6531_v40  ;;  %3946 = vmatprep.subr.bf16.mxu0 %v5603_v51  ;;  %v5579_v57 = vcombine.high %v1028_v33, %v1032_v35  ;;  %v5578_v60 = vcombine.low %v1028_v33, %v1032_v35  ;;  %v5699_v51 = vcombine.high %v1148_v54, %v1152_v41  ;;  %v1008_v8 = vld [vmem:[#allocation10 + $0x820] sm:$0xff] }
 0x223   :  { %3987 = vmatprep.subr.bf16.mxu1 %v5731_v37  ;;  %v1132_v9 = vld [vmem:[#allocation10 + $0xc00] sm:$0xff]  ;;  %v5690_v13 = vcombine.low %v1140_v1, %v1144_v2  ;;  %v5555_v14 = vcombine.high %v1004_v7, %v1008_v8  ;;  %v5554_v20 = vcombine.low %v1004_v7, %v1008_v8 }
 0x224   :  { %3947 = vmatpush1.bf16.msra.mxu0 %v5602_v42  ;;  %v1136_v10 = vld [vmem:[#allocation10 + $0xc20] sm:$0xff] }
 0x225   :  { %3988 = vmatpush1.bf16.msra.mxu1 %v5730_v43  ;;  %3948 = vmatprep.subr.bf16.mxu0 %v5595_v44  ;;  %v5683_v15 = vcombine.high %v1132_v9, %v1136_v10  ;;  %v1124_v16 = vld [vmem:[#allocation10 + $0xbc0] sm:$0xff]  ;;  %v5682_v24 = vcombine.low %v1132_v9, %v1136_v10  ;;  %v5802_v43 = vcombine.low %v1252_v18, %v1256_v19 }
 0x226   :  { %3989 = vmatprep.subr.bf16.mxu1 %v5723_v45  ;;  %v1128_v17 = vld [vmem:[#allocation10 + $0xbe0] sm:$0xff]  ;;  %v5795_v45 = vcombine.high %v1244_v38, %v1248_v39 }
 0x227   :  { %v5675_v26 = vcombine.high %v1124_v16, %v1128_v17  ;;  %v1120_v37 = vld [vmem:[#allocation10 + $0xba0] sm:$0xff]  ;;  %v5674_v42 = vcombine.low %v1124_v16, %v1128_v17 }
 0x228   :  { %3949 = vmatpush1.bf16.msra.mxu0 %v5594_v47  ;;  %v5667_v44 = vcombine.high %v1116_v30, %v1120_v37  ;;  %v1236_v29 = vld [vmem:[#allocation10 + $0xf40] sm:$0xff]  ;;  %v5666_v47 = vcombine.low %v1116_v30, %v1120_v37  ;;  %v805_v30 = vld [vmem:[#allocation10 + $0x1c8] sm:$0xff] }
 0x229   :  { %3990 = vmatpush1.bf16.msra.mxu1 %v5722_v48  ;;  %3950 = vmatprep.subr.bf16.mxu0 %v5587_v49  ;;  %v1240_v31 = vld [vmem:[#allocation10 + $0xf60] sm:$0xff]  ;;  %v5794_v48 = vcombine.low %v1244_v38, %v1248_v39  ;;  %v5659_v49 = vcombine.high %v1108_v46, %v1112_v28  ;;  %v809_v37 = vld [vmem:[#allocation10 + $0x1e8] sm:$0xff] }
 0x22a   :  { %3991 = vmatprep.subr.bf16.mxu1 %v5715_v32  ;;  %v5787_v32 = vcombine.high %v1236_v29, %v1240_v31  ;;  %v1100_v33 = vld [vmem:[#allocation10 + $0xb00] sm:$0xff]  ;;  %v933_v38 = vld [vmem:[#allocation10 + $0x5c8] sm:$0xff] }
 0x22b   :  { %v1104_v35 = vld [vmem:[#allocation10 + $0xb20] sm:$0xff]  ;;  %v937_v39 = vld [vmem:[#allocation10 + $0x5e8] sm:$0xff] }
 0x22c   :  { %3951 = vmatpush1.bf16.msra.mxu0 %v5586_v53  ;;  %v5658_v53 = vcombine.low %v1108_v46, %v1112_v28  ;;  %v1092_v56 = vld [vmem:[#allocation10 + $0xac0] sm:$0xff]  ;;  %v797_v46 = vld [vmem:[#allocation10 + $0x188] sm:$0xff] }
 0x22d   :  { %3992 = vmatpush1.bf16.msra.mxu1 %v5714_v55  ;;  %3952 = vmatprep.subr.bf16.mxu0 %v5579_v57  ;;  %v5786_v55 = vcombine.low %v1236_v29, %v1240_v31  ;;  %v5651_v57 = vcombine.high %v1100_v33, %v1104_v35  ;;  %v1096_v59 = vld [vmem:[#allocation10 + $0xae0] sm:$0xff]  ;;  %v801_v28 = vld [vmem:[#allocation10 + $0x1a8] sm:$0xff]  ;;  %v5356_v29 = vcombine.low %v805_v30, %v809_v37 }
 0x22e   :  { %3993 = vmatprep.subr.bf16.mxu1 %v5707_v58  ;;  %v5779_v58 = vcombine.high %v1228_v50, %v1232_v52  ;;  %v1220_v54 = vld [vmem:[#allocation10 + $0xec0] sm:$0xff]  ;;  %v925_v31 = vld [vmem:[#allocation10 + $0x588] sm:$0xff] }
 0x22f   :  { %v1224_v41 = vld [vmem:[#allocation10 + $0xee0] sm:$0xff] }
 0x230   :  { %3953 = vmatpush1.bf16.msra.mxu0 %v5578_v60  ;;  %v5650_v60 = vcombine.low %v1100_v33, %v1104_v35  ;;  %v1084_v63 = vld [vmem:[#allocation10 + $0xa80] sm:$0xff]  ;;  %v5349_v33 = vcombine.high %v797_v46, %v801_v28  ;;  %v789_v35 = vld [vmem:[#allocation10 + $0x148] sm:$0xff] }
 0x231   :  { %3994 = vmatpush1.bf16.msra.mxu1 %v5706_v61  ;;  %3954 = vmatprep.subr.bf16.mxu0 %v5571_v62  ;;  %v5778_v61 = vcombine.low %v1228_v50, %v1232_v52  ;;  %v5643_v62 = vcombine.high %v1092_v56, %v1096_v59  ;;  %v1088_v0 = vld [vmem:[#allocation10 + $0xaa0] sm:$0xff]  ;;  %v793_v50 = vld [vmem:[#allocation10 + $0x168] sm:$0xff] }
 0x232   :  { %3995 = vmatprep.subr.bf16.mxu1 %v5699_v51  ;;  %v5771_v51 = vcombine.high %v1220_v54, %v1224_v41  ;;  %v1212_v1 = vld [vmem:[#allocation10 + $0xe80] sm:$0xff] }
 0x233   :  { %v1216_v2 = vld [vmem:[#allocation10 + $0xea0] sm:$0xff] }
 0x234   :  { %3955 = vmatpush1.bf16.msra.mxu0 %v5570_v3  ;;  %v5642_v3 = vcombine.low %v1092_v56, %v1096_v59  ;;  %v1076_v7 = vld [vmem:[#allocation10 + $0xa40] sm:$0xff]  ;;  %v781_v56 = vld [vmem:[#allocation10 + $0x108] sm:$0xff] }
 0x235   :  { %3996 = vmatpush1.bf16.msra.mxu1 %v5698_v4  ;;  %3956 = vmatprep.subr.bf16.mxu0 %v5563_v5  ;;  %v5770_v4 = vcombine.low %v1220_v54, %v1224_v41  ;;  %v5635_v5 = vcombine.high %v1084_v63, %v1088_v0  ;;  %v1080_v8 = vld [vmem:[#allocation10 + $0xa60] sm:$0xff]  ;;  %v785_v59 = vld [vmem:[#allocation10 + $0x128] sm:$0xff] }
 0x236   :  { %3997 = vmatprep.subr.bf16.mxu1 %v5691_v6  ;;  %v5763_v6 = vcombine.high %v1212_v1, %v1216_v2  ;;  %v1204_v9 = vld [vmem:[#allocation10 + $0xe40] sm:$0xff]  ;;  %v909_v54 = vld [vmem:[#allocation10 + $0x508] sm:$0xff] }
 0x237   :  { %v1208_v10 = vld [vmem:[#allocation10 + $0xe60] sm:$0xff]  ;;  %v913_v41 = vld [vmem:[#allocation10 + $0x528] sm:$0xff] }
 0x238   :  { %3957 = vmatpush1.bf16.msra.mxu0 %v5562_v12  ;;  %v5634_v12 = vcombine.low %v1084_v63, %v1088_v0  ;;  %v1068_v16 = vld [vmem:[#allocation10 + $0xa00] sm:$0xff]  ;;  %v773_v63 = vld [vmem:[#allocation10 + $0xc8] sm:$0xff] }
 0x239   :  { %3998 = vmatpush1.bf16.msra.mxu1 %v5690_v13  ;;  %3958 = vmatprep.subr.bf16.mxu0 %v5555_v14  ;;  %v5762_v13 = vcombine.low %v1212_v1, %v1216_v2  ;;  %v5627_v14 = vcombine.high %v1076_v7, %v1080_v8  ;;  %v1072_v17 = vld [vmem:[#allocation10 + $0xa20] sm:$0xff]  ;;  %v777_v0 = vld [vmem:[#allocation10 + $0xe8] sm:$0xff] }
 0x23a   :  { %3999 = vmatprep.subr.bf16.mxu1 %v5683_v15  ;;  %v5755_v15 = vcombine.high %v1204_v9, %v1208_v10  ;;  %v1196_v18 = vld [vmem:[#allocation10 + $0xe00] sm:$0xff]  ;;  %v901_v1 = vld [vmem:[#allocation10 + $0x4c8] sm:$0xff] }
 0x23b   :  { %v1200_v19 = vld [vmem:[#allocation10 + $0xe20] sm:$0xff]  ;;  %v905_v2 = vld [vmem:[#allocation10 + $0x4e8] sm:$0xff] }
 0x23c   :  { %3959 = vmatpush1.bf16.msra.mxu0 %v5554_v20  ;;  %v5626_v20 = vcombine.low %v1076_v7, %v1080_v8  ;;  %v765_v7 = vld [vmem:[#allocation10 + $0x88] sm:$0xff] }
 0x23d   :  { %4000 = vmatpush1.bf16.msra.mxu1 %v5682_v24  ;;  %3960 = vmatprep.subr.bf16.mxu0 %v5675_v26  ;;  %v5754_v24 = vcombine.low %v1204_v9, %v1208_v10  ;;  %v5619_v26 = vcombine.high %v1068_v16, %v1072_v17  ;;  %v769_v8 = vld [vmem:[#allocation10 + $0xa8] sm:$0xff] }
 0x23e   :  { %4001 = vmatprep.subr.bf16.mxu1 %v5803_v27  ;;  %v5747_v27 = vcombine.high %v1196_v18, %v1200_v19  ;;  %v893_v9 = vld [vmem:[#allocation10 + $0x488] sm:$0xff] }
 0x23f   :  { %v897_v10 = vld [vmem:[#allocation10 + $0x4a8] sm:$0xff] }
 0x240   :  { %3961 = vmatpush2.bf16.msra.mxu0 %v5674_v42  ;;  %v5618_v42 = vcombine.low %v1068_v16, %v1072_v17  ;;  %v757_v16 = vld [vmem:[#allocation10 + $0x48] sm:$0xff] }
 0x241   :  { %4002 = vmatpush2.bf16.msra.mxu1 %v5802_v43  ;;  %3962 = vmatprep.subr.bf16.mxu0 %v5667_v44  ;;  %v5746_v43 = vcombine.low %v1196_v18, %v1200_v19  ;;  %v5357_v44 = vcombine.high %v805_v30, %v809_v37  ;;  %v761_v17 = vld [vmem:[#allocation10 + $0x68] sm:$0xff] }
 0x242   :  { %4003 = vmatprep.subr.bf16.mxu1 %v5795_v45  ;;  %v5485_v45 = vcombine.high %v933_v38, %v937_v39  ;;  %v885_v18 = vld [vmem:[#allocation10 + $0x448] sm:$0xff] }
 0x243   :  { %v889_v19 = vld [vmem:[#allocation10 + $0x468] sm:$0xff] }
 0x244   :  { %3963 = vmatpush2.bf16.msra.mxu0 %v5666_v47  ;;  %v929_v47 = vld [vmem:[#allocation10 + $0x5a8] sm:$0xff] }
 0x245   :  { %4004 = vmatpush2.bf16.msra.mxu1 %v5794_v48  ;;  %3964 = vmatprep.subr.bf16.mxu0 %v5659_v49  ;;  %v6540_v48 = vpack.c.bf16 %v6520_v34, %v6520_v34  ;;  %v5484_v49 = vcombine.low %v933_v38, %v937_v39  ;;  %v5477_v52 = vcombine.high %v925_v31, %v929_v47  ;;  %v749_v30 = vld [vmem:[#allocation10 + $0x8] sm:$0xff] }
 0x246   :  { %4005 = vmatprep.subr.bf16.mxu1 %v5787_v32  ;;  %v6544_v32 = vpack.c.bf16 %v6523_v36, %v6523_v36  ;;  %v5348_v34 = vcombine.low %v797_v46, %v801_v28  ;;  %v753_v37 = vld [vmem:[#allocation10 + $0x28] sm:$0xff] }
 0x247   :  { %v877_v38 = vld [vmem:[#allocation10 + $0x408] sm:$0xff] }
 0x248   :  { %3965 = vmatpush2.bf16.msra.mxu0 %v5658_v53  ;;  %v917_v53 = vld [vmem:[#allocation10 + $0x548] sm:$0xff] }
 0x249   :  { %4006 = vmatpush2.bf16.msra.mxu1 %v5786_v55  ;;  %3966 = vmatprep.subr.bf16.mxu0 %v5651_v57  ;;  %v921_v55 = vld [vmem:[#allocation10 + $0x568] sm:$0xff]  ;;  %v5476_v57 = vcombine.low %v925_v31, %v929_v47  ;;  %v5300_v47 = vcombine.low %v749_v30, %v753_v37 }
 0x24a   :  { %4007 = vmatprep.subr.bf16.mxu1 %v5779_v58  ;;  %v5341_v58 = vcombine.high %v789_v35, %v793_v50  ;;  %v5469_v36 = vcombine.high %v917_v53, %v921_v55  ;;  %v881_v39 = vld [vmem:[#allocation10 + $0x428] sm:$0xff] }
 0x24b   :  { %v869_v46 = vld [vmem:[#allocation10 + $0x3c8] sm:$0xff] }
 0x24c   :  { %3967 = vmatpush2.bf16.msra.mxu0 %v5650_v60  ;;  %v5340_v60 = vcombine.low %v789_v35, %v793_v50  ;;  %v873_v28 = vld [vmem:[#allocation10 + $0x3e8] sm:$0xff] }
 0x24d   :  { %4008 = vmatpush2.bf16.msra.mxu1 %v5778_v61  ;;  %3968 = vmatprep.subr.bf16.mxu0 %v5643_v62  ;;  %v5468_v61 = vcombine.low %v917_v53, %v921_v55  ;;  %v5333_v62 = vcombine.high %v781_v56, %v785_v59  ;;  %v1001_v31 = vld [vmem:[#allocation10 + $0x7e8] sm:$0xff] }
 0x24e   :  { %4009 = vmatprep.subr.bf16.mxu1 %v5771_v51  ;;  %v5461_v51 = vcombine.high %v909_v54, %v913_v41  ;;  %v861_v50 = vld [vmem:[#allocation10 + $0x388] sm:$0xff] }
 0x24f   :  { %v989_v53 = vld [vmem:[#allocation10 + $0x788] sm:$0xff] }
 0x250   :  { %3969 = vmatpush2.bf16.msra.mxu0 %v5642_v3  ;;  %v5332_v3 = vcombine.low %v781_v56, %v785_v59  ;;  %v993_v55 = vld [vmem:[#allocation10 + $0x7a8] sm:$0xff] }
 0x251   :  { %4010 = vmatpush2.bf16.msra.mxu1 %v5770_v4  ;;  %3970 = vmatprep.subr.bf16.mxu0 %v5635_v5  ;;  %v5460_v4 = vcombine.low %v909_v54, %v913_v41  ;;  %v5325_v5 = vcombine.high %v773_v63, %v777_v0  ;;  %v853_v56 = vld [vmem:[#allocation10 + $0x348] sm:$0xff] }
 0x252   :  { %4011 = vmatprep.subr.bf16.mxu1 %v5763_v6  ;;  %v5453_v6 = vcombine.high %v901_v1, %v905_v2  ;;  %v857_v59 = vld [vmem:[#allocation10 + $0x368] sm:$0xff] }
 0x253   :  { %v981_v54 = vld [vmem:[#allocation10 + $0x748] sm:$0xff] }
 0x254   :  { %3971 = vmatpush2.bf16.msra.mxu0 %v5634_v12  ;;  %v5324_v12 = vcombine.low %v773_v63, %v777_v0  ;;  %v985_v41 = vld [vmem:[#allocation10 + $0x768] sm:$0xff] }
 0x255   :  { %4012 = vmatpush2.bf16.msra.mxu1 %v5762_v13  ;;  %3972 = vmatprep.subr.bf16.mxu0 %v5627_v14  ;;  %v5452_v13 = vcombine.low %v901_v1, %v905_v2  ;;  %v5317_v14 = vcombine.high %v765_v7, %v769_v8  ;;  %v845_v63 = vld [vmem:[#allocation10 + $0x308] sm:$0xff] }
 0x256   :  { %4013 = vmatprep.subr.bf16.mxu1 %v5755_v15  ;;  %v5445_v15 = vcombine.high %v893_v9, %v897_v10  ;;  %v849_v0 = vld [vmem:[#allocation10 + $0x328] sm:$0xff] }
 0x257   :  { %v973_v1 = vld [vmem:[#allocation10 + $0x708] sm:$0xff] }
 0x258   :  { %3973 = vmatpush2.bf16.msra.mxu0 %v5626_v20  ;;  %v5316_v20 = vcombine.low %v765_v7, %v769_v8  ;;  %v977_v2 = vld [vmem:[#allocation10 + $0x728] sm:$0xff] }
 0x259   :  { %4014 = vmatpush2.bf16.msra.mxu1 %v5754_v24  ;;  %3974 = vmatprep.subr.bf16.mxu0 %v5619_v26  ;;  %v5444_v24 = vcombine.low %v893_v9, %v897_v10  ;;  %v5309_v26 = vcombine.high %v757_v16, %v761_v17  ;;  %v837_v7 = vld [vmem:[#allocation10 + $0x2c8] sm:$0xff] }
 0x25a   :  { %4015 = vmatprep.subr.bf16.mxu1 %v5747_v27  ;;  %v5437_v27 = vcombine.high %v885_v18, %v889_v19  ;;  %v841_v8 = vld [vmem:[#allocation10 + $0x2e8] sm:$0xff] }
 0x25b   :  { %v965_v9 = vld [vmem:[#allocation10 + $0x6c8] sm:$0xff] }
 0x25c   :  { %3975 = vmatpush2.bf16.msra.mxu0 %v5618_v42  ;;  %v5308_v42 = vcombine.low %v757_v16, %v761_v17  ;;  %v969_v10 = vld [vmem:[#allocation10 + $0x6e8] sm:$0xff] }
 0x25d   :  { %4016 = vmatpush2.bf16.msra.mxu1 %v5746_v43  ;;  %4026 = vmatprep.subr.bf16.mxu0 %v5357_v44  ;;  %v5436_v43 = vcombine.low %v885_v18, %v889_v19  ;;  %v5301_v44 = vcombine.high %v749_v30, %v753_v37  ;;  %v829_v16 = vld [vmem:[#allocation10 + $0x288] sm:$0xff] }
 0x25e   :  { %4067 = vmatprep.subr.bf16.mxu1 %v5485_v45  ;;  %v5429_v45 = vcombine.high %v877_v38, %v881_v39  ;;  %v833_v17 = vld [vmem:[#allocation10 + $0x2a8] sm:$0xff] }
 0x25f   :  { %3977 = vmatmul.mubr.bf16.vlgmr.msra.gmra.mxu0 %v6540_v48  ;;  %v957_v18 = vld [vmem:[#allocation10 + $0x688] sm:$0xff] }
 0x260   :  { %4018 = vmatmul.mubr.bf16.vlgmr.msra.gmra.mxu1 %v6544_v32  ;;  %4027 = vmatpush1.bf16.msra.mxu0 %v5356_v29  ;;  %v997_v29 = vld [vmem:[#allocation10 + $0x7c8] sm:$0xff] }
 0x261   :  { %4058 = vmatprep.mubr.bf16.mxu0 %v6503_v11  ;;  %4068 = vmatpush1.bf16.msra.mxu1 %v5484_v49  ;;  %v5428_v49 = vcombine.low %v877_v38, %v881_v39  ;;  %v5549_v35 = vcombine.high %v997_v29, %v1001_v31  ;;  %v961_v19 = vld [vmem:[#allocation10 + $0x6a8] sm:$0xff] }
 0x262   :  { %4099 = vmatprep.mubr.bf16.mxu1 %v6511_v22  ;;  %4028 = vmatprep.subr.bf16.mxu0 %v5349_v33  ;;  %v5421_v33 = vcombine.high %v869_v46, %v873_v28  ;;  %v821_v30 = vld [vmem:[#allocation10 + $0x248] sm:$0xff] }
 0x263   :  { %4069 = vmatprep.subr.bf16.mxu1 %v5477_v52  ;;  %v865_v52 = vld [vmem:[#allocation10 + $0x3a8] sm:$0xff] }
 0x264   :  { %4029 = vmatpush1.bf16.msra.mxu0 %v5348_v34  ;;  %v5420_v34 = vcombine.low %v869_v46, %v873_v28  ;;  %v825_v37 = vld [vmem:[#allocation10 + $0x268] sm:$0xff] }
 0x265   :  { %4070 = vmatpush1.bf16.msra.mxu1 %v5476_v57  ;;  %4030 = vmatprep.subr.bf16.mxu0 %v5341_v58  ;;  %v5548_v57 = vcombine.low %v997_v29, %v1001_v31  ;;  %v5413_v58 = vcombine.high %v861_v50, %v865_v52  ;;  %v949_v38 = vld [vmem:[#allocation10 + $0x648] sm:$0xff] }
 0x266   :  { %4071 = vmatprep.subr.bf16.mxu1 %v5469_v36  ;;  %v5541_v36 = vcombine.high %v989_v53, %v993_v55  ;;  %v953_v39 = vld [vmem:[#allocation10 + $0x668] sm:$0xff] }
 0x267   :  { %v813_v46 = vld [vmem:[#allocation10 + $0x208] sm:$0xff] }
 0x268   :  { %4031 = vmatpush1.bf16.msra.mxu0 %v5340_v60  ;;  %v5412_v60 = vcombine.low %v861_v50, %v865_v52  ;;  %v817_v28 = vld [vmem:[#allocation10 + $0x228] sm:$0xff] }
 0x269   :  { %4072 = vmatpush1.bf16.msra.mxu1 %v5468_v61  ;;  %4032 = vmatprep.subr.bf16.mxu0 %v5333_v62  ;;  %v5540_v61 = vcombine.low %v989_v53, %v993_v55  ;;  %v5405_v62 = vcombine.high %v853_v56, %v857_v59  ;;  %v941_v29 = vld [vmem:[#allocation10 + $0x608] sm:$0xff] }
 0x26a   :  { %4073 = vmatprep.subr.bf16.mxu1 %v5461_v51  ;;  %v5533_v51 = vcombine.high %v981_v54, %v985_v41  ;;  %v945_v31 = vld [vmem:[#allocation10 + $0x628] sm:$0xff] }
 0x26b   :  { %v1061_v50 = vld [vmem:[#allocation10 + $0x9c8] sm:$0xff] }
 0x26c   :  { %4033 = vmatpush1.bf16.msra.mxu0 %v5332_v3  ;;  %v5404_v3 = vcombine.low %v853_v56, %v857_v59  ;;  %v1065_v52 = vld [vmem:[#allocation10 + $0x9e8] sm:$0xff] }
 0x26d   :  { %4074 = vmatpush1.bf16.msra.mxu1 %v5460_v4  ;;  %4034 = vmatprep.subr.bf16.mxu0 %v5325_v5  ;;  %v5532_v4 = vcombine.low %v981_v54, %v985_v41  ;;  %v5397_v5 = vcombine.high %v845_v63, %v849_v0  ;;  %v1189_v53 = vld [vmem:[#allocation10 + $0xdc8] sm:$0xff]  ;;  %v5612_v54 = vcombine.low %v1061_v50, %v1065_v52 }
 0x26e   :  { %4075 = vmatprep.subr.bf16.mxu1 %v5453_v6  ;;  %v5525_v6 = vcombine.high %v973_v1, %v977_v2  ;;  %v1193_v55 = vld [vmem:[#allocation10 + $0xde8] sm:$0xff] }
 0x26f   :  { %v1053_v56 = vld [vmem:[#allocation10 + $0x988] sm:$0xff] }
 0x270   :  { %4035 = vmatpush1.bf16.msra.mxu0 %v5324_v12  ;;  %v5396_v12 = vcombine.low %v845_v63, %v849_v0  ;;  %v1057_v59 = vld [vmem:[#allocation10 + $0x9a8] sm:$0xff] }
 0x271   :  { %4076 = vmatpush1.bf16.msra.mxu1 %v5452_v13  ;;  %4036 = vmatprep.subr.bf16.mxu0 %v5317_v14  ;;  %v5524_v13 = vcombine.low %v973_v1, %v977_v2  ;;  %v5389_v14 = vcombine.high %v837_v7, %v841_v8  ;;  %v1181_v41 = vld [vmem:[#allocation10 + $0xd88] sm:$0xff] }
 0x272   :  { %4077 = vmatprep.subr.bf16.mxu1 %v5445_v15  ;;  %v5517_v15 = vcombine.high %v965_v9, %v969_v10  ;;  %v1049_v63 = vld [vmem:[#allocation10 + $0x968] sm:$0xff] }
 0x273   :  { %v1173_v1 = vld [vmem:[#allocation10 + $0xd48] sm:$0xff] }
 0x274   :  { %4037 = vmatpush1.bf16.msra.mxu0 %v5316_v20  ;;  %v5388_v20 = vcombine.low %v837_v7, %v841_v8  ;;  %v1177_v2 = vld [vmem:[#allocation10 + $0xd68] sm:$0xff] }
 0x275   :  { %4078 = vmatpush1.bf16.msra.mxu1 %v5444_v24  ;;  %4038 = vmatprep.subr.bf16.mxu0 %v5309_v26  ;;  %v5516_v24 = vcombine.low %v965_v9, %v969_v10  ;;  %v5381_v26 = vcombine.high %v829_v16, %v833_v17  ;;  %v1037_v7 = vld [vmem:[#allocation10 + $0x908] sm:$0xff] }
 0x276   :  { %4079 = vmatprep.subr.bf16.mxu1 %v5437_v27  ;;  %v5509_v27 = vcombine.high %v957_v18, %v961_v19  ;;  %v1041_v8 = vld [vmem:[#allocation10 + $0x928] sm:$0xff] }
 0x277   :  { %v1165_v9 = vld [vmem:[#allocation10 + $0xd08] sm:$0xff] }
 0x278   :  { %4039 = vmatpush1.bf16.msra.mxu0 %v5308_v42  ;;  %v5380_v42 = vcombine.low %v829_v16, %v833_v17  ;;  %v1169_v10 = vld [vmem:[#allocation10 + $0xd28] sm:$0xff] }
 0x279   :  { %4080 = vmatpush1.bf16.msra.mxu1 %v5436_v43  ;;  %4040 = vmatprep.subr.bf16.mxu0 %v5301_v44  ;;  %v5508_v43 = vcombine.low %v957_v18, %v961_v19  ;;  %v5373_v44 = vcombine.high %v821_v30, %v825_v37  ;;  %v1029_v16 = vld [vmem:[#allocation10 + $0x8c8] sm:$0xff] }
 0x27a   :  { %4081 = vmatprep.subr.bf16.mxu1 %v5429_v45  ;;  %v5501_v45 = vcombine.high %v949_v38, %v953_v39  ;;  %v1033_v17 = vld [vmem:[#allocation10 + $0x8e8] sm:$0xff] }
 0x27b   :  { %v1157_v18 = vld [vmem:[#allocation10 + $0xcc8] sm:$0xff] }
 0x27c   :  { %4041 = vmatpush1.bf16.msra.mxu0 %v5300_v47  ;;  %v5372_v47 = vcombine.low %v821_v30, %v825_v37  ;;  %v1161_v19 = vld [vmem:[#allocation10 + $0xce8] sm:$0xff] }
 0x27d   :  { %4082 = vmatpush1.bf16.msra.mxu1 %v5428_v49  ;;  %4042 = vmatprep.subr.bf16.mxu0 %v5421_v33  ;;  %v5500_v49 = vcombine.low %v949_v38, %v953_v39  ;;  %v5365_v33 = vcombine.high %v813_v46, %v817_v28  ;;  %v1021_v30 = vld [vmem:[#allocation10 + $0x888] sm:$0xff] }
 0x27e   :  { %4083 = vmatprep.subr.bf16.mxu1 %v5549_v35  ;;  %v5493_v35 = vcombine.high %v941_v29, %v945_v31  ;;  %v1025_v37 = vld [vmem:[#allocation10 + $0x8a8] sm:$0xff] }
 0x27f   :  { %v1149_v38 = vld [vmem:[#allocation10 + $0xc88] sm:$0xff] }
 0x280   :  { %4043 = vmatpush2.bf16.msra.mxu0 %v5420_v34  ;;  %v5364_v34 = vcombine.low %v813_v46, %v817_v28  ;;  %v1153_v39 = vld [vmem:[#allocation10 + $0xca8] sm:$0xff] }
 0x281   :  { %4084 = vmatpush2.bf16.msra.mxu1 %v5548_v57  ;;  %4044 = vmatprep.subr.bf16.mxu0 %v5413_v58  ;;  %v5492_v57 = vcombine.low %v941_v29, %v945_v31  ;;  %v5613_v58 = vcombine.high %v1061_v50, %v1065_v52  ;;  %v1013_v46 = vld [vmem:[#allocation10 + $0x848] sm:$0xff] }
 0x282   :  { %4085 = vmatprep.subr.bf16.mxu1 %v5541_v36  ;;  %v5741_v36 = vcombine.high %v1189_v53, %v1193_v55  ;;  %v1017_v28 = vld [vmem:[#allocation10 + $0x868] sm:$0xff] }
 0x283   :  { %v1141_v29 = vld [vmem:[#allocation10 + $0xc48] sm:$0xff] }
 0x284   :  { %4045 = vmatpush2.bf16.msra.mxu0 %v5412_v60  ;;  %v1185_v60 = vld [vmem:[#allocation10 + $0xda8] sm:$0xff] }
 0x285   :  { %4086 = vmatpush2.bf16.msra.mxu1 %v5540_v61  ;;  %4046 = vmatprep.subr.bf16.mxu0 %v5405_v62  ;;  %v5740_v61 = vcombine.low %v1189_v53, %v1193_v55  ;;  %v5605_v62 = vcombine.high %v1053_v56, %v1057_v59  ;;  %v5733_v0 = vcombine.high %v1181_v41, %v1185_v60  ;;  %v1145_v31 = vld [vmem:[#allocation10 + $0xc68] sm:$0xff] }
 0x286   :  { %4087 = vmatprep.subr.bf16.mxu1 %v5533_v51  ;;  %v1045_v51 = vld [vmem:[#allocation10 + $0x948] sm:$0xff] }
 0x287   :  { %v1005_v50 = vld [vmem:[#allocation10 + $0x808] sm:$0xff] }
 0x288   :  { %4047 = vmatpush2.bf16.msra.mxu0 %v5404_v3  ;;  %v5604_v3 = vcombine.low %v1053_v56, %v1057_v59  ;;  %v1009_v52 = vld [vmem:[#allocation10 + $0x828] sm:$0xff] }
 0x289   :  { %4088 = vmatpush2.bf16.msra.mxu1 %v5532_v4  ;;  %4048 = vmatprep.subr.bf16.mxu0 %v5397_v5  ;;  %v5732_v4 = vcombine.low %v1181_v41, %v1185_v60  ;;  %v5597_v5 = vcombine.high %v1045_v51, %v1049_v63  ;;  %v1133_v53 = vld [vmem:[#allocation10 + $0xc08] sm:$0xff]  ;;  %v5556_v60 = vcombine.low %v1005_v50, %v1009_v52 }
 0x28a   :  { %4089 = vmatprep.subr.bf16.mxu1 %v5525_v6  ;;  %v5725_v6 = vcombine.high %v1173_v1, %v1177_v2  ;;  %v1137_v55 = vld [vmem:[#allocation10 + $0xc28] sm:$0xff] }
 0x28b   :  { %v1125_v56 = vld [vmem:[#allocation10 + $0xbc8] sm:$0xff] }
 0x28c   :  { %4049 = vmatpush2.bf16.msra.mxu0 %v5396_v12  ;;  %v5596_v12 = vcombine.low %v1045_v51, %v1049_v63  ;;  %v1129_v59 = vld [vmem:[#allocation10 + $0xbe8] sm:$0xff] }
 0x28d   :  { %4090 = vmatpush2.bf16.msra.mxu1 %v5524_v13  ;;  %4050 = vmatprep.subr.bf16.mxu0 %v5389_v14  ;;  %v5724_v13 = vcombine.low %v1173_v1, %v1177_v2  ;;  %v5589_v14 = vcombine.high %v1037_v7, %v1041_v8  ;;  %v1257_v41 = vld [vmem:[#allocation10 + $0xfe8] sm:$0xff] }
 0x28e   :  { %4091 = vmatprep.subr.bf16.mxu1 %v5517_v15  ;;  %v5717_v15 = vcombine.high %v1165_v9, %v1169_v10  ;;  %v1117_v63 = vld [vmem:[#allocation10 + $0xb88] sm:$0xff] }
 0x28f   :  { %v1245_v1 = vld [vmem:[#allocation10 + $0xf88] sm:$0xff] }
 0x290   :  { %4051 = vmatpush2.bf16.msra.mxu0 %v5388_v20  ;;  %v5588_v20 = vcombine.low %v1037_v7, %v1041_v8  ;;  %v1249_v2 = vld [vmem:[#allocation10 + $0xfa8] sm:$0xff] }
 0x291   :  { %4092 = vmatpush2.bf16.msra.mxu1 %v5516_v24  ;;  %4052 = vmatprep.subr.bf16.mxu0 %v5381_v26  ;;  %v5716_v24 = vcombine.low %v1165_v9, %v1169_v10  ;;  %v5581_v26 = vcombine.high %v1029_v16, %v1033_v17  ;;  %v1109_v7 = vld [vmem:[#allocation10 + $0xb48] sm:$0xff] }
 0x292   :  { %4093 = vmatprep.subr.bf16.mxu1 %v5509_v27  ;;  %v5709_v27 = vcombine.high %v1157_v18, %v1161_v19  ;;  %v1113_v8 = vld [vmem:[#allocation10 + $0xb68] sm:$0xff] }
 0x293   :  { %v1237_v9 = vld [vmem:[#allocation10 + $0xf48] sm:$0xff] }
 0x294   :  { %4053 = vmatpush2.bf16.msra.mxu0 %v5380_v42  ;;  %v5580_v42 = vcombine.low %v1029_v16, %v1033_v17  ;;  %v1241_v10 = vld [vmem:[#allocation10 + $0xf68] sm:$0xff] }
 0x295   :  { %4094 = vmatpush2.bf16.msra.mxu1 %v5508_v43  ;;  %4054 = vmatprep.subr.bf16.mxu0 %v5373_v44  ;;  %v5708_v43 = vcombine.low %v1157_v18, %v1161_v19  ;;  %v5573_v44 = vcombine.high %v1021_v30, %v1025_v37  ;;  %v1101_v16 = vld [vmem:[#allocation10 + $0xb08] sm:$0xff] }
 0x296   :  { %4095 = vmatprep.subr.bf16.mxu1 %v5501_v45  ;;  %v5701_v45 = vcombine.high %v1149_v38, %v1153_v39  ;;  %v1105_v17 = vld [vmem:[#allocation10 + $0xb28] sm:$0xff] }
 0x297   :  { %v1229_v18 = vld [vmem:[#allocation10 + $0xf08] sm:$0xff] }
 0x298   :  { %4055 = vmatpush2.bf16.msra.mxu0 %v5372_v47  ;;  %v5572_v47 = vcombine.low %v1021_v30, %v1025_v37  ;;  %v1233_v19 = vld [vmem:[#allocation10 + $0xf28] sm:$0xff] }
 0x299   :  { %4096 = vmatpush2.bf16.msra.mxu1 %v5500_v49  ;;  %4056 = vmatprep.subr.bf16.mxu0 %v5365_v33  ;;  %v5700_v49 = vcombine.low %v1149_v38, %v1153_v39  ;;  %v5565_v33 = vcombine.high %v1013_v46, %v1017_v28  ;;  %v1093_v30 = vld [vmem:[#allocation10 + $0xac8] sm:$0xff] }
 0x29a   :  { %4097 = vmatprep.subr.bf16.mxu1 %v5493_v35  ;;  %v5693_v35 = vcombine.high %v1141_v29, %v1145_v31  ;;  %v1097_v37 = vld [vmem:[#allocation10 + $0xae8] sm:$0xff] }
 0x29b   :  { %v1221_v38 = vld [vmem:[#allocation10 + $0xec8] sm:$0xff] }
 0x29c   :  { %4057 = vmatpush2.bf16.msra.mxu0 %v5364_v34  ;;  %v5564_v34 = vcombine.low %v1013_v46, %v1017_v28  ;;  %v1225_v39 = vld [vmem:[#allocation10 + $0xee8] sm:$0xff] }
 0x29d   :  { %4098 = vmatpush2.bf16.msra.mxu1 %v5492_v57  ;;  %4108 = vmatprep.subr.bf16.mxu0 %v5613_v58  ;;  %v5692_v57 = vcombine.low %v1141_v29, %v1145_v31  ;;  %v5557_v58 = vcombine.high %v1005_v50, %v1009_v52  ;;  %v1085_v46 = vld [vmem:[#allocation10 + $0xa88] sm:$0xff] }
 0x29e   :  { %4149 = vmatprep.subr.bf16.mxu1 %v5741_v36  ;;  %v5685_v36 = vcombine.high %v1133_v53, %v1137_v55  ;;  %v1089_v28 = vld [vmem:[#allocation10 + $0xaa8] sm:$0xff] }
 0x29f   :  { %4059 = vmatmul.mubr.bf16.vlgmr.msra.gmra.mxu0 %v6509_v21  ;;  %v1213_v29 = vld [vmem:[#allocation10 + $0xe88] sm:$0xff] }
 0x2a0   :  { %4100 = vmatmul.mubr.bf16.vlgmr.msra.gmra.mxu1 %v6513_v23  ;;  %4109 = vmatpush1.bf16.msra.mxu0 %v5612_v54  ;;  %v1253_v54 = vld [vmem:[#allocation10 + $0xfc8] sm:$0xff] }
 0x2a1   :  { %4140 = vmatprep.mubr.bf16.mxu0 %v6516_v25  ;;  %4150 = vmatpush1.bf16.msra.mxu1 %v5740_v61  ;;  %v5684_v61 = vcombine.low %v1133_v53, %v1137_v55  ;;  %v5805_v51 = vcombine.high %v1253_v54, %v1257_v41  ;;  %v1217_v31 = vld [vmem:[#allocation10 + $0xea8] sm:$0xff] }
 0x2a2   :  { %4181 = vmatprep.mubr.bf16.mxu1 %v6531_v40  ;;  %4110 = vmatprep.subr.bf16.mxu0 %v5605_v62  ;;  %v5677_v62 = vcombine.high %v1125_v56, %v1129_v59  ;;  %v1077_v50 = vld [vmem:[#allocation10 + $0xa48] sm:$0xff] }
 0x2a3   :  { %4151 = vmatprep.subr.bf16.mxu1 %v5733_v0  ;;  %v1121_v0 = vld [vmem:[#allocation10 + $0xba8] sm:$0xff] }
 0x2a4   :  { %4111 = vmatpush1.bf16.msra.mxu0 %v5604_v3  ;;  %v5676_v3 = vcombine.low %v1125_v56, %v1129_v59  ;;  %v1081_v52 = vld [vmem:[#allocation10 + $0xa68] sm:$0xff] }
 0x2a5   :  { %4152 = vmatpush1.bf16.msra.mxu1 %v5732_v4  ;;  %4112 = vmatprep.subr.bf16.mxu0 %v5597_v5  ;;  %v5804_v4 = vcombine.low %v1253_v54, %v1257_v41  ;;  %v5669_v5 = vcombine.high %v1117_v63, %v1121_v0  ;;  %v1205_v53 = vld [vmem:[#allocation10 + $0xe48] sm:$0xff] }
 0x2a6   :  { %4153 = vmatprep.subr.bf16.mxu1 %v5725_v6  ;;  %v5797_v6 = vcombine.high %v1245_v1, %v1249_v2  ;;  %v1209_v55 = vld [vmem:[#allocation10 + $0xe68] sm:$0xff] }
 0x2a7   :  { %v5757_v56 = vcombine.high %v1205_v53, %v1209_v55  ;;  %v1069_v59 = vld [vmem:[#allocation10 + $0xa08] sm:$0xff] }
 0x2a8   :  { %4113 = vmatpush1.bf16.msra.mxu0 %v5596_v12  ;;  %v5668_v12 = vcombine.low %v1117_v63, %v1121_v0  ;;  %v1073_v54 = vld [vmem:[#allocation10 + $0xa28] sm:$0xff] }
 0x2a9   :  { %4154 = vmatpush1.bf16.msra.mxu1 %v5724_v13  ;;  %4114 = vmatprep.subr.bf16.mxu0 %v5589_v14  ;;  %v5796_v13 = vcombine.low %v1245_v1, %v1249_v2  ;;  %v5661_v14 = vcombine.high %v1109_v7, %v1113_v8  ;;  %v1197_v41 = vld [vmem:[#allocation10 + $0xe08] sm:$0xff]  ;;  %v5621_v63 = vcombine.high %v1069_v59, %v1073_v54  ;;  %v806_v1 = vld [vmem:[#allocation10 + $0x1d0] sm:$0xff] }
 0x2aa   :  { %4155 = vmatprep.subr.bf16.mxu1 %v5717_v15  ;;  %v5789_v15 = vcombine.high %v1237_v9, %v1241_v10  ;;  %v810_v2 = vld [vmem:[#allocation10 + $0x1f0] sm:$0xff] }
 0x2ac   :  { %4115 = vmatpush1.bf16.msra.mxu0 %v5588_v20  ;;  %v5660_v20 = vcombine.low %v1109_v7, %v1113_v8  ;;  %v5359_v8 = vcombine.high %v806_v1, %v810_v2 }
 0x2ad   :  { %4156 = vmatpush1.bf16.msra.mxu1 %v5716_v24  ;;  %4116 = vmatprep.subr.bf16.mxu0 %v5581_v26  ;;  %v5788_v24 = vcombine.low %v1237_v9, %v1241_v10  ;;  %v5653_v26 = vcombine.high %v1101_v16, %v1105_v17  ;;  %v6557_v9 = vld [vmem:[#allocation11] sm:$0xff] }
 0x2ae   :  { %4157 = vmatprep.subr.bf16.mxu1 %v5709_v27  ;;  %v5781_v27 = vcombine.high %v1229_v18, %v1233_v19 }
 0x2b0   :  { %4117 = vmatpush1.bf16.msra.mxu0 %v5580_v42  ;;  %v5652_v42 = vcombine.low %v1101_v16, %v1105_v17  ;;  %v926_v17 = vld [vmem:[#allocation10 + $0x590] sm:$0xff] }
 0x2b1   :  { %4158 = vmatpush1.bf16.msra.mxu1 %v5708_v43  ;;  %4118 = vmatprep.subr.bf16.mxu0 %v5573_v44  ;;  %v5780_v43 = vcombine.low %v1229_v18, %v1233_v19  ;;  %v5645_v44 = vcombine.high %v1093_v30, %v1097_v37  ;;  %v930_v18 = vld [vmem:[#allocation10 + $0x5b0] sm:$0xff] }
 0x2b2   :  { %4159 = vmatprep.subr.bf16.mxu1 %v5701_v45  ;;  %v5773_v45 = vcombine.high %v1221_v38, %v1225_v39 }
 0x2b4   :  { %4119 = vmatpush1.bf16.msra.mxu0 %v5572_v47  ;;  %v5644_v47 = vcombine.low %v1093_v30, %v1097_v37  ;;  %v5479_v37 = vcombine.high %v926_v17, %v930_v18 }
 0x2b5   :  { %4160 = vmatpush1.bf16.msra.mxu1 %v5700_v49  ;;  %4120 = vmatprep.subr.bf16.mxu0 %v5565_v33  ;;  %v5772_v49 = vcombine.low %v1221_v38, %v1225_v39  ;;  %v5637_v33 = vcombine.high %v1085_v46, %v1089_v28  ;;  %v918_v38 = vld [vmem:[#allocation10 + $0x550] sm:$0xff] }
 0x2b6   :  { %4161 = vmatprep.subr.bf16.mxu1 %v5693_v35  ;;  %v5765_v35 = vcombine.high %v1213_v29, %v1217_v31  ;;  %v922_v39 = vld [vmem:[#allocation10 + $0x570] sm:$0xff] }
 0x2b8   :  { %4121 = vmatpush1.bf16.msra.mxu0 %v5564_v34  ;;  %v5636_v34 = vcombine.low %v1085_v46, %v1089_v28  ;;  %v5478_v46 = vcombine.low %v926_v17, %v930_v18 }
 0x2b9   :  { %4162 = vmatpush1.bf16.msra.mxu1 %v5692_v57  ;;  %4122 = vmatprep.subr.bf16.mxu0 %v5557_v58  ;;  %v1262_v57 = vlaneseq  ;;  %v5764_v58 = vcombine.low %v1213_v29, %v1217_v31 }
 0x2ba   :  { %4163 = vmatprep.subr.bf16.mxu1 %v5685_v36  ;;  %v5629_v36 = vcombine.high %v1077_v50, %v1081_v52 }
 0x2bc   :  { %4123 = vmatpush1.bf16.msra.mxu0 %v5556_v60  ;;  %v1201_v60 = vld [vmem:[#allocation10 + $0xe28] sm:$0xff] }
 0x2bd   :  { %4164 = vmatpush1.bf16.msra.mxu1 %v5684_v61  ;;  %4124 = vmatprep.subr.bf16.mxu0 %v5677_v62  ;;  %v5628_v61 = vcombine.low %v1077_v50, %v1081_v52  ;;  %v6554_v62 = vshrl.u32 %v1262_v57, 7  ;;  %v5749_v0 = vcombine.high %v1197_v41, %v1201_v60  ;;  %v5748_v7 = vcombine.low %v1197_v41, %v1201_v60  ;;  %v910_v52 = vld [vmem:[#allocation10 + $0x510] sm:$0xff] }
 0x2be   :  { %4165 = vmatprep.subr.bf16.mxu1 %v5805_v51  ;;  %v5756_v51 = vcombine.low %v1205_v53, %v1209_v55  ;;  %v914_v53 = vld [vmem:[#allocation10 + $0x530] sm:$0xff] }
 0x2bf   :  { %v774_v41 = vld [vmem:[#allocation10 + $0xd0] sm:$0xff] }
 0x2c0   :  { %4125 = vmatpush2.bf16.msra.mxu0 %v5676_v3  ;;  %v934_v3 = vld [vmem:[#allocation10 + $0x5d0] sm:$0xff] }
 0x2c1   :  { %4166 = vmatpush2.bf16.msra.mxu1 %v5804_v4  ;;  %4126 = vmatprep.subr.bf16.mxu0 %v5669_v5  ;;  %v938_v4 = vld [vmem:[#allocation10 + $0x5f0] sm:$0xff]  ;;  %v5620_v5 = vcombine.low %v1069_v59, %v1073_v54  ;;  %v5463_v54 = vcombine.high %v910_v52, %v914_v53 }
 0x2c2   :  { %4167 = vmatprep.subr.bf16.mxu1 %v5797_v6  ;;  %v1264_v6 = vsub.s32 0, %v6554_v62  ;;  %v5487_v10 = vcombine.high %v934_v3, %v938_v4  ;;  %v5486_v19 = vcombine.low %v934_v3, %v938_v4  ;;  %v778_v60 = vld [vmem:[#allocation10 + $0xf0] sm:$0xff] }
 0x2c3   :  { %v766_v3 = vld [vmem:[#allocation10 + $0x90] sm:$0xff] }
 0x2c4   :  { %4127 = vmatpush2.bf16.msra.mxu0 %v5668_v12  ;;  %v1268_v12 = vsub.s32 1, %v6554_v62  ;;  %v1265_v16 = vrot.slane %v6557_v9, %v1264_v6  ;;  %v770_v4 = vld [vmem:[#allocation10 + $0xb0] sm:$0xff] }
 0x2c5   :  { %4168 = vmatpush2.bf16.msra.mxu1 %v5796_v13  ;;  %4128 = vmatprep.subr.bf16.mxu0 %v5661_v14  ;;  %v798_v13 = vld [vmem:[#allocation10 + $0x190] sm:$0xff]  ;;  %v5318_v17 = vcombine.low %v766_v3, %v770_v4 }
 0x2c6   :  { %4169 = vmatprep.subr.bf16.mxu1 %v5789_v15  ;;  %v802_v14 = vld [vmem:[#allocation10 + $0x1b0] sm:$0xff]  ;;  %v5358_v15 = vcombine.low %v806_v1, %v810_v2  ;;  %v5327_v1 = vcombine.high %v774_v41, %v778_v60 }
 0x2c7   :  { %v898_v6 = vld [vmem:[#allocation10 + $0x4b0] sm:$0xff] }
 0x2c8   :  { %4129 = vmatpush2.bf16.msra.mxu0 %v5660_v20  ;;  %v1269_v20 = vrot.slane %v6557_v9, %v1268_v12 }
 0x2c9   :  { %4170 = vmatpush2.bf16.msra.mxu1 %v5788_v24  ;;  %4130 = vmatprep.subr.bf16.mxu0 %v5653_v26  ;;  %v5351_v24 = vcombine.high %v798_v13, %v802_v14  ;;  %v790_v26 = vld [vmem:[#allocation10 + $0x150] sm:$0xff] }
 0x2ca   :  { %4171 = vmatprep.subr.bf16.mxu1 %v5781_v27  ;;  %v794_v27 = vld [vmem:[#allocation10 + $0x170] sm:$0xff] }
 0x2cb   :  { %v5343_v28 = vcombine.high %v790_v26, %v794_v27  ;;  %v5342_v57 = vcombine.low %v790_v26, %v794_v27  ;;  %v754_v26 = vld [vmem:[#allocation10 + $0x30] sm:$0xff] }
 0x2cc   :  { %4131 = vmatpush2.bf16.msra.mxu0 %v5652_v42  ;;  %v878_v27 = vld [vmem:[#allocation10 + $0x410] sm:$0xff] }
 0x2cd   :  { %4172 = vmatpush2.bf16.msra.mxu1 %v5780_v43  ;;  %4132 = vmatprep.subr.bf16.mxu0 %v5645_v44  ;;  %v5350_v44 = vcombine.low %v798_v13, %v802_v14  ;;  %v758_v13 = vld [vmem:[#allocation10 + $0x50] sm:$0xff] }
 0x2ce   :  { %4173 = vmatprep.subr.bf16.mxu1 %v5773_v45  ;;  %v762_v14 = vld [vmem:[#allocation10 + $0x70] sm:$0xff] }
 0x2d0   :  { %4133 = vmatpush2.bf16.msra.mxu0 %v5644_v47 }
 0x2d1   :  { %4174 = vmatpush2.bf16.msra.mxu1 %v5772_v49  ;;  %4134 = vmatprep.subr.bf16.mxu0 %v5637_v33  ;;  %v5471_v49 = vcombine.high %v918_v38, %v922_v39  ;;  %v782_v33 = vld [vmem:[#allocation10 + $0x110] sm:$0xff] }
 0x2d2   :  { %4175 = vmatprep.subr.bf16.mxu1 %v5765_v35  ;;  %v786_v35 = vld [vmem:[#allocation10 + $0x130] sm:$0xff] }
 0x2d4   :  { %4135 = vmatpush2.bf16.msra.mxu0 %v5636_v34 }
 0x2d5   :  { %4176 = vmatpush2.bf16.msra.mxu1 %v5764_v58  ;;  %4136 = vmatprep.subr.bf16.mxu0 %v5629_v36  ;;  %v5470_v36 = vcombine.low %v918_v38, %v922_v39 }
 0x2d6   :  { %4177 = vmatprep.subr.bf16.mxu1 %v5757_v56  ;;  %v5335_v56 = vcombine.high %v782_v33, %v786_v35 }
 0x2d8   :  { %4137 = vmatpush2.bf16.msra.mxu0 %v5628_v61  ;;  %v902_v61 = vld [vmem:[#allocation10 + $0x4d0] sm:$0xff] }
 0x2d9   :  { %4178 = vmatpush2.bf16.msra.mxu1 %v5756_v51  ;;  %4138 = vmatprep.subr.bf16.mxu0 %v5621_v63  ;;  %v906_v51 = vld [vmem:[#allocation10 + $0x4f0] sm:$0xff]  ;;  %v5334_v63 = vcombine.low %v782_v33, %v786_v35 }
 0x2da   :  { %4179 = vmatprep.subr.bf16.mxu1 %v5749_v0  ;;  %v5462_v0 = vcombine.low %v910_v52, %v914_v53  ;;  %v5455_v2 = vcombine.high %v902_v61, %v906_v51  ;;  %v862_v33 = vld [vmem:[#allocation10 + $0x390] sm:$0xff] }
 0x2db   :  { %v866_v35 = vld [vmem:[#allocation10 + $0x3b0] sm:$0xff] }
 0x2dc   :  { %4139 = vmatpush2.bf16.msra.mxu0 %v5620_v5  ;;  %v894_v5 = vld [vmem:[#allocation10 + $0x490] sm:$0xff] }
 0x2dd   :  { %4180 = vmatpush2.bf16.msra.mxu1 %v5748_v7  ;;  %4190 = vmatprep.subr.bf16.mxu0 %v5359_v8  ;;  %v5326_v7 = vcombine.low %v774_v41, %v778_v60  ;;  %v5454_v8 = vcombine.low %v902_v61, %v906_v51  ;;  %v5447_v12 = vcombine.high %v894_v5, %v898_v6  ;;  %v994_v52 = vld [vmem:[#allocation10 + $0x7b0] sm:$0xff] }
 0x2de   :  { %4231 = vmatprep.subr.bf16.mxu1 %v5487_v10  ;;  %v5319_v10 = vcombine.high %v766_v3, %v770_v4  ;;  %v5446_v18 = vcombine.low %v894_v5, %v898_v6  ;;  %v5414_v41 = vcombine.low %v862_v33, %v866_v35 }
 0x2df   :  { %4141 = vmatmul.mubr.bf16.vlgmr.msra.gmra.mxu0 %v6540_v48  ;;  %v3896_v30 = vpop.f32.mrf.mxu0 }
 0x2e0   :  { %v3897_v42 = vadd.f32 %v3896_v30, %v1265_v16  ;;  %4182 = vmatmul.mubr.bf16.vlgmr.msra.gmra.mxu1 %v6544_v32  ;;  %4191 = vmatpush1.bf16.msra.mxu0 %v5358_v15  ;;  %v3937_v43 = vpop.f32.mrf.mxu1  ;;  %v886_v15 = vld [vmem:[#allocation10 + $0x450] sm:$0xff] }
 0x2e1   :  { %4222 = vmatprep.mubr.bf16.mxu0 %v6503_v11  ;;  %4232 = vmatpush1.bf16.msra.mxu1 %v5486_v19  ;;  %v3898_v45 = vpop.f32.mrf.mxu0  ;;  %v890_v16 = vld [vmem:[#allocation10 + $0x470] sm:$0xff]  ;;  %v5311_v19 = vcombine.high %v758_v13, %v762_v14 }
 0x2e2   :  { %v6565_v29 = vadd.f32 %v3937_v43, %v3897_v42  ;;  %4263 = vmatprep.mubr.bf16.mxu1 %v6511_v22  ;;  %v3899_v31 = vadd.f32 %v3898_v45, %v1269_v20  ;;  %v3939_v47 = vpop.f32.mrf.mxu1  ;;  %4192 = vmatprep.subr.bf16.mxu0 %v5351_v24  ;;  %v5439_v20 = vcombine.high %v886_v15, %v890_v16  ;;  %v750_v24 = vld [vmem:[#allocation10 + $0x10] sm:$0xff] }
 0x2e3   :  { %v3900_v50 = vpop.f32.mrf.mxu0  ;;  %4233 = vmatprep.subr.bf16.mxu1 %v5479_v37  ;;  %v882_v30 = vld [vmem:[#allocation10 + $0x430] sm:$0xff]  ;;  %v5310_v37 = vcombine.low %v758_v13, %v762_v14  ;;  %v5438_v38 = vcombine.low %v886_v15, %v890_v16  ;;  %v5303_v39 = vcombine.high %v750_v24, %v754_v26 }
 0x2e4   :  { %v6568_v55 = vadd.f32 %v3939_v47, %v3899_v31  ;;  %4193 = vmatpush1.bf16.msra.mxu0 %v5350_v44  ;;  %v3941_v34 = vpop.f32.mrf.mxu1  ;;  %v5431_v42 = vcombine.high %v878_v27, %v882_v30  ;;  %v870_v43 = vld [vmem:[#allocation10 + $0x3d0] sm:$0xff]  ;;  %v5430_v31 = vcombine.low %v878_v27, %v882_v30 }
 0x2e5   :  { %4234 = vmatpush1.bf16.msra.mxu1 %v5478_v46  ;;  %v3901_v58 = vpop.f32.mrf.mxu0  ;;  %4194 = vmatprep.subr.bf16.mxu0 %v5343_v28  ;;  %v874_v44 = vld [vmem:[#allocation10 + $0x3f0] sm:$0xff]  ;;  %v5302_v28 = vcombine.low %v750_v24, %v754_v26 }
 0x2e6   :  { %v3942_v59 = vpop.f32.mrf.mxu1  ;;  %4235 = vmatprep.subr.bf16.mxu1 %v5471_v49  ;;  %v998_v45 = vld [vmem:[#allocation10 + $0x7d0] sm:$0xff]  ;;  %v5423_v47 = vcombine.high %v870_v43, %v874_v44  ;;  %v5422_v53 = vcombine.low %v870_v43, %v874_v44 }
 0x2e7   :  { %v1002_v46 = vld [vmem:[#allocation10 + $0x7f0] sm:$0xff] }
 0x2e8   :  { %4195 = vmatpush1.bf16.msra.mxu0 %v5342_v57  ;;  %v5551_v49 = vcombine.high %v998_v45, %v1002_v46  ;;  %v990_v50 = vld [vmem:[#allocation10 + $0x790] sm:$0xff]  ;;  %v5550_v34 = vcombine.low %v998_v45, %v1002_v46  ;;  %v5415_v57 = vcombine.high %v862_v33, %v866_v35 }
 0x2e9   :  { %4236 = vmatpush1.bf16.msra.mxu1 %v5470_v36  ;;  %4196 = vmatprep.subr.bf16.mxu0 %v5335_v56  ;;  %v5543_v58 = vcombine.high %v990_v50, %v994_v52  ;;  %v854_v36 = vld [vmem:[#allocation10 + $0x350] sm:$0xff]  ;;  %v5542_v60 = vcombine.low %v990_v50, %v994_v52 }
 0x2ea   :  { %4237 = vmatprep.subr.bf16.mxu1 %v5463_v54  ;;  %v858_v56 = vld [vmem:[#allocation10 + $0x370] sm:$0xff] }
 0x2eb   :  { %v982_v59 = vld [vmem:[#allocation10 + $0x750] sm:$0xff]  ;;  %v5407_v61 = vcombine.high %v854_v36, %v858_v56  ;;  %v5406_v3 = vcombine.low %v854_v36, %v858_v56 }
 0x2ec   :  { %4197 = vmatpush1.bf16.msra.mxu0 %v5334_v63  ;;  %v986_v54 = vld [vmem:[#allocation10 + $0x770] sm:$0xff] }
 0x2ed   :  { %4238 = vmatpush1.bf16.msra.mxu1 %v5462_v0  ;;  %4198 = vmatprep.subr.bf16.mxu0 %v5327_v1  ;;  %v5535_v51 = vcombine.high %v982_v59, %v986_v54  ;;  %v846_v63 = vld [vmem:[#allocation10 + $0x310] sm:$0xff]  ;;  %v5534_v4 = vcombine.low %v982_v59, %v986_v54 }
 0x2ee   :  { %4239 = vmatprep.subr.bf16.mxu1 %v5455_v2  ;;  %v850_v0 = vld [vmem:[#allocation10 + $0x330] sm:$0xff] }
 0x2ef   :  { %v974_v1 = vld [vmem:[#allocation10 + $0x710] sm:$0xff]  ;;  %v5399_v5 = vcombine.high %v846_v63, %v850_v0  ;;  %v5398_v13 = vcombine.low %v846_v63, %v850_v0 }
 0x2f0   :  { %4199 = vmatpush1.bf16.msra.mxu0 %v5326_v7  ;;  %v978_v2 = vld [vmem:[#allocation10 + $0x730] sm:$0xff] }
 0x2f1   :  { %4240 = vmatpush1.bf16.msra.mxu1 %v5454_v8  ;;  %4200 = vmatprep.subr.bf16.mxu0 %v5319_v10  ;;  %v5527_v6 = vcombine.high %v974_v1, %v978_v2  ;;  %v838_v7 = vld [vmem:[#allocation10 + $0x2d0] sm:$0xff]  ;;  %v5526_v14 = vcombine.low %v974_v1, %v978_v2 }
 0x2f2   :  { %4241 = vmatprep.subr.bf16.mxu1 %v5447_v12  ;;  %v842_v8 = vld [vmem:[#allocation10 + $0x2f0] sm:$0xff] }
 0x2f3   :  { %v966_v10 = vld [vmem:[#allocation10 + $0x6d0] sm:$0xff]  ;;  %v5391_v15 = vcombine.high %v838_v7, %v842_v8  ;;  %v5390_v24 = vcombine.low %v838_v7, %v842_v8 }
 0x2f4   :  { %4201 = vmatpush1.bf16.msra.mxu0 %v5318_v17  ;;  %v970_v12 = vld [vmem:[#allocation10 + $0x6f0] sm:$0xff] }
 0x2f5   :  { %4242 = vmatpush1.bf16.msra.mxu1 %v5446_v18  ;;  %4202 = vmatprep.subr.bf16.mxu0 %v5311_v19  ;;  %v5519_v16 = vcombine.high %v966_v10, %v970_v12  ;;  %v830_v17 = vld [vmem:[#allocation10 + $0x290] sm:$0xff]  ;;  %v5518_v26 = vcombine.low %v966_v10, %v970_v12 }
 0x2f6   :  { %4243 = vmatprep.subr.bf16.mxu1 %v5439_v20  ;;  %v834_v18 = vld [vmem:[#allocation10 + $0x2b0] sm:$0xff] }
 0x2f7   :  { %v958_v19 = vld [vmem:[#allocation10 + $0x690] sm:$0xff]  ;;  %v5383_v27 = vcombine.high %v830_v17, %v834_v18  ;;  %v5382_v43 = vcombine.low %v830_v17, %v834_v18 }
 0x2f8   :  { %4203 = vmatpush1.bf16.msra.mxu0 %v5310_v37  ;;  %v962_v20 = vld [vmem:[#allocation10 + $0x6b0] sm:$0xff] }
 0x2f9   :  { %4244 = vmatpush1.bf16.msra.mxu1 %v5438_v38  ;;  %4204 = vmatprep.subr.bf16.mxu0 %v5303_v39  ;;  %v5511_v30 = vcombine.high %v958_v19, %v962_v20  ;;  %v822_v37 = vld [vmem:[#allocation10 + $0x250] sm:$0xff]  ;;  %v5510_v44 = vcombine.low %v958_v19, %v962_v20 }
 0x2fa   :  { %4245 = vmatprep.subr.bf16.mxu1 %v5431_v42  ;;  %v826_v38 = vld [vmem:[#allocation10 + $0x270] sm:$0xff] }
 0x2fb   :  { %v950_v39 = vld [vmem:[#allocation10 + $0x650] sm:$0xff]  ;;  %v5375_v45 = vcombine.high %v822_v37, %v826_v38  ;;  %v5374_v33 = vcombine.low %v822_v37, %v826_v38 }
 0x2fc   :  { %4205 = vmatpush1.bf16.msra.mxu0 %v5302_v28  ;;  %v954_v42 = vld [vmem:[#allocation10 + $0x670] sm:$0xff] }
 0x2fd   :  { %4246 = vmatpush1.bf16.msra.mxu1 %v5430_v31  ;;  %4206 = vmatprep.subr.bf16.mxu0 %v5423_v47  ;;  %v5503_v46 = vcombine.high %v950_v39, %v954_v42  ;;  %v814_v28 = vld [vmem:[#allocation10 + $0x210] sm:$0xff]  ;;  %v5502_v35 = vcombine.low %v950_v39, %v954_v42 }
 0x2fe   :  { %4247 = vmatprep.subr.bf16.mxu1 %v5551_v49  ;;  %v818_v31 = vld [vmem:[#allocation10 + $0x230] sm:$0xff] }
 0x2ff   :  { %v942_v47 = vld [vmem:[#allocation10 + $0x610] sm:$0xff]  ;;  %v5367_v50 = vcombine.high %v814_v28, %v818_v31  ;;  %v5366_v36 = vcombine.low %v814_v28, %v818_v31 }
 0x300   :  { %4207 = vmatpush2.bf16.msra.mxu0 %v5422_v53  ;;  %v946_v49 = vld [vmem:[#allocation10 + $0x630] sm:$0xff] }
 0x301   :  { %4248 = vmatpush2.bf16.msra.mxu1 %v5550_v34  ;;  %4208 = vmatprep.subr.bf16.mxu0 %v5415_v57  ;;  %v5495_v52 = vcombine.high %v942_v47, %v946_v49  ;;  %v1062_v53 = vld [vmem:[#allocation10 + $0x9d0] sm:$0xff]  ;;  %v5494_v56 = vcombine.low %v942_v47, %v946_v49 }
 0x302   :  { %4249 = vmatprep.subr.bf16.mxu1 %v5543_v58  ;;  %v1066_v34 = vld [vmem:[#allocation10 + $0x9f0] sm:$0xff] }
 0x303   :  { %v1190_v57 = vld [vmem:[#allocation10 + $0xdd0] sm:$0xff]  ;;  %v5615_v59 = vcombine.high %v1062_v53, %v1066_v34 }
 0x304   :  { %4209 = vmatpush2.bf16.msra.mxu0 %v5414_v41  ;;  %v1194_v58 = vld [vmem:[#allocation10 + $0xdf0] sm:$0xff] }
 0x305   :  { %4250 = vmatpush2.bf16.msra.mxu1 %v5542_v60  ;;  %4210 = vmatprep.subr.bf16.mxu0 %v5407_v61  ;;  %v5743_v54 = vcombine.high %v1190_v57, %v1194_v58  ;;  %v1054_v41 = vld [vmem:[#allocation10 + $0x990] sm:$0xff]  ;;  %v5614_v61 = vcombine.low %v1062_v53, %v1066_v34  ;;  %v5742_v0 = vcombine.low %v1190_v57, %v1194_v58 }
 0x306   :  { %4251 = vmatprep.subr.bf16.mxu1 %v5535_v51  ;;  %v1058_v60 = vld [vmem:[#allocation10 + $0x9b0] sm:$0xff] }
 0x307   :  { %v1182_v51 = vld [vmem:[#allocation10 + $0xd90] sm:$0xff]  ;;  %v5607_v1 = vcombine.high %v1054_v41, %v1058_v60  ;;  %v5606_v12 = vcombine.low %v1054_v41, %v1058_v60 }
 0x308   :  { %4211 = vmatpush2.bf16.msra.mxu0 %v5406_v3  ;;  %v1186_v63 = vld [vmem:[#allocation10 + $0xdb0] sm:$0xff] }
 0x309   :  { %4252 = vmatpush2.bf16.msra.mxu1 %v5534_v4  ;;  %4212 = vmatprep.subr.bf16.mxu0 %v5399_v5  ;;  %v1046_v2 = vld [vmem:[#allocation10 + $0x950] sm:$0xff]  ;;  %v5735_v5 = vcombine.high %v1182_v51, %v1186_v63 }
 0x30a   :  { %4253 = vmatprep.subr.bf16.mxu1 %v5527_v6  ;;  %v1050_v3 = vld [vmem:[#allocation10 + $0x970] sm:$0xff] }
 0x30b   :  { %v1174_v6 = vld [vmem:[#allocation10 + $0xd50] sm:$0xff]  ;;  %v5598_v38 = vcombine.low %v1046_v2, %v1050_v3 }
 0x30c   :  { %4213 = vmatpush2.bf16.msra.mxu0 %v5398_v13  ;;  %v1178_v7 = vld [vmem:[#allocation10 + $0xd70] sm:$0xff] }
 0x30d   :  { %4254 = vmatpush2.bf16.msra.mxu1 %v5526_v14  ;;  %4214 = vmatprep.subr.bf16.mxu0 %v5391_v15  ;;  %v5734_v14 = vcombine.low %v1182_v51, %v1186_v63  ;;  %v5599_v15 = vcombine.high %v1046_v2, %v1050_v3  ;;  %v1038_v19 = vld [vmem:[#allocation10 + $0x910] sm:$0xff] }
 0x30e   :  { %4255 = vmatprep.subr.bf16.mxu1 %v5519_v16  ;;  %v1042_v20 = vld [vmem:[#allocation10 + $0x930] sm:$0xff] }
 0x30f   :  { %v5591_v42 = vcombine.high %v1038_v19, %v1042_v20  ;;  %v1158_v28 = vld [vmem:[#allocation10 + $0xcd0] sm:$0xff]  ;;  %v5590_v47 = vcombine.low %v1038_v19, %v1042_v20 }
 0x310   :  { %4215 = vmatpush2.bf16.msra.mxu0 %v5390_v24  ;;  %v1162_v31 = vld [vmem:[#allocation10 + $0xcf0] sm:$0xff] }
 0x311   :  { %4256 = vmatpush2.bf16.msra.mxu1 %v5518_v26  ;;  %4216 = vmatprep.subr.bf16.mxu0 %v5383_v27  ;;  %v1166_v26 = vld [vmem:[#allocation10 + $0xd10] sm:$0xff]  ;;  %v5710_v58 = vcombine.low %v1158_v28, %v1162_v31 }
 0x312   :  { %4257 = vmatprep.subr.bf16.mxu1 %v5511_v30  ;;  %v1170_v27 = vld [vmem:[#allocation10 + $0xd30] sm:$0xff] }
 0x313   :  { %v5718_v49 = vcombine.low %v1166_v26, %v1170_v27  ;;  %v1150_v53 = vld [vmem:[#allocation10 + $0xc90] sm:$0xff] }
 0x314   :  { %4217 = vmatpush2.bf16.msra.mxu0 %v5382_v43  ;;  %v1154_v34 = vld [vmem:[#allocation10 + $0xcb0] sm:$0xff] }
 0x315   :  { %4258 = vmatpush2.bf16.msra.mxu1 %v5510_v44  ;;  %4218 = vmatprep.subr.bf16.mxu0 %v5375_v45  ;;  %v5719_v44 = vcombine.high %v1166_v26, %v1170_v27  ;;  %v1030_v45 = vld [vmem:[#allocation10 + $0x8d0] sm:$0xff]  ;;  %v5702_v51 = vcombine.low %v1150_v53, %v1154_v34 }
 0x316   :  { %4259 = vmatprep.subr.bf16.mxu1 %v5503_v46  ;;  %v1034_v46 = vld [vmem:[#allocation10 + $0x8f0] sm:$0xff] }
 0x317   :  { %v5582_v57 = vcombine.low %v1030_v45, %v1034_v46  ;;  %v1142_v41 = vld [vmem:[#allocation10 + $0xc50] sm:$0xff] }
 0x318   :  { %4219 = vmatpush2.bf16.msra.mxu0 %v5374_v33  ;;  %v5583_v33 = vcombine.high %v1030_v45, %v1034_v46  ;;  %v1146_v60 = vld [vmem:[#allocation10 + $0xc70] sm:$0xff] }
 0x319   :  { %4260 = vmatpush2.bf16.msra.mxu1 %v5502_v35  ;;  %4220 = vmatprep.subr.bf16.mxu0 %v5367_v50  ;;  %v5711_v35 = vcombine.high %v1158_v28, %v1162_v31  ;;  %v1022_v50 = vld [vmem:[#allocation10 + $0x890] sm:$0xff] }
 0x31a   :  { %4261 = vmatprep.subr.bf16.mxu1 %v5495_v52  ;;  %v1026_v52 = vld [vmem:[#allocation10 + $0x8b0] sm:$0xff] }
 0x31b   :  { %v1010_v2 = vld [vmem:[#allocation10 + $0x830] sm:$0xff] }
 0x31c   :  { %4221 = vmatpush2.bf16.msra.mxu0 %v5366_v36  ;;  %v5575_v36 = vcombine.high %v1022_v50, %v1026_v52  ;;  %v1134_v3 = vld [vmem:[#allocation10 + $0xc10] sm:$0xff] }
 0x31d   :  { %4262 = vmatpush2.bf16.msra.mxu1 %v5494_v56  ;;  %4272 = vmatprep.subr.bf16.mxu0 %v5615_v59  ;;  %v5703_v56 = vcombine.high %v1150_v53, %v1154_v34  ;;  %v1014_v59 = vld [vmem:[#allocation10 + $0x850] sm:$0xff] }
 0x31e   :  { %4313 = vmatprep.subr.bf16.mxu1 %v5743_v54  ;;  %v1018_v54 = vld [vmem:[#allocation10 + $0x870] sm:$0xff] }
 0x31f   :  { %v3978_v4 = vpop.f32.mrf.mxu0  ;;  %4223 = vmatmul.mubr.bf16.vlgmr.msra.gmra.mxu0 %v6509_v21  ;;  %v5567_v63 = vcombine.high %v1014_v59, %v1018_v54  ;;  %v1118_v19 = vld [vmem:[#allocation10 + $0xb90] sm:$0xff] }
 0x320   :  { %v3979_v8 = vadd.f32 %v3978_v4, %v6565_v29  ;;  %v4019_v10 = vpop.f32.mrf.mxu1  ;;  %4264 = vmatmul.mubr.bf16.vlgmr.msra.gmra.mxu1 %v6513_v23  ;;  %4273 = vmatpush1.bf16.msra.mxu0 %v5614_v61  ;;  %v5727_v29 = vcombine.high %v1174_v6, %v1178_v7  ;;  %v5574_v61 = vcombine.low %v1022_v50, %v1026_v52  ;;  %v1138_v4 = vld [vmem:[#allocation10 + $0xc30] sm:$0xff] }
 0x321   :  { %4304 = vmatprep.mubr.bf16.mxu0 %v6516_v25  ;;  %v3980_v13 = vpop.f32.mrf.mxu0  ;;  %4314 = vmatpush1.bf16.msra.mxu1 %v5742_v0  ;;  %v5695_v0 = vcombine.high %v1142_v41, %v1146_v60  ;;  %v1122_v20 = vld [vmem:[#allocation10 + $0xbb0] sm:$0xff] }
 0x322   :  { %v6574_v16 = vadd.f32 %v4019_v10, %v3979_v8  ;;  %v3981_v17 = vadd.f32 %v3980_v13, %v6568_v55  ;;  %4345 = vmatprep.mubr.bf16.mxu1 %v6531_v40  ;;  %v4021_v18 = vpop.f32.mrf.mxu1  ;;  %4274 = vmatprep.subr.bf16.mxu0 %v5607_v1  ;;  %v5726_v55 = vcombine.low %v1174_v6, %v1178_v7  ;;  %v1006_v1 = vld [vmem:[#allocation10 + $0x810] sm:$0xff] }
 0x323   :  { %v3982_v24 = vpop.f32.mrf.mxu0  ;;  %4315 = vmatprep.subr.bf16.mxu1 %v5735_v5  ;;  %v5566_v5 = vcombine.low %v1014_v59, %v1018_v54  ;;  %v5694_v6 = vcombine.low %v1142_v41, %v1146_v60  ;;  %v5559_v7 = vcombine.high %v1006_v1, %v1010_v2  ;;  %v5687_v8 = vcombine.high %v1134_v3, %v1138_v4  ;;  %v1126_v10 = vld [vmem:[#allocation10 + $0xbd0] sm:$0xff] }
 0x324   :  { %v6578_v30 = vadd.f32 %v4021_v18, %v3981_v17  ;;  %v4023_v37 = vpop.f32.mrf.mxu1  ;;  %4275 = vmatpush1.bf16.msra.mxu0 %v5606_v12  ;;  %v1130_v12 = vld [vmem:[#allocation10 + $0xbf0] sm:$0xff]  ;;  %v5686_v17 = vcombine.low %v1134_v3, %v1138_v4  ;;  %v5670_v45 = vcombine.low %v1118_v19, %v1122_v20 }
 0x325   :  { %v3983_v39 = vpop.f32.mrf.mxu0  ;;  %4316 = vmatpush1.bf16.msra.mxu1 %v5734_v14  ;;  %4276 = vmatprep.subr.bf16.mxu0 %v5599_v15  ;;  %v1254_v13 = vld [vmem:[#allocation10 + $0xfd0] sm:$0xff]  ;;  %v5558_v15 = vcombine.low %v1006_v1, %v1010_v2  ;;  %v5679_v18 = vcombine.high %v1126_v10, %v1130_v12  ;;  %v5678_v27 = vcombine.low %v1126_v10, %v1130_v12 }
 0x326   :  { %v4024_v43 = vpop.f32.mrf.mxu1  ;;  %4317 = vmatprep.subr.bf16.mxu1 %v5727_v29  ;;  %v1258_v14 = vld [vmem:[#allocation10 + $0xff0] sm:$0xff] }
 0x327   :  { %v5807_v29 = vcombine.high %v1254_v13, %v1258_v14  ;;  %v1246_v24 = vld [vmem:[#allocation10 + $0xf90] sm:$0xff]  ;;  %v5806_v37 = vcombine.low %v1254_v13, %v1258_v14 }
 0x328   :  { %4277 = vmatpush1.bf16.msra.mxu0 %v5598_v38  ;;  %v1250_v26 = vld [vmem:[#allocation10 + $0xfb0] sm:$0xff]  ;;  %v5671_v38 = vcombine.high %v1118_v19, %v1122_v20 }
 0x329   :  { %4318 = vmatpush1.bf16.msra.mxu1 %v5726_v55  ;;  %4278 = vmatprep.subr.bf16.mxu0 %v5591_v42  ;;  %v5799_v39 = vcombine.high %v1246_v24, %v1250_v26  ;;  %v1110_v55 = vld [vmem:[#allocation10 + $0xb50] sm:$0xff]  ;;  %v5798_v46 = vcombine.low %v1246_v24, %v1250_v26 }
 0x32a   :  { %4319 = vmatprep.subr.bf16.mxu1 %v5719_v44  ;;  %v1114_v42 = vld [vmem:[#allocation10 + $0xb70] sm:$0xff] }
 0x32b   :  { %v1238_v43 = vld [vmem:[#allocation10 + $0xf50] sm:$0xff]  ;;  %v5663_v28 = vcombine.high %v1110_v55, %v1114_v42  ;;  %v5662_v50 = vcombine.low %v1110_v55, %v1114_v42  ;;  %v1272_v42 = vsub.s32 2, %v6554_v62 }
 0x32c   :  { %4279 = vmatpush1.bf16.msra.mxu0 %v5590_v47  ;;  %v1242_v44 = vld [vmem:[#allocation10 + $0xf70] sm:$0xff] }
 0x32d   :  { %4320 = vmatpush1.bf16.msra.mxu1 %v5718_v49  ;;  %4280 = vmatprep.subr.bf16.mxu0 %v5583_v33  ;;  %v5791_v31 = vcombine.high %v1238_v43, %v1242_v44  ;;  %v1102_v47 = vld [vmem:[#allocation10 + $0xb10] sm:$0xff]  ;;  %v5790_v52 = vcombine.low %v1238_v43, %v1242_v44 }
 0x32e   :  { %4321 = vmatprep.subr.bf16.mxu1 %v5711_v35  ;;  %v1106_v49 = vld [vmem:[#allocation10 + $0xb30] sm:$0xff] }
 0x32f   :  { %v1230_v33 = vld [vmem:[#allocation10 + $0xf10] sm:$0xff]  ;;  %v5655_v53 = vcombine.high %v1102_v47, %v1106_v49  ;;  %v5654_v59 = vcombine.low %v1102_v47, %v1106_v49  ;;  %v1273_v47 = vrot.slane %v6557_v9, %v1272_v42 }
 0x330   :  { %4281 = vmatpush1.bf16.msra.mxu0 %v5582_v57  ;;  %v1234_v35 = vld [vmem:[#allocation10 + $0xf30] sm:$0xff] }
 0x331   :  { %4322 = vmatpush1.bf16.msra.mxu1 %v5710_v58  ;;  %4282 = vmatprep.subr.bf16.mxu0 %v5575_v36  ;;  %v5783_v34 = vcombine.high %v1230_v33, %v1234_v35  ;;  %v1094_v57 = vld [vmem:[#allocation10 + $0xad0] sm:$0xff]  ;;  %v5782_v54 = vcombine.low %v1230_v33, %v1234_v35  ;;  %v927_v33 = vld [vmem:[#allocation10 + $0x598] sm:$0xff] }
 0x332   :  { %4323 = vmatprep.subr.bf16.mxu1 %v5703_v56  ;;  %v1098_v58 = vld [vmem:[#allocation10 + $0xaf0] sm:$0xff]  ;;  %v931_v35 = vld [vmem:[#allocation10 + $0x5b8] sm:$0xff] }
 0x333   :  { %v1222_v36 = vld [vmem:[#allocation10 + $0xed0] sm:$0xff]  ;;  %v5647_v41 = vcombine.high %v1094_v57, %v1098_v58  ;;  %v5646_v1 = vcombine.low %v1094_v57, %v1098_v58  ;;  %v795_v57 = vld [vmem:[#allocation10 + $0x178] sm:$0xff] }
 0x334   :  { %4283 = vmatpush1.bf16.msra.mxu0 %v5574_v61  ;;  %v1226_v56 = vld [vmem:[#allocation10 + $0xef0] sm:$0xff] }
 0x335   :  { %4324 = vmatpush1.bf16.msra.mxu1 %v5702_v51  ;;  %4284 = vmatprep.subr.bf16.mxu0 %v5567_v63  ;;  %v5775_v60 = vcombine.high %v1222_v36, %v1226_v56  ;;  %v1086_v61 = vld [vmem:[#allocation10 + $0xa90] sm:$0xff]  ;;  %v5774_v2 = vcombine.low %v1222_v36, %v1226_v56  ;;  %v5481_v36 = vcombine.high %v927_v33, %v931_v35  ;;  %v919_v56 = vld [vmem:[#allocation10 + $0x558] sm:$0xff] }
 0x336   :  { %4325 = vmatprep.subr.bf16.mxu1 %v5695_v0  ;;  %v1090_v51 = vld [vmem:[#allocation10 + $0xab0] sm:$0xff] }
 0x337   :  { %v1214_v63 = vld [vmem:[#allocation10 + $0xe90] sm:$0xff]  ;;  %v5639_v3 = vcombine.high %v1086_v61, %v1090_v51  ;;  %v5638_v10 = vcombine.low %v1086_v61, %v1090_v51 }
 0x338   :  { %4285 = vmatpush1.bf16.msra.mxu0 %v5566_v5  ;;  %v1218_v0 = vld [vmem:[#allocation10 + $0xeb0] sm:$0xff] }
 0x339   :  { %4326 = vmatpush1.bf16.msra.mxu1 %v5694_v6  ;;  %4286 = vmatprep.subr.bf16.mxu0 %v5559_v7  ;;  %v5767_v4 = vcombine.high %v1214_v63, %v1218_v0  ;;  %v1078_v5 = vld [vmem:[#allocation10 + $0xa50] sm:$0xff]  ;;  %v5766_v12 = vcombine.low %v1214_v63, %v1218_v0 }
 0x33a   :  { %4327 = vmatprep.subr.bf16.mxu1 %v5687_v8  ;;  %v1082_v6 = vld [vmem:[#allocation10 + $0xa70] sm:$0xff] }
 0x33b   :  { %v1206_v7 = vld [vmem:[#allocation10 + $0xe50] sm:$0xff]  ;;  %v5631_v13 = vcombine.high %v1078_v5, %v1082_v6  ;;  %v5630_v19 = vcombine.low %v1078_v5, %v1082_v6  ;;  %v911_v6 = vld [vmem:[#allocation10 + $0x518] sm:$0xff] }
 0x33c   :  { %4287 = vmatpush1.bf16.msra.mxu0 %v5558_v15  ;;  %v1210_v8 = vld [vmem:[#allocation10 + $0xe70] sm:$0xff] }
 0x33d   :  { %4328 = vmatpush1.bf16.msra.mxu1 %v5686_v17  ;;  %4288 = vmatprep.subr.bf16.mxu0 %v5679_v18  ;;  %v5759_v14 = vcombine.high %v1206_v7, %v1210_v8  ;;  %v1070_v15 = vld [vmem:[#allocation10 + $0xa10] sm:$0xff]  ;;  %v5758_v20 = vcombine.low %v1206_v7, %v1210_v8  ;;  %v915_v7 = vld [vmem:[#allocation10 + $0x538] sm:$0xff] }
 0x33e   :  { %4329 = vmatprep.subr.bf16.mxu1 %v5807_v29  ;;  %v1074_v17 = vld [vmem:[#allocation10 + $0xa30] sm:$0xff] }
 0x33f   :  { %v1198_v18 = vld [vmem:[#allocation10 + $0xe10] sm:$0xff]  ;;  %v5623_v24 = vcombine.high %v1070_v15, %v1074_v17  ;;  %v5622_v55 = vcombine.low %v1070_v15, %v1074_v17  ;;  %v5465_v15 = vcombine.high %v911_v6, %v915_v7  ;;  %v775_v17 = vld [vmem:[#allocation10 + $0xd8] sm:$0xff] }
 0x340   :  { %4289 = vmatpush2.bf16.msra.mxu0 %v5678_v27  ;;  %v1202_v29 = vld [vmem:[#allocation10 + $0xe30] sm:$0xff]  ;;  %v807_v27 = vld [vmem:[#allocation10 + $0x1d8] sm:$0xff] }
 0x341   :  { %4330 = vmatpush2.bf16.msra.mxu1 %v5806_v37  ;;  %4290 = vmatprep.subr.bf16.mxu0 %v5671_v38  ;;  %v5751_v26 = vcombine.high %v1198_v18, %v1202_v29  ;;  %v811_v37 = vld [vmem:[#allocation10 + $0x1f8] sm:$0xff]  ;;  %v5750_v43 = vcombine.low %v1198_v18, %v1202_v29 }
 0x342   :  { %4331 = vmatprep.subr.bf16.mxu1 %v5799_v39  ;;  %v935_v38 = vld [vmem:[#allocation10 + $0x5d8] sm:$0xff]  ;;  %v5361_v44 = vcombine.high %v807_v27, %v811_v37  ;;  %v5360_v49 = vcombine.low %v807_v27, %v811_v37 }
 0x343   :  { %v939_v39 = vld [vmem:[#allocation10 + $0x5f8] sm:$0xff] }
 0x344   :  { %4291 = vmatpush2.bf16.msra.mxu0 %v5670_v45  ;;  %v5489_v45 = vcombine.high %v935_v38, %v939_v39  ;;  %v779_v18 = vld [vmem:[#allocation10 + $0xf8] sm:$0xff] }
 0x345   :  { %4332 = vmatpush2.bf16.msra.mxu1 %v5798_v46  ;;  %4292 = vmatprep.subr.bf16.mxu0 %v5663_v28  ;;  %v1276_v46 = vsub.s32 3, %v6554_v62  ;;  %v799_v28 = vld [vmem:[#allocation10 + $0x198] sm:$0xff]  ;;  %v5328_v42 = vcombine.low %v775_v17, %v779_v18 }
 0x346   :  { %4333 = vmatprep.subr.bf16.mxu1 %v5791_v31  ;;  %v803_v31 = vld [vmem:[#allocation10 + $0x1b8] sm:$0xff] }
 0x347   :  { %v903_v29 = vld [vmem:[#allocation10 + $0x4d8] sm:$0xff] }
 0x348   :  { %4293 = vmatpush2.bf16.msra.mxu0 %v5662_v50  ;;  %v5488_v50 = vcombine.low %v935_v38, %v939_v39  ;;  %v767_v37 = vld [vmem:[#allocation10 + $0x98] sm:$0xff] }
 0x349   :  { %4334 = vmatpush2.bf16.msra.mxu1 %v5790_v52  ;;  %4294 = vmatprep.subr.bf16.mxu0 %v5655_v53  ;;  %v1277_v52 = vrot.slane %v6557_v9, %v1276_v46  ;;  %v5353_v53 = vcombine.high %v799_v28, %v803_v31  ;;  %v5480_v9 = vcombine.low %v927_v33, %v931_v35  ;;  %v771_v38 = vld [vmem:[#allocation10 + $0xb8] sm:$0xff] }
 0x34a   :  { %4335 = vmatprep.subr.bf16.mxu1 %v5783_v34  ;;  %v791_v34 = vld [vmem:[#allocation10 + $0x158] sm:$0xff] }
 0x34b   :  { %v5345_v51 = vcombine.high %v791_v34, %v795_v57  ;;  %v895_v39 = vld [vmem:[#allocation10 + $0x498] sm:$0xff] }
 0x34c   :  { %4295 = vmatpush2.bf16.msra.mxu0 %v5654_v59  ;;  %v923_v59 = vld [vmem:[#allocation10 + $0x578] sm:$0xff] }
 0x34d   :  { %4336 = vmatpush2.bf16.msra.mxu1 %v5782_v54  ;;  %4296 = vmatprep.subr.bf16.mxu0 %v5647_v41  ;;  %v759_v46 = vld [vmem:[#allocation10 + $0x58] sm:$0xff] }
 0x34e   :  { %4337 = vmatprep.subr.bf16.mxu1 %v5775_v60  ;;  %v5352_v60 = vcombine.low %v799_v28, %v803_v31  ;;  %v763_v28 = vld [vmem:[#allocation10 + $0x78] sm:$0xff] }
 0x34f   :  { %v887_v31 = vld [vmem:[#allocation10 + $0x458] sm:$0xff]  ;;  %v5313_v35 = vcombine.high %v759_v46, %v763_v28 }
 0x350   :  { %4297 = vmatpush2.bf16.msra.mxu0 %v5646_v1 }
 0x351   :  { %4338 = vmatpush2.bf16.msra.mxu1 %v5774_v2  ;;  %4298 = vmatprep.subr.bf16.mxu0 %v5639_v3  ;;  %v5473_v2 = vcombine.high %v919_v56, %v923_v59  ;;  %v783_v3 = vld [vmem:[#allocation10 + $0x118] sm:$0xff] }
 0x352   :  { %4339 = vmatprep.subr.bf16.mxu1 %v5767_v4  ;;  %v787_v4 = vld [vmem:[#allocation10 + $0x138] sm:$0xff] }
 0x354   :  { %4299 = vmatpush2.bf16.msra.mxu0 %v5638_v10  ;;  %v5344_v10 = vcombine.low %v791_v34, %v795_v57  ;;  %v879_v34 = vld [vmem:[#allocation10 + $0x418] sm:$0xff] }
 0x355   :  { %4340 = vmatpush2.bf16.msra.mxu1 %v5766_v12  ;;  %4300 = vmatprep.subr.bf16.mxu0 %v5631_v13  ;;  %v5472_v13 = vcombine.low %v919_v56, %v923_v59  ;;  %v883_v57 = vld [vmem:[#allocation10 + $0x438] sm:$0xff] }
 0x356   :  { %4341 = vmatprep.subr.bf16.mxu1 %v5759_v14  ;;  %v5337_v14 = vcombine.high %v783_v3, %v787_v4  ;;  %v5433_v59 = vcombine.high %v879_v34, %v883_v57 }
 0x358   :  { %4301 = vmatpush2.bf16.msra.mxu0 %v5630_v19  ;;  %v907_v19 = vld [vmem:[#allocation10 + $0x4f8] sm:$0xff] }
 0x359   :  { %4342 = vmatpush2.bf16.msra.mxu1 %v5758_v20  ;;  %4302 = vmatprep.subr.bf16.mxu0 %v5623_v24  ;;  %v5336_v20 = vcombine.low %v783_v3, %v787_v4  ;;  %v5464_v24 = vcombine.low %v911_v6, %v915_v7  ;;  %v5457_v27 = vcombine.high %v903_v29, %v907_v19  ;;  %v867_v3 = vld [vmem:[#allocation10 + $0x3b8] sm:$0xff] }
 0x35a   :  { %4343 = vmatprep.subr.bf16.mxu1 %v5751_v26  ;;  %v5329_v26 = vcombine.high %v775_v17, %v779_v18  ;;  %v991_v4 = vld [vmem:[#allocation10 + $0x798] sm:$0xff] }
 0x35c   :  { %4303 = vmatpush2.bf16.msra.mxu0 %v5622_v55  ;;  %v899_v55 = vld [vmem:[#allocation10 + $0x4b8] sm:$0xff] }
 0x35d   :  { %4344 = vmatpush2.bf16.msra.mxu1 %v5750_v43  ;;  %4354 = vmatprep.subr.bf16.mxu0 %v5361_v44  ;;  %v5456_v43 = vcombine.low %v903_v29, %v907_v19  ;;  %v5321_v44 = vcombine.high %v767_v37, %v771_v38  ;;  %v5448_v33 = vcombine.low %v895_v39, %v899_v55  ;;  %v847_v19 = vld [vmem:[#allocation10 + $0x318] sm:$0xff] }
 0x35e   :  { %4395 = vmatprep.subr.bf16.mxu1 %v5489_v45  ;;  %v5449_v45 = vcombine.high %v895_v39, %v899_v55  ;;  %v839_v55 = vld [vmem:[#allocation10 + $0x2d8] sm:$0xff] }
 0x35f   :  { %v4060_v58 = vpop.f32.mrf.mxu0  ;;  %4305 = vmatmul.mubr.bf16.vlgmr.msra.gmra.mxu0 %v6540_v48 }
 0x360   :  { %v4061_v54 = vadd.f32 %v4060_v58, %v1273_v47  ;;  %v4101_v41 = vpop.f32.mrf.mxu1  ;;  %4346 = vmatmul.mubr.bf16.vlgmr.msra.gmra.mxu1 %v6544_v32  ;;  %4355 = vmatpush1.bf16.msra.mxu0 %v5360_v49  ;;  %v891_v47 = vld [vmem:[#allocation10 + $0x478] sm:$0xff]  ;;  %v5320_v49 = vcombine.low %v767_v37, %v771_v38  ;;  %v5312_v58 = vcombine.low %v759_v46, %v763_v28 }
 0x361   :  { %4386 = vmatprep.mubr.bf16.mxu0 %v6503_v11  ;;  %v4062_v61 = vpop.f32.mrf.mxu0  ;;  %4396 = vmatpush1.bf16.msra.mxu1 %v5488_v50  ;;  %v5441_v50 = vcombine.high %v887_v31, %v891_v47 }
 0x362   :  { %v6587_v63 = vadd.f32 %v4101_v41, %v4061_v54  ;;  %v4063_v0 = vadd.f32 %v4062_v61, %v1277_v52  ;;  %4427 = vmatprep.mubr.bf16.mxu1 %v6511_v22  ;;  %v4103_v1 = vpop.f32.mrf.mxu1  ;;  %4356 = vmatprep.subr.bf16.mxu0 %v5353_v53  ;;  %v751_v52 = vld [vmem:[#allocation10 + $0x18] sm:$0xff] }
 0x363   :  { %v4064_v5 = vpop.f32.mrf.mxu0  ;;  %4397 = vmatprep.subr.bf16.mxu1 %v5481_v36  ;;  %v755_v53 = vld [vmem:[#allocation10 + $0x38] sm:$0xff]  ;;  %v5440_v36 = vcombine.low %v887_v31, %v891_v47 }
 0x364   :  { %v6590_v8 = vadd.f32 %v4103_v1, %v4063_v0  ;;  %v4105_v11 = vpop.f32.mrf.mxu1  ;;  %4357 = vmatpush1.bf16.msra.mxu0 %v5352_v60  ;;  %v5305_v56 = vcombine.high %v751_v52, %v755_v53  ;;  %v871_v54 = vld [vmem:[#allocation10 + $0x3d8] sm:$0xff] }
 0x365   :  { %v4065_v12 = vpop.f32.mrf.mxu0  ;;  %4398 = vmatpush1.bf16.msra.mxu1 %v5480_v9  ;;  %4358 = vmatprep.subr.bf16.mxu0 %v5345_v51  ;;  %v875_v41 = vld [vmem:[#allocation10 + $0x3f8] sm:$0xff]  ;;  %v5304_v9 = vcombine.low %v751_v52, %v755_v53  ;;  %v5432_v51 = vcombine.low %v879_v34, %v883_v57 }
 0x366   :  { %v4106_v22 = vpop.f32.mrf.mxu1  ;;  %4399 = vmatprep.subr.bf16.mxu1 %v5473_v2  ;;  %v999_v60 = vld [vmem:[#allocation10 + $0x7d8] sm:$0xff]  ;;  %v5425_v0 = vcombine.high %v871_v54, %v875_v41  ;;  %v5424_v6 = vcombine.low %v871_v54, %v875_v41 }
 0x367   :  { %v1003_v61 = vld [vmem:[#allocation10 + $0x7f8] sm:$0xff] }
 0x368   :  { %4359 = vmatpush1.bf16.msra.mxu0 %v5344_v10  ;;  %v5553_v1 = vcombine.high %v999_v60, %v1003_v61  ;;  %v863_v2 = vld [vmem:[#allocation10 + $0x398] sm:$0xff]  ;;  %v5552_v7 = vcombine.low %v999_v60, %v1003_v61 }
 0x369   :  { %4400 = vmatpush1.bf16.msra.mxu1 %v5472_v13  ;;  %4360 = vmatprep.subr.bf16.mxu0 %v5337_v14  ;;  %v995_v5 = vld [vmem:[#allocation10 + $0x7b8] sm:$0xff]  ;;  %v5417_v11 = vcombine.high %v863_v2, %v867_v3 }
 0x36a   :  { %4401 = vmatprep.subr.bf16.mxu1 %v5465_v15  ;;  %v5545_v10 = vcombine.high %v991_v4, %v995_v5  ;;  %v855_v12 = vld [vmem:[#allocation10 + $0x358] sm:$0xff]  ;;  %v5416_v15 = vcombine.low %v863_v2, %v867_v3  ;;  %v5544_v17 = vcombine.low %v991_v4, %v995_v5 }
 0x36b   :  { %v859_v13 = vld [vmem:[#allocation10 + $0x378] sm:$0xff] }
 0x36c   :  { %4361 = vmatpush1.bf16.msra.mxu0 %v5336_v20  ;;  %v983_v14 = vld [vmem:[#allocation10 + $0x758] sm:$0xff]  ;;  %v5409_v18 = vcombine.high %v855_v12, %v859_v13 }
 0x36d   :  { %4402 = vmatpush1.bf16.msra.mxu1 %v5464_v24  ;;  %4362 = vmatprep.subr.bf16.mxu0 %v5329_v26  ;;  %v987_v22 = vld [vmem:[#allocation10 + $0x778] sm:$0xff] }
 0x36e   :  { %4403 = vmatprep.subr.bf16.mxu1 %v5457_v27  ;;  %v5537_v29 = vcombine.high %v983_v14, %v987_v22  ;;  %v851_v20 = vld [vmem:[#allocation10 + $0x338] sm:$0xff]  ;;  %v5408_v27 = vcombine.low %v855_v12, %v859_v13  ;;  %v5536_v37 = vcombine.low %v983_v14, %v987_v22 }
 0x36f   :  { %v975_v24 = vld [vmem:[#allocation10 + $0x718] sm:$0xff]  ;;  %v5401_v38 = vcombine.high %v847_v19, %v851_v20 }
 0x370   :  { %4363 = vmatpush1.bf16.msra.mxu0 %v5328_v42  ;;  %v979_v26 = vld [vmem:[#allocation10 + $0x738] sm:$0xff] }
 0x371   :  { %4404 = vmatpush1.bf16.msra.mxu1 %v5456_v43  ;;  %4364 = vmatprep.subr.bf16.mxu0 %v5321_v44  ;;  %v5529_v39 = vcombine.high %v975_v24, %v979_v26  ;;  %v843_v42 = vld [vmem:[#allocation10 + $0x2f8] sm:$0xff]  ;;  %v5528_v46 = vcombine.low %v975_v24, %v979_v26 }
 0x372   :  { %4405 = vmatprep.subr.bf16.mxu1 %v5449_v45  ;;  %v967_v43 = vld [vmem:[#allocation10 + $0x6d8] sm:$0xff]  ;;  %v5400_v45 = vcombine.low %v847_v19, %v851_v20  ;;  %v5393_v28 = vcombine.high %v839_v55, %v843_v42 }
 0x373   :  { %v971_v44 = vld [vmem:[#allocation10 + $0x6f8] sm:$0xff] }
 0x374   :  { %4365 = vmatpush1.bf16.msra.mxu0 %v5320_v49  ;;  %v5521_v31 = vcombine.high %v967_v43, %v971_v44  ;;  %v831_v47 = vld [vmem:[#allocation10 + $0x298] sm:$0xff]  ;;  %v5520_v52 = vcombine.low %v967_v43, %v971_v44 }
 0x375   :  { %4406 = vmatpush1.bf16.msra.mxu1 %v5448_v33  ;;  %4366 = vmatprep.subr.bf16.mxu0 %v5313_v35  ;;  %v835_v49 = vld [vmem:[#allocation10 + $0x2b8] sm:$0xff] }
 0x376   :  { %4407 = vmatprep.subr.bf16.mxu1 %v5441_v50  ;;  %v959_v33 = vld [vmem:[#allocation10 + $0x698] sm:$0xff]  ;;  %v5392_v50 = vcombine.low %v839_v55, %v843_v42  ;;  %v5385_v53 = vcombine.high %v831_v47, %v835_v49 }
 0x377   :  { %v963_v35 = vld [vmem:[#allocation10 + $0x6b8] sm:$0xff] }
 0x378   :  { %4367 = vmatpush1.bf16.msra.mxu0 %v5312_v58  ;;  %v5513_v34 = vcombine.high %v959_v33, %v963_v35  ;;  %v823_v57 = vld [vmem:[#allocation10 + $0x258] sm:$0xff]  ;;  %v5512_v54 = vcombine.low %v959_v33, %v963_v35 }
 0x379   :  { %4408 = vmatpush1.bf16.msra.mxu1 %v5440_v36  ;;  %4368 = vmatprep.subr.bf16.mxu0 %v5305_v56  ;;  %v827_v58 = vld [vmem:[#allocation10 + $0x278] sm:$0xff] }
 0x37a   :  { %4409 = vmatprep.subr.bf16.mxu1 %v5433_v59  ;;  %v951_v36 = vld [vmem:[#allocation10 + $0x658] sm:$0xff]  ;;  %v5384_v59 = vcombine.low %v831_v47, %v835_v49  ;;  %v5377_v41 = vcombine.high %v823_v57, %v827_v58 }
 0x37b   :  { %v955_v56 = vld [vmem:[#allocation10 + $0x678] sm:$0xff] }
 0x37c   :  { %4369 = vmatpush1.bf16.msra.mxu0 %v5304_v9  ;;  %v5505_v60 = vcombine.high %v951_v36, %v955_v56  ;;  %v815_v61 = vld [vmem:[#allocation10 + $0x218] sm:$0xff]  ;;  %v5504_v2 = vcombine.low %v951_v36, %v955_v56 }
 0x37d   :  { %4410 = vmatpush1.bf16.msra.mxu1 %v5432_v51  ;;  %4370 = vmatprep.subr.bf16.mxu0 %v5425_v0  ;;  %v819_v9 = vld [vmem:[#allocation10 + $0x238] sm:$0xff] }
 0x37e   :  { %4411 = vmatprep.subr.bf16.mxu1 %v5553_v1  ;;  %v943_v51 = vld [vmem:[#allocation10 + $0x618] sm:$0xff]  ;;  %v5376_v1 = vcombine.low %v823_v57, %v827_v58  ;;  %v5369_v3 = vcombine.high %v815_v61, %v819_v9 }
 0x37f   :  { %v947_v0 = vld [vmem:[#allocation10 + $0x638] sm:$0xff] }
 0x380   :  { %4371 = vmatpush2.bf16.msra.mxu0 %v5424_v6  ;;  %v5497_v4 = vcombine.high %v943_v51, %v947_v0  ;;  %v1063_v5 = vld [vmem:[#allocation10 + $0x9d8] sm:$0xff]  ;;  %v5496_v12 = vcombine.low %v943_v51, %v947_v0 }
 0x381   :  { %4412 = vmatpush2.bf16.msra.mxu1 %v5552_v7  ;;  %4372 = vmatprep.subr.bf16.mxu0 %v5417_v11  ;;  %v1067_v6 = vld [vmem:[#allocation10 + $0x9f8] sm:$0xff] }
 0x382   :  { %4413 = vmatprep.subr.bf16.mxu1 %v5545_v10  ;;  %v1191_v7 = vld [vmem:[#allocation10 + $0xdd8] sm:$0xff]  ;;  %v5368_v10 = vcombine.low %v815_v61, %v819_v9  ;;  %v5617_v13 = vcombine.high %v1063_v5, %v1067_v6 }
 0x383   :  { %v1195_v11 = vld [vmem:[#allocation10 + $0xdf8] sm:$0xff] }
 0x384   :  { %4373 = vmatpush2.bf16.msra.mxu0 %v5416_v15  ;;  %v5745_v14 = vcombine.high %v1191_v7, %v1195_v11  ;;  %v1055_v22 = vld [vmem:[#allocation10 + $0x998] sm:$0xff]  ;;  %v5744_v19 = vcombine.low %v1191_v7, %v1195_v11 }
 0x385   :  { %4414 = vmatpush2.bf16.msra.mxu1 %v5544_v17  ;;  %4374 = vmatprep.subr.bf16.mxu0 %v5409_v18  ;;  %v1059_v15 = vld [vmem:[#allocation10 + $0x9b8] sm:$0xff]  ;;  %v5616_v17 = vcombine.low %v1063_v5, %v1067_v6 }
 0x386   :  { %4415 = vmatprep.subr.bf16.mxu1 %v5537_v29  ;;  %v1183_v18 = vld [vmem:[#allocation10 + $0xd98] sm:$0xff]  ;;  %v5609_v20 = vcombine.high %v1055_v22, %v1059_v15  ;;  %v5608_v43 = vcombine.low %v1055_v22, %v1059_v15 }
 0x387   :  { %v1187_v29 = vld [vmem:[#allocation10 + $0xdb8] sm:$0xff] }
 0x388   :  { %4375 = vmatpush2.bf16.msra.mxu0 %v5408_v27  ;;  %v1047_v24 = vld [vmem:[#allocation10 + $0x958] sm:$0xff] }
 0x389   :  { %4416 = vmatpush2.bf16.msra.mxu1 %v5536_v37  ;;  %4376 = vmatprep.subr.bf16.mxu0 %v5401_v38  ;;  %v1051_v26 = vld [vmem:[#allocation10 + $0x978] sm:$0xff]  ;;  %v5737_v37 = vcombine.high %v1183_v18, %v1187_v29 }
 0x38a   :  { %4417 = vmatprep.subr.bf16.mxu1 %v5529_v39  ;;  %v1175_v38 = vld [vmem:[#allocation10 + $0xd58] sm:$0xff]  ;;  %v5600_v35 = vcombine.low %v1047_v24, %v1051_v26 }
 0x38b   :  { %v1179_v39 = vld [vmem:[#allocation10 + $0xd78] sm:$0xff] }
 0x38c   :  { %4377 = vmatpush2.bf16.msra.mxu0 %v5400_v45  ;;  %v5736_v45 = vcombine.low %v1183_v18, %v1187_v29  ;;  %v1043_v47 = vld [vmem:[#allocation10 + $0x938] sm:$0xff] }
 0x38d   :  { %4418 = vmatpush2.bf16.msra.mxu1 %v5528_v46  ;;  %4378 = vmatprep.subr.bf16.mxu0 %v5393_v28  ;;  %v5601_v46 = vcombine.high %v1047_v24, %v1051_v26  ;;  %v1167_v49 = vld [vmem:[#allocation10 + $0xd18] sm:$0xff] }
 0x38e   :  { %4419 = vmatprep.subr.bf16.mxu1 %v5521_v31  ;;  %v1039_v31 = vld [vmem:[#allocation10 + $0x918] sm:$0xff] }
 0x38f   :  { %v1171_v33 = vld [vmem:[#allocation10 + $0xd38] sm:$0xff] }
 0x390   :  { %4379 = vmatpush2.bf16.msra.mxu0 %v5392_v50  ;;  %v1031_v57 = vld [vmem:[#allocation10 + $0x8d8] sm:$0xff] }
 0x391   :  { %4420 = vmatpush2.bf16.msra.mxu1 %v5520_v52  ;;  %4380 = vmatprep.subr.bf16.mxu0 %v5385_v53  ;;  %v5728_v52 = vcombine.low %v1175_v38, %v1179_v39  ;;  %v5593_v53 = vcombine.high %v1039_v31, %v1043_v47  ;;  %v1035_v58 = vld [vmem:[#allocation10 + $0x8f8] sm:$0xff] }
 0x392   :  { %4421 = vmatprep.subr.bf16.mxu1 %v5513_v34  ;;  %v1159_v36 = vld [vmem:[#allocation10 + $0xcd8] sm:$0xff] }
 0x393   :  { %v1163_v56 = vld [vmem:[#allocation10 + $0xcf8] sm:$0xff] }
 0x394   :  { %4381 = vmatpush2.bf16.msra.mxu0 %v5384_v59  ;;  %v5592_v59 = vcombine.low %v1039_v31, %v1043_v47  ;;  %v1023_v61 = vld [vmem:[#allocation10 + $0x898] sm:$0xff] }
 0x395   :  { %4422 = vmatpush2.bf16.msra.mxu1 %v5512_v54  ;;  %4382 = vmatprep.subr.bf16.mxu0 %v5377_v41  ;;  %v5720_v54 = vcombine.low %v1167_v49, %v1171_v33  ;;  %v5585_v41 = vcombine.high %v1031_v57, %v1035_v58  ;;  %v1027_v9 = vld [vmem:[#allocation10 + $0x8b8] sm:$0xff] }
 0x396   :  { %4423 = vmatprep.subr.bf16.mxu1 %v5505_v60  ;;  %v5713_v60 = vcombine.high %v1159_v36, %v1163_v56  ;;  %v1151_v51 = vld [vmem:[#allocation10 + $0xc98] sm:$0xff] }
 0x397   :  { %v1155_v0 = vld [vmem:[#allocation10 + $0xcb8] sm:$0xff] }
 0x398   :  { %4383 = vmatpush2.bf16.msra.mxu0 %v5376_v1  ;;  %v5584_v1 = vcombine.low %v1031_v57, %v1035_v58  ;;  %v1015_v5 = vld [vmem:[#allocation10 + $0x858] sm:$0xff] }
 0x399   :  { %4424 = vmatpush2.bf16.msra.mxu1 %v5504_v2  ;;  %4384 = vmatprep.subr.bf16.mxu0 %v5369_v3  ;;  %v5712_v2 = vcombine.low %v1159_v36, %v1163_v56  ;;  %v5577_v3 = vcombine.high %v1023_v61, %v1027_v9  ;;  %v1019_v6 = vld [vmem:[#allocation10 + $0x878] sm:$0xff] }
 0x39a   :  { %4425 = vmatprep.subr.bf16.mxu1 %v5497_v4  ;;  %v5705_v4 = vcombine.high %v1151_v51, %v1155_v0  ;;  %v1143_v7 = vld [vmem:[#allocation10 + $0xc58] sm:$0xff]  ;;  %v5568_v29 = vcombine.low %v1015_v5, %v1019_v6 }
 0x39b   :  { %v1147_v11 = vld [vmem:[#allocation10 + $0xc78] sm:$0xff] }
 0x39c   :  { %4385 = vmatpush2.bf16.msra.mxu0 %v5368_v10  ;;  %v5576_v10 = vcombine.low %v1023_v61, %v1027_v9  ;;  %v1007_v22 = vld [vmem:[#allocation10 + $0x818] sm:$0xff] }
 0x39d   :  { %4426 = vmatpush2.bf16.msra.mxu1 %v5496_v12  ;;  %4436 = vmatprep.subr.bf16.mxu0 %v5617_v13  ;;  %v5704_v12 = vcombine.low %v1151_v51, %v1155_v0  ;;  %v5569_v13 = vcombine.high %v1015_v5, %v1019_v6  ;;  %v1011_v15 = vld [vmem:[#allocation10 + $0x838] sm:$0xff] }
 0x39e   :  { %4477 = vmatprep.subr.bf16.mxu1 %v5745_v14  ;;  %v5697_v14 = vcombine.high %v1143_v7, %v1147_v11  ;;  %v1139_v18 = vld [vmem:[#allocation10 + $0xc38] sm:$0xff] }
 0x39f   :  { %v4142_v27 = vpop.f32.mrf.mxu0  ;;  %4387 = vmatmul.mubr.bf16.vlgmr.msra.gmra.mxu0 %v6509_v21  ;;  %v1127_v26 = vld [vmem:[#allocation10 + $0xbd8] sm:$0xff] }
 0x3a0   :  { %v4143_v55 = vadd.f32 %v4142_v27, %v6587_v63  ;;  %v4183_v42 = vpop.f32.mrf.mxu1  ;;  %4428 = vmatmul.mubr.bf16.vlgmr.msra.gmra.mxu1 %v6513_v23  ;;  %4437 = vmatpush1.bf16.msra.mxu0 %v5616_v17  ;;  %v5729_v63 = vcombine.high %v1175_v38, %v1179_v39  ;;  %v1135_v17 = vld [vmem:[#allocation10 + $0xc18] sm:$0xff]  ;;  %v5560_v39 = vcombine.low %v1007_v22, %v1011_v15 }
 0x3a1   :  { %4468 = vmatprep.mubr.bf16.mxu0 %v6516_v25  ;;  %v6596_v44 = vpop.f32.mrf.mxu0  ;;  %4478 = vmatpush1.bf16.msra.mxu1 %v5744_v19  ;;  %v5696_v19 = vcombine.low %v1143_v7, %v1147_v11  ;;  %v5689_v24 = vcombine.high %v1135_v17, %v1139_v18  ;;  %v1131_v27 = vld [vmem:[#allocation10 + $0xbf8] sm:$0xff] }
 0x3a2   :  { %v6598_v28 = vadd.f32 %v4183_v42, %v4143_v55  ;;  %4509 = vmatprep.mubr.bf16.mxu1 %v6531_v40  ;;  %v6601_v21 = vpop.f32.mrf.mxu1  ;;  %4438 = vmatprep.subr.bf16.mxu0 %v5609_v20  ;;  %v5721_v40 = vcombine.high %v1167_v49, %v1171_v33  ;;  %v5561_v20 = vcombine.high %v1007_v22, %v1011_v15  ;;  %v1259_v38 = vld [vmem:[#allocation10 + $0xff8] sm:$0xff] }
 0x3a3   :  { %v4146_v23 = vpop.f32.mrf.mxu0  ;;  %4479 = vmatprep.subr.bf16.mxu1 %v5737_v37  ;;  %v1255_v37 = vld [vmem:[#allocation10 + $0xfd8] sm:$0xff]  ;;  %v5688_v55 = vcombine.low %v1135_v17, %v1139_v18  ;;  %v5681_v42 = vcombine.high %v1127_v26, %v1131_v27  ;;  %v5680_v47 = vcombine.low %v1127_v26, %v1131_v27 }
 0x3a4   :  { %v4187_v25 = vpop.f32.mrf.mxu1  ;;  %4439 = vmatpush1.bf16.msra.mxu0 %v5608_v43  ;;  %v5809_v43 = vcombine.high %v1255_v37, %v1259_v38  ;;  %v1251_v31 = vld [vmem:[#allocation10 + $0xfb8] sm:$0xff]  ;;  %v5808_v23 = vcombine.low %v1255_v37, %v1259_v38 }
 0x3a5   :  { %v4147_v50 = vpop.f32.mrf.mxu0  ;;  %4480 = vmatpush1.bf16.msra.mxu1 %v5736_v45  ;;  %4440 = vmatprep.subr.bf16.mxu0 %v5601_v46  ;;  %v1119_v45 = vld [vmem:[#allocation10 + $0xb98] sm:$0xff] }
 0x3a6   :  { %v4188_v34 = vpop.f32.mrf.mxu1  ;;  %4481 = vmatprep.subr.bf16.mxu1 %v5729_v63  ;;  %v1123_v46 = vld [vmem:[#allocation10 + $0xbb8] sm:$0xff] }
 0x3a7   :  { %v1247_v63 = vld [vmem:[#allocation10 + $0xf98] sm:$0xff]  ;;  %v5673_v49 = vcombine.high %v1119_v45, %v1123_v46 }
 0x3a8   :  { %4441 = vmatpush1.bf16.msra.mxu0 %v5600_v35  ;;  %v5801_v33 = vcombine.high %v1247_v63, %v1251_v31  ;;  %v1111_v25 = vld [vmem:[#allocation10 + $0xb58] sm:$0xff]  ;;  %v5800_v34 = vcombine.low %v1247_v63, %v1251_v31 }
 0x3a9   :  { %4482 = vmatpush1.bf16.msra.mxu1 %v5728_v52  ;;  %4442 = vmatprep.subr.bf16.mxu0 %v5593_v53  ;;  %v1115_v35 = vld [vmem:[#allocation10 + $0xb78] sm:$0xff]  ;;  %v5672_v53 = vcombine.low %v1119_v45, %v1123_v46 }
 0x3aa   :  { %4483 = vmatprep.subr.bf16.mxu1 %v5721_v40  ;;  %v1239_v50 = vld [vmem:[#allocation10 + $0xf58] sm:$0xff]  ;;  %v5665_v40 = vcombine.high %v1111_v25, %v1115_v35 }
 0x3ab   :  { %v1243_v52 = vld [vmem:[#allocation10 + $0xf78] sm:$0xff] }
 0x3ac   :  { %4443 = vmatpush1.bf16.msra.mxu0 %v5592_v59  ;;  %v5793_v57 = vcombine.high %v1239_v50, %v1243_v52  ;;  %v1103_v58 = vld [vmem:[#allocation10 + $0xb18] sm:$0xff] }
 0x3ad   :  { %4484 = vmatpush1.bf16.msra.mxu1 %v5720_v54  ;;  %4444 = vmatprep.subr.bf16.mxu0 %v5585_v41  ;;  %v1107_v36 = vld [vmem:[#allocation10 + $0xb38] sm:$0xff]  ;;  %v5664_v54 = vcombine.low %v1111_v25, %v1115_v35  ;;  %v5792_v41 = vcombine.low %v1239_v50, %v1243_v52  ;;  %v6113_v25 = vld [vmem:[%s6829_s7 + $0x70] sm:$0xff]  }
 0x3ae   :  { %4485 = vmatprep.subr.bf16.mxu1 %v5713_v60  ;;  %v1231_v56 = vld [vmem:[#allocation10 + $0xf18] sm:$0xff]  ;;  %v5657_v60 = vcombine.high %v1103_v58, %v1107_v36 }
 0x3af   :  { %v1235_v59 = vld [vmem:[#allocation10 + $0xf38] sm:$0xff] }
 0x3b0   :  { %4445 = vmatpush1.bf16.msra.mxu0 %v5584_v1  ;;  %v5785_v61 = vcombine.high %v1231_v56, %v1235_v59  ;;  %v1095_v9 = vld [vmem:[#allocation10 + $0xad8] sm:$0xff] }
 0x3b1   :  { %4486 = vmatpush1.bf16.msra.mxu1 %v5712_v2  ;;  %4446 = vmatprep.subr.bf16.mxu0 %v5577_v3  ;;  %v1099_v51 = vld [vmem:[#allocation10 + $0xaf8] sm:$0xff]  ;;  %v5656_v2 = vcombine.low %v1103_v58, %v1107_v36  ;;  %v5784_v3 = vcombine.low %v1231_v56, %v1235_v59 }
 0x3b2   :  { %4487 = vmatprep.subr.bf16.mxu1 %v5705_v4  ;;  %v1223_v0 = vld [vmem:[#allocation10 + $0xed8] sm:$0xff]  ;;  %v5649_v4 = vcombine.high %v1095_v9, %v1099_v51 }
 0x3b3   :  { %v1227_v1 = vld [vmem:[#allocation10 + $0xef8] sm:$0xff] }
 0x3b4   :  { %4447 = vmatpush1.bf16.msra.mxu0 %v5576_v10  ;;  %v5777_v5 = vcombine.high %v1223_v0, %v1227_v1  ;;  %v1087_v6 = vld [vmem:[#allocation10 + $0xa98] sm:$0xff] }
 0x3b5   :  { %4488 = vmatpush1.bf16.msra.mxu1 %v5704_v12  ;;  %4448 = vmatprep.subr.bf16.mxu0 %v5569_v13  ;;  %v1091_v7 = vld [vmem:[#allocation10 + $0xab8] sm:$0xff]  ;;  %v5648_v12 = vcombine.low %v1095_v9, %v1099_v51  ;;  %v5776_v13 = vcombine.low %v1223_v0, %v1227_v1  ;;  %v6123_v9 = vld [vmem:[%s6829_s7 + $0xe0] sm:$0xff]   ;;  %v6125_v1 = vld [vmem:[%s6829_s7 + $0x58] sm:$0xff]  }
 0x3b6   :  { %4489 = vmatprep.subr.bf16.mxu1 %v5697_v14  ;;  %v1215_v11 = vld [vmem:[#allocation10 + $0xe98] sm:$0xff]  ;;  %v5641_v14 = vcombine.high %v1087_v6, %v1091_v7  ;;  %v6122_v51 = vld [vmem:[%s6829_s7 + $0x20] sm:$0xff]  }
 0x3b7   :  { %v1219_v10 = vld [vmem:[#allocation10 + $0xeb8] sm:$0xff]  ;;  %v6124_v0 = vld [vmem:[%s6829_s7 + $0xa0] sm:$0xff]  }
 0x3b8   :  { %4449 = vmatpush1.bf16.msra.mxu0 %v5568_v29  ;;  %v5769_v22 = vcombine.high %v1215_v11, %v1219_v10  ;;  %v1079_v15 = vld [vmem:[#allocation10 + $0xa58] sm:$0xff] }
 0x3b9   :  { %4490 = vmatpush1.bf16.msra.mxu1 %v5696_v19  ;;  %4450 = vmatprep.subr.bf16.mxu0 %v5561_v20  ;;  %v1083_v17 = vld [vmem:[#allocation10 + $0xa78] sm:$0xff]  ;;  %v5640_v19 = vcombine.low %v1087_v6, %v1091_v7  ;;  %v5768_v20 = vcombine.low %v1215_v11, %v1219_v10  ;;  %v6131_v6 = vld [vmem:[%s6829_s7 + $0xd0] sm:$0xff]  }
 0x3ba   :  { %4491 = vmatprep.subr.bf16.mxu1 %v5689_v24  ;;  %v1207_v18 = vld [vmem:[#allocation10 + $0xe58] sm:$0xff]  ;;  %v5633_v24 = vcombine.high %v1079_v15, %v1083_v17  ;;  %v6130_v7 = vld [vmem:[%s6829_s7 + $0x10] sm:$0xff]  }
 0x3bb   :  { %v1211_v29 = vld [vmem:[#allocation10 + $0xe78] sm:$0xff]  ;;  %v6132_v11 = vld [vmem:[%s6829_s7 + $0x90] sm:$0xff]  }
 0x3bc   :  { %4451 = vmatpush1.bf16.msra.mxu0 %v5560_v39  ;;  %v5761_v26 = vcombine.high %v1207_v18, %v1211_v29  ;;  %v1071_v27 = vld [vmem:[#allocation10 + $0xa18] sm:$0xff] }
 0x3bd   :  { %4492 = vmatpush1.bf16.msra.mxu1 %v5688_v55  ;;  %4452 = vmatprep.subr.bf16.mxu0 %v5681_v42  ;;  %v1075_v37 = vld [vmem:[#allocation10 + $0xa38] sm:$0xff]  ;;  %v4145_v55 = vadd.f32 %v6596_v44, %v6590_v8  ;;  %v5632_v42 = vcombine.low %v1079_v15, %v1083_v17  ;;  %v6111_v8 = vld [vmem:[%s6829_s7 + $0xf8] sm:$0xff]   ;;  %v4519_v44 = vmax.f32 %v6578_v30, 0.0  ;;  %v6115_v30 = vld [vmem:[%s6829_s7 + $0xf0] sm:$0xff]  }
 0x3be   :  { %4493 = vmatprep.subr.bf16.mxu1 %v5809_v43  ;;  %v1199_v38 = vld [vmem:[#allocation10 + $0xe18] sm:$0xff]  ;;  %v5760_v43 = vcombine.low %v1207_v18, %v1211_v29  ;;  %v5625_v45 = vcombine.high %v1071_v27, %v1075_v37  ;;  %v5624_v31 = vcombine.low %v1071_v27, %v1075_v37  ;;  %v6139_v15 = vld [vmem:[%s6829_s7 + $0xc0] sm:$0xff]   ;;  %v4518_v18 = vmax.f32 %v6574_v16, 0.0  ;;  %v6142_v16 = vld [vmem:[%s6829_s7 + $0x138] sm:$0xff]  }
 0x3bf   :  { %v1203_v39 = vld [vmem:[#allocation10 + $0xe38] sm:$0xff]  ;;  %v4186_v63 = vadd.f32 %v6601_v21, %v4145_v55  ;;  %v6110_v21 = vld [vmem:[%s6829_s7 + $0x38] sm:$0xff]   ;;  %v4527_v35 = vpack.c.bf16 %v4519_v44, %v4519_v44  ;;  %v6138_v17 = vld [vmem:[%s6829_s7] sm:$0xff]  }
 0x3c0   :  { %4453 = vmatpush2.bf16.msra.mxu0 %v5680_v47  ;;  %v5753_v46 = vcombine.high %v1199_v38, %v1203_v39  ;;  %v5752_v47 = vcombine.low %v1199_v38, %v1203_v39  ;;  %v6118_v59 = vld [vmem:[%s6829_s7 + $0x28] sm:$0xff]   ;;  %v6140_v29 = vld [vmem:[%s6829_s7 + $0x80] sm:$0xff]   ;;  %v6143_v27 = vld [vmem:[%s6829_s7 + $0x170] sm:$0xff]  }
 0x3c1   :  { %4494 = vmatpush2.bf16.msra.mxu1 %v5808_v23  ;;  %4454 = vmatprep.subr.bf16.mxu0 %v5673_v49  ;;  %v6109_v23 = vld [vmem:[%s6829_s7 + $0x78] sm:$0xff]   ;;  %v4521_v49 = vmax.f32 %v4186_v63, 0.0  ;;  %v6133_v10 = vld [vmem:[%s6829_s7 + $0x48] sm:$0xff]   ;;  %v6159_v38 = vld [vmem:[%s6829_s7 + $0x1f0] sm:$0xff]  }
 0x3c2   :  { %4495 = vmatprep.subr.bf16.mxu1 %v5801_v33  ;;  %v6112_v33 = vld [vmem:[%s6829_s7 + $0xb8] sm:$0xff]   ;;  %v6144_v39 = vld [vmem:[%s6829_s7 + $0x130] sm:$0xff]   ;;  %v6145_v55 = vld [vmem:[%s6829_s7 + $0x168] sm:$0xff]  }
 0x3c3   :  { %v4529_v52 = vpack.c.bf16 %v4521_v49, %v4521_v49  ;;  %v6162_v63 = vld [vmem:[%s6829_s7 + $0x1a8] sm:$0xff]   ;;  %v6165_v44 = vld [vmem:[%s6829_s7 + $0x1d8] sm:$0xff]  }
 0x3c4   :  { %4455 = vmatpush2.bf16.msra.mxu0 %v5672_v53  ;;  %v6150_v49 = vld [vmem:[%s6829_s7 + $0x118] sm:$0xff]  }
 0x3c5   :  { %4496 = vmatpush2.bf16.msra.mxu1 %v5800_v34  ;;  %4456 = vmatprep.subr.bf16.mxu0 %v5665_v40  ;;  %v6114_v34 = vld [vmem:[%s6829_s7 + $0x30] sm:$0xff]  }
 0x3c6   :  { %4497 = vmatprep.subr.bf16.mxu1 %v5793_v57  ;;  %v6117_v57 = vld [vmem:[%s6829_s7 + $0x68] sm:$0xff]  }
 0x3c8   :  { %4457 = vmatpush2.bf16.msra.mxu0 %v5664_v54 }
 0x3c9   :  { %4498 = vmatpush2.bf16.msra.mxu1 %v5792_v41  ;;  %4458 = vmatprep.subr.bf16.mxu0 %v5657_v60  ;;  %v6120_v41 = vld [vmem:[%s6829_s7 + $0xa8] sm:$0xff]   ;;  %v6121_v60 = vld [vmem:[%s6829_s7 + $0x60] sm:$0xff]  }
 0x3ca   :  { %4499 = vmatprep.subr.bf16.mxu1 %v5785_v61 }
 0x3cc   :  { %4459 = vmatpush2.bf16.msra.mxu0 %v5656_v2  ;;  %v6127_v2 = vld [vmem:[%s6829_s7 + $0xd8] sm:$0xff]  }
 0x3cd   :  { %4500 = vmatpush2.bf16.msra.mxu1 %v5784_v3  ;;  %4460 = vmatprep.subr.bf16.mxu0 %v5649_v4  ;;  %v6126_v3 = vld [vmem:[%s6829_s7 + $0x18] sm:$0xff]  }
 0x3ce   :  { %4501 = vmatprep.subr.bf16.mxu1 %v5777_v5  ;;  %v6128_v4 = vld [vmem:[%s6829_s7 + $0x98] sm:$0xff]   ;;  %v6129_v5 = vld [vmem:[%s6829_s7 + $0x50] sm:$0xff]  }
 0x3d0   :  { %4461 = vmatpush2.bf16.msra.mxu0 %v5648_v12  ;;  %v6135_v12 = vld [vmem:[%s6829_s7 + $0xc8] sm:$0xff]  }
 0x3d1   :  { %4502 = vmatpush2.bf16.msra.mxu1 %v5776_v13  ;;  %4462 = vmatprep.subr.bf16.mxu0 %v5641_v14  ;;  %v6134_v13 = vld [vmem:[%s6829_s7 + $0x8] sm:$0xff]  }
 0x3d2   :  { %4503 = vmatprep.subr.bf16.mxu1 %v5769_v22  ;;  %v6136_v14 = vld [vmem:[%s6829_s7 + $0x88] sm:$0xff]   ;;  %v6137_v22 = vld [vmem:[%s6829_s7 + $0x40] sm:$0xff]  }
 0x3d4   :  { %4463 = vmatpush2.bf16.msra.mxu0 %v5640_v19  ;;  %v6141_v19 = vld [vmem:[%s6829_s7 + $0x178] sm:$0xff]  }
 0x3d5   :  { %4504 = vmatpush2.bf16.msra.mxu1 %v5768_v20  ;;  %4464 = vmatprep.subr.bf16.mxu0 %v5633_v24  ;;  %v4520_v20 = vmax.f32 %v6598_v28, 0.0  ;;  %v6157_v24 = vld [vmem:[%s6829_s7 + $0x1f8] sm:$0xff]  }
 0x3d6   :  { %4505 = vmatprep.subr.bf16.mxu1 %v5761_v26  ;;  %v4526_v26 = vpack.c.bf16 %v4518_v18, %v4518_v18  ;;  %v6158_v28 = vld [vmem:[%s6829_s7 + $0x1b8] sm:$0xff]  }
 0x3d7   :  { %v4528_v37 = vpack.c.bf16 %v4520_v20, %v4520_v20 }
 0x3d8   :  { %4465 = vmatpush2.bf16.msra.mxu0 %v5632_v42  ;;  %v6160_v42 = vld [vmem:[%s6829_s7 + $0x1b0] sm:$0xff]  }
 0x3d9   :  { %4506 = vmatpush2.bf16.msra.mxu1 %v5760_v43  ;;  %4466 = vmatprep.subr.bf16.mxu0 %v5625_v45  ;;  %v6161_v43 = vld [vmem:[%s6829_s7 + $0x1e8] sm:$0xff]  }
 0x3da   :  { %4507 = vmatprep.subr.bf16.mxu1 %v5753_v46  ;;  %v6146_v45 = vld [vmem:[%s6829_s7 + $0x128] sm:$0xff]   ;;  %v6147_v46 = vld [vmem:[%s6829_s7 + $0x160] sm:$0xff]  }
 0x3dc   :  { %4467 = vmatpush2.bf16.msra.mxu0 %v5624_v31  ;;  %v6163_v31 = vld [vmem:[%s6829_s7 + $0x1e0] sm:$0xff]  }
 0x3dd   :  { %4508 = vmatpush2.bf16.msra.mxu1 %v5752_v47  ;;  %5932 = vmatprep.subr.bf16.mxu0 %v6109_v23  ;;  %v6148_v47 = vld [vmem:[%s6829_s7 + $0x120] sm:$0xff]   ;;  %v6149_v23 = vld [vmem:[%s6829_s7 + $0x158] sm:$0xff]  }
 0x3de   :  { %5954 = vmatprep.subr.bf16.mxu1 %v6111_v8  ;;  %v6164_v8 = vld [vmem:[%s6829_s7 + $0x1a0] sm:$0xff]  }
 0x3df   :  { %v6622_v50 = vpop.f32.mrf.mxu0  ;;  %4469 = vmatmul.mubr.bf16.vlgmr.msra.gmra.mxu0 %v6540_v48  ;;  %v6116_v48 = vld [vmem:[%s6829_s7 + $0xb0] sm:$0xff]  }
 0x3e0   :  { %v6628_v53 = vpop.f32.mrf.mxu1  ;;  %4510 = vmatmul.mubr.bf16.vlgmr.msra.gmra.mxu1 %v6544_v32  ;;  %5933 = vmatpush3.bf16.msra.mxu0 %v6110_v21  ;;  %v6119_v32 = vld [vmem:[%s6829_s7 + $0xe8] sm:$0xff]   ;;  %v6151_v21 = vld [vmem:[%s6829_s7 + $0x150] sm:$0xff]  }
 0x3e1   :  { %5085 = vmatprep.mubr.bf16.mxu0 %v4527_v35  ;;  %v6634_v40 = vpop.f32.mrf.mxu0  ;;  %5955 = vmatpush3.bf16.msra.mxu1 %v6112_v33  ;;  %v6166_v33 = vld [vmem:[%s6829_s7 + $0x198] sm:$0xff]   ;;  %v6153_v35 = vld [vmem:[%s6829_s7 + $0x148] sm:$0xff]  }
 0x3e2   :  { %5125 = vmatprep.mubr.bf16.mxu1 %v4529_v52  ;;  %v6642_v58 = vpop.f32.mrf.mxu1  ;;  %5934 = vmatprep.subr.bf16.mxu0 %v6113_v25  ;;  %v6152_v25 = vld [vmem:[%s6829_s7 + $0x110] sm:$0xff]   ;;  %v1284_v52 = vsub.s32 5, %v6554_v62 }
 0x3e3   :  { %v4228_v36 = vpop.f32.mrf.mxu0  ;;  %5956 = vmatprep.subr.bf16.mxu1 %v6115_v30  ;;  %v1280_v30 = vsub.s32 4, %v6554_v62 }
 0x3e4   :  { %v4269_v56 = vpop.f32.mrf.mxu1  ;;  %5935 = vmatpush3.bf16.msra.mxu0 %v6114_v34  ;;  %v6154_v34 = vld [vmem:[%s6829_s7 + $0x108] sm:$0xff]  }
 0x3e5   :  { %v4229_v54 = vpop.f32.mrf.mxu0  ;;  %5957 = vmatpush3.bf16.msra.mxu1 %v6116_v48  ;;  %5936 = vmatprep.subr.bf16.mxu0 %v6117_v57  ;;  %v6155_v48 = vld [vmem:[%s6829_s7 + $0x140] sm:$0xff]   ;;  %v6173_v57 = vld [vmem:[#allocation11] sm:$0xff] }
 0x3e6   :  { %v4270_v61 = vpop.f32.mrf.mxu1  ;;  %5958 = vmatprep.subr.bf16.mxu1 %v6119_v32  ;;  %v1281_v32 = vrot.slane %v6173_v57, %v1280_v30  ;;  %v1285_v36 = vrot.slane %v6173_v57, %v1284_v52  ;;  %v6156_v56 = vld [vmem:[%s6829_s7 + $0x100] sm:$0xff]  }
 0x3e8   :  { %5937 = vmatpush3.bf16.msra.mxu0 %v6118_v59  ;;  %v4225_v59 = vadd.f32 %v6622_v50, %v1281_v32  ;;  %v4227_v54 = vadd.f32 %v6634_v40, %v1285_v36 }
 0x3e9   :  { %5959 = vmatpush3.bf16.msra.mxu1 %v6120_v41  ;;  %5938 = vmatprep.subr.bf16.mxu0 %v6121_v60  ;;  %v6167_v60 = vld [vmem:[%s6829_s7 + $0x1d0] sm:$0xff]  }
 0x3ea   :  { %5960 = vmatprep.subr.bf16.mxu1 %v6123_v9  ;;  %v4266_v41 = vadd.f32 %v6628_v53, %v4225_v59  ;;  %v6168_v9 = vld [vmem:[%s6829_s7 + $0x190] sm:$0xff]   ;;  %v6169_v53 = vld [vmem:[%s6829_s7 + $0x1c8] sm:$0xff]  }
 0x3ec   :  { %5939 = vmatpush3.bf16.msra.mxu0 %v6122_v51  ;;  %v4268_v51 = vadd.f32 %v6642_v58, %v4227_v54 }
 0x3ed   :  { %5961 = vmatpush3.bf16.msra.mxu1 %v6124_v0  ;;  %5940 = vmatprep.subr.bf16.mxu0 %v6125_v1 }
 0x3ee   :  { %5962 = vmatprep.subr.bf16.mxu1 %v6127_v2 }
 0x3f0   :  { %5941 = vmatpush3.bf16.msra.mxu0 %v6126_v3 }
 0x3f1   :  { %5963 = vmatpush3.bf16.msra.mxu1 %v6128_v4  ;;  %5942 = vmatprep.subr.bf16.mxu0 %v6129_v5  ;;  %v6170_v5 = vld [vmem:[%s6829_s7 + $0x188] sm:$0xff]  }
 0x3f2   :  { %5964 = vmatprep.subr.bf16.mxu1 %v6131_v6 }
 0x3f4   :  { %5943 = vmatpush3.bf16.msra.mxu0 %v6130_v7 }
 0x3f5   :  { %5965 = vmatpush3.bf16.msra.mxu1 %v6132_v11  ;;  %5944 = vmatprep.subr.bf16.mxu0 %v6133_v10 }
 0x3f6   :  { %5966 = vmatprep.subr.bf16.mxu1 %v6135_v12 }
 0x3f8   :  { %5945 = vmatpush3.bf16.msra.mxu0 %v6134_v13  ;;  %v6171_v13 = vld [vmem:[%s6829_s7 + $0x1c0] sm:$0xff]  }
 0x3f9   :  { %5967 = vmatpush3.bf16.msra.mxu1 %v6136_v14  ;;  %5946 = vmatprep.subr.bf16.mxu0 %v6137_v22  ;;  %v6172_v14 = vld [vmem:[%s6829_s7 + $0x180] sm:$0xff]   ;;  %s6358_s7 = smov 127  }
 0x3fa   :  { %5968 = vmatprep.subr.bf16.mxu1 %v6139_v15 }
 0x3fc   :  { %5947 = vmatpush3.bf16.msra.mxu0 %v6138_v17 }
 0x3fd   :  { %5969 = vmatpush3.bf16.msra.mxu1 %v6140_v29  ;;  %5976 = vmatprep.subr.bf16.mxu0 %v6141_v19 }
 0x3fe   :  { %5998 = vmatprep.subr.bf16.mxu1 %v6157_v24 }
 0x3ff   :  { %5086 = vmatmul.mubr.bf16.vlgmr.msra.gmra.mxu0 %v4526_v26 }
 0x400   :  { %5126 = vmatmul.mubr.bf16.vlgmr.msra.gmra.mxu1 %v4528_v37  ;;  %5977 = vmatpush3.bf16.msra.mxu0 %v6142_v16 }
 0x401   :  { %5978 = vmatprep.subr.bf16.mxu0 %v6143_v27  ;;  %5999 = vmatpush3.bf16.msra.mxu1 %v6158_v28  ;;  %v1288_v27 = vsub.s32 6, %v6554_v62  ;;  %v1292_v28 = vsub.s32 7, %v6554_v62 }
 0x402   :  { %6000 = vmatprep.subr.bf16.mxu1 %v6159_v38 }
 0x403   :  { %v1289_v37 = vrot.slane %v6173_v57, %v1288_v27  ;;  %v1293_v38 = vrot.slane %v6173_v57, %v1292_v28  ;;  %v5810_v57 = vld [vmem:[#allocation13] ss:$0 sm:$0xff] }
 0x404   :  { %5979 = vmatpush3.bf16.msra.mxu0 %v6144_v39 }
 0x405   :  { %5980 = vmatprep.subr.bf16.mxu0 %v6145_v55  ;;  %6001 = vmatpush3.bf16.msra.mxu1 %v6160_v42 }
 0x406   :  { %6002 = vmatprep.subr.bf16.mxu1 %v6161_v43 }
 0x408   :  { %5981 = vmatpush3.bf16.msra.mxu0 %v6146_v45 }
 0x409   :  { %5982 = vmatprep.subr.bf16.mxu0 %v6147_v46  ;;  %6003 = vmatpush3.bf16.msra.mxu1 %v6162_v63 }
 0x40a   :  { %6004 = vmatprep.subr.bf16.mxu1 %v6163_v31 }
 0x40c   :  { %5983 = vmatpush3.bf16.msra.mxu0 %v6148_v47 }
 0x40d   :  { %5984 = vmatprep.subr.bf16.mxu0 %v6149_v23  ;;  %6005 = vmatpush3.bf16.msra.mxu1 %v6164_v8 }
 0x40e   :  { %6006 = vmatprep.subr.bf16.mxu1 %v6165_v44 }
 0x410   :  { %5985 = vmatpush3.bf16.msra.mxu0 %v6150_v49 }
 0x411   :  { %5986 = vmatprep.subr.bf16.mxu0 %v6151_v21  ;;  %6007 = vmatpush3.bf16.msra.mxu1 %v6166_v33 }
 0x412   :  { %6008 = vmatprep.subr.bf16.mxu1 %v6167_v60 }
 0x414   :  { %5987 = vmatpush3.bf16.msra.mxu0 %v6152_v25 }
 0x415   :  { %5988 = vmatprep.subr.bf16.mxu0 %v6153_v35  ;;  %6009 = vmatpush3.bf16.msra.mxu1 %v6168_v9 }
 0x416   :  { %6010 = vmatprep.subr.bf16.mxu1 %v6169_v53  ;;  %v6357_v53 = vmov 0  }
 0x417   :  { %6065 = vset.pattern.permute.xlu1 %v6357_v53  ;;  %6066 = vset.pattern.permute.xlu0 %v6357_v53 }
 0x418   :  { %5989 = vmatpush3.bf16.msra.mxu0 %v6154_v34 }
 0x419   :  { %5990 = vmatprep.subr.bf16.mxu0 %v6155_v48  ;;  %6011 = vmatpush3.bf16.msra.mxu1 %v6170_v5 }
 0x41a   :  { %6012 = vmatprep.subr.bf16.mxu1 %v6171_v13 }
 0x41c   :  { %5991 = vmatpush3.bf16.msra.mxu0 %v6156_v56 }
 0x41d   :  { %6013 = vmatpush3.bf16.msra.mxu1 %v6172_v14 }
 0x41f   :  { %v4306_v61 = vpop.f32.mrf.mxu0 }
 0x420   :  { %v4307_v0 = vadd.f32 %v4306_v61, %v4266_v41  ;;  %v4347_v1 = vpop.f32.mrf.mxu1 }
 0x421   :  { %v4308_v50 = vpop.f32.mrf.mxu0 }
 0x422   :  { %v4348_v40 = vadd.f32 %v4347_v1, %v4307_v0  ;;  %v4309_v2 = vadd.f32 %v4308_v50, %v4268_v51  ;;  %v4349_v3 = vpop.f32.mrf.mxu1 }
 0x423   :  { %v4310_v4 = vpop.f32.mrf.mxu0 }
 0x424   :  { %v4350_v6 = vadd.f32 %v4349_v3, %v4309_v2  ;;  %v4351_v7 = vpop.f32.mrf.mxu1  ;;  %v4522_v58 = vmax.f32 %v4348_v40, 0.0 }
 0x425   :  { %v4311_v11 = vpop.f32.mrf.mxu0 }
 0x426   :  { %v4523_v10 = vmax.f32 %v4350_v6, 0.0  ;;  %v4352_v12 = vpop.f32.mrf.mxu1  ;;  %v4530_v15 = vpack.c.bf16 %v4522_v58, %v4522_v58 }
 0x428   :  { %v4531_v22 = vpack.c.bf16 %v4523_v10, %v4523_v10 }
 0x42a   :  { %5165 = vmatprep.mubr.bf16.mxu0 %v4531_v22 }
 0x42b   :  { %5166 = vmatmul.mubr.bf16.vlgmr.msra.gmra.mxu0 %v4530_v15 }
 0x45f   :  { %v4388_v17 = vpop.f32.mrf.mxu0 }
 0x460   :  { %v4429_v18 = vpop.f32.mrf.mxu1  ;;  %v4389_v39 = vadd.f32 %v4388_v17, %v1289_v37 }
 0x461   :  { %v4390_v29 = vpop.f32.mrf.mxu0 }
 0x462   :  { %v4431_v19 = vpop.f32.mrf.mxu1  ;;  %v4391_v55 = vadd.f32 %v4390_v29, %v1293_v38  ;;  %v4430_v42 = vadd.f32 %v4429_v18, %v4389_v39 }
 0x463   :  { %v4392_v20 = vpop.f32.mrf.mxu0 }
 0x464   :  { %v4433_v24 = vpop.f32.mrf.mxu1  ;;  %v4432_v45 = vadd.f32 %v4431_v19, %v4391_v55 }
 0x465   :  { %v4393_v16 = vpop.f32.mrf.mxu0 }
 0x466   :  { %v4434_v26 = vpop.f32.mrf.mxu1 }
 0x49f   :  { %v4470_v43 = vpop.f32.mrf.mxu0 }
 0x4a0   :  { %v4471_v46 = vadd.f32 %v4470_v43, %v4430_v42  ;;  %v4511_v63 = vpop.f32.mrf.mxu1 }
 0x4a1   :  { %v4472_v31 = vpop.f32.mrf.mxu0 }
 0x4a2   :  { %v4512_v47 = vadd.f32 %v4511_v63, %v4471_v46  ;;  %v4473_v23 = vadd.f32 %v4472_v31, %v4432_v45  ;;  %v4513_v8 = vpop.f32.mrf.mxu1 }
 0x4a3   :  { %v4474_v44 = vpop.f32.mrf.mxu0 }
 0x4a4   :  { %v4514_v49 = vadd.f32 %v4513_v8, %v4473_v23  ;;  %v4515_v21 = vpop.f32.mrf.mxu1  ;;  %v4524_v33 = vmax.f32 %v4512_v47, 0.0 }
 0x4a5   :  { %v4475_v25 = vpop.f32.mrf.mxu0 }
 0x4a6   :  { %v4525_v35 = vmax.f32 %v4514_v49, 0.0  ;;  %v4516_v62 = vpop.f32.mrf.mxu1  ;;  %v4532_v52 = vpack.c.bf16 %v4524_v33, %v4524_v33 }
 0x4a8   :  { %v4533_v30 = vpack.c.bf16 %v4525_v35, %v4525_v35 }
 0x4aa   :  { %5205 = vmatprep.mubr.bf16.mxu1 %v4533_v30 }
 0x4ab   :  { %5206 = vmatmul.mubr.bf16.vlgmr.msra.gmra.mxu1 %v4532_v52 }
 0x4bf   :  { %v5948_v34 = vpop.f32.mrf.mxu0 }
 0x4c0   :  { %v5970_v48 = vpop.f32.mrf.mxu1 }
 0x4c1   :  { %v5949_v32 = vpop.f32.mrf.mxu0 }
 0x4c2   :  { %v5950_v36 = vadd.f32 %v5949_v32, %v5948_v34  ;;  %v5971_v56 = vpop.f32.mrf.mxu1 }
 0x4c3   :  { %v5972_v59 = vadd.f32 %v5971_v56, %v5970_v48  ;;  %v5951_v54 = vpop.f32.mrf.mxu0 }
 0x4c4   :  { %v5088_v41 = vadd.f32 %v5950_v36, %v5810_v57  ;;  %v5973_v60 = vpop.f32.mrf.mxu1 }
 0x4c5   :  { %v5952_v61 = vpop.f32.mrf.mxu0 }
 0x4c6   :  { %v5128_v9 = vadd.f32 %v5972_v59, %v5088_v41  ;;  %v5974_v51 = vpop.f32.mrf.mxu1 }
 0x4eb   :  { %v5992_v0 = vpop.f32.mrf.mxu0 }
 0x4ed   :  { %v5993_v1 = vpop.f32.mrf.mxu0 }
 0x4ee   :  { %v5994_v50 = vadd.f32 %v5993_v1, %v5992_v0 }
 0x4ef   :  { %v5995_v40 = vpop.f32.mrf.mxu0 }
 0x4f0   :  { %v5168_v2 = vadd.f32 %v5994_v50, %v5128_v9 }
 0x4f1   :  { %v5996_v3 = vpop.f32.mrf.mxu0 }
 0x56b   :  { %v6014_v4 = vpop.f32.mrf.mxu1 }
 0x56d   :  { %v6015_v5 = vpop.f32.mrf.mxu1 }
 0x56e   :  { %v6016_v6 = vadd.f32 %v6015_v5, %v6014_v4 }
 0x56f   :  { %v6017_v7 = vpop.f32.mrf.mxu1 }
 0x570   :  { %v5208_v58 = vadd.f32 %v6016_v6, %v5168_v2 }
 0x571   :  { %v6018_v11 = vpop.f32.mrf.mxu1 }
 0x572   :  { %5225 = vperm.xlu1 %6065, %v5208_v58   ;;  %5214 = vrot.lane.b32.xlu0 %v5208_v58, %s6358_s7 }
 0x5e4   :  { %v5215_v10 = vpop.permute.xlu0 %5214 }
 0x5e5   :  { %v5218_v12 = vsel %vm5217_vm8, %v5215_v10, 0.0 }
 0x5e6   :  { %5219 = vadd.xlane.f32.xlu0 %v5218_v12 }
 0x5ed   :  { %v5226_v15 = vpop.permute.xlu1 %5225 }
 0x66f   :  { %v5220_v13 = vpop.xlane.xlu0 %5219 }
 0x670   :  { %v5222_v14 = vmul.f32 0.25, %v5220_v13 }
 0x672   :  { %v5223_v22 = vsub.f32 %v5208_v58, %v5222_v14 }
 0x674   :  { %v5228_v17 = vadd.f32 %v5226_v15, %v5223_v22 }
 0x676   :  { %5230 = vrot.lane.b32.xlu1 %v5228_v17, %s6358_s7 }
 0x6e8   :  { %v5231_v18 = vpop.permute.xlu1 %5230 }
 0x6e9   :  { %5233 = vst.msk [vmem:[#allocation14] sm:$0x3] %vm5217_vm8, %v5231_v18 }
 0x6ea   :  { %6325 = shalt.err (!%p6322_p11)
}
 0x6eb   :  { %5243 = dma.vmem_to_hbm [thread:$0]  %s5241_s18, 32, %s6831_s9, [#allocation4]  }
 0x6ec   :  { %6342 = dma.done.wait [#allocation4], 32  }
 0x6ed   :  { %6343 = vsyncadd [#allocation4], 4294967264 }
 0x6ee   :  { %5247 = vsyncpa [#allocation3], 1 }
 0x6ef   :  { %5248 = vsyncpa [#allocation6], 1 }
 0x6f0   :  { %5249 = vsyncpa [#allocation9], 1 }
 0x6f1   :  { %5250 = vsyncpa [#allocation12], 1 }
 0x6f2   :  { %5251 = vsyncpa [#allocation4], 1 }

</bundles_post_ra>
